<compile_context>
chip_gen: v6e
topology: v6e:2x2x1
jax: 0.10.0
libtpu: 0.0.40
codegen_flags: <defaults>
</compile_context>

<pallas_src>
import jax
import jax.numpy as jnp
import numpy as np
from jax.experimental import pallas as pl
from jax.experimental.pallas import tpu as pltpu


def _conv3x3_im2col(pad_ref, w_ref, H, W, C):
    """3x3 'SAME' conv over a zero-padded (H+2, W+2, C) VMEM tile as ONE im2col
    matmul: (H*W, 9C) @ (9C, C), bf16 operands, f32 accumulation on the MXU."""
    taps = [pad_ref[dy:dy + H, dx:dx + W, :].reshape(H * W, C)
            for dy in range(3) for dx in range(3)]
    patches = jnp.concatenate(taps, axis=1).astype(jnp.bfloat16)      # (H*W, 9C)
    return jnp.dot(patches, w_ref[...], preferred_element_type=jnp.float32)


def resblock_kernel(x_ref, w1_ref, w2_ref, o_ref, xpad_ref, hpad_ref):
    """Fused y = x + conv2(relu(conv1(x))) for one NHWC image block."""
    _, H, W, C = x_ref.shape

    # conv1 halo: zero the padded scratch, copy the interior (SAME padding in VMEM).
    xpad_ref[...] = jnp.zeros_like(xpad_ref)
    xpad_ref[1:H + 1, 1:W + 1, :] = x_ref[0]
    h = jnp.maximum(_conv3x3_im2col(xpad_ref, w1_ref, H, W, C), 0.0)  # (H*W, C) f32

    # conv2 halo: the intermediate h never leaves VMEM.
    hpad_ref[...] = jnp.zeros_like(hpad_ref)
    hpad_ref[1:H + 1, 1:W + 1, :] = h.reshape(H, W, C)
    y = x_ref[0].reshape(H * W, C) + _conv3x3_im2col(hpad_ref, w2_ref, H, W, C)

    o_ref[...] = y.reshape(1, H, W, C)


def resblock_forward(x_nchw, w1_oihw, w2_oihw):
    """ResBlock forward. Inputs follow PyTorch conventions (NCHW x, OIHW weights)."""
    N, C, H, W = x_nchw.shape

    # Layout glue: NCHW -> NHWC for x (stays f32 for residual precision); weights
    # OIHW -> HWIO, folded to the (9C, C) im2col matrix, cast to bf16 for the MXU.
    # TODO(synk): if this block sits in an NHWC pipeline, drop these transposes.
    x = jnp.transpose(x_nchw, (0, 2, 3, 1)).astype(jnp.float32)       # (N, H, W, C)
    fold = lambda w: (jnp.transpose(w, (2, 3, 1, 0))
                      .reshape(9 * C, C).astype(jnp.bfloat16))
    w1, w2 = fold(w1_oihw), fold(w2_oihw)

    y = pl.pallas_call(
        resblock_kernel,
        out_shape=jax.ShapeDtypeStruct((N, H, W, C), jnp.float32),
        grid=(N,),
        in_specs=[
            pl.BlockSpec((1, H, W, C), lambda n: (n, 0, 0, 0)),       # one image / step
            pl.BlockSpec((9 * C, C), lambda n: (0, 0)),               # w1: VMEM-resident
            pl.BlockSpec((9 * C, C), lambda n: (0, 0)),               # w2: VMEM-resident
        ],
        out_specs=pl.BlockSpec((1, H, W, C), lambda n: (n, 0, 0, 0)),
        scratch_shapes=[
            pltpu.VMEM((H + 2, W + 2, C), jnp.float32),               # padded x tile
            pltpu.VMEM((H + 2, W + 2, C), jnp.float32),               # padded h tile
        ],
        input_output_aliases={0: 0},                                  # y reuses x's HBM buffer
        compiler_params=pltpu.CompilerParams(
            dimension_semantics=("parallel",),       # megacore: batch split across cores
            vmem_limit_bytes=32 * 1024 * 1024,
        ),
    )(x, w1, w2)

    return jnp.transpose(y, (0, 3, 1, 2))                             # back to NCHW


# ----------------------------- references (verification) -----------------------------

def _conv_nchw(a, w, preferred=None):
    return jax.lax.conv_general_dilated(
        a, w, window_strides=(1, 1), padding="SAME",
        dimension_numbers=("NCHW", "OIHW", "NCHW"),
        preferred_element_type=preferred)


def resblock_reference_f32(x, w1, w2):
    """Pure-f32 reference matching the torch module exactly."""
    return x + _conv_nchw(jax.nn.relu(_conv_nchw(x, w1)), w2)


def resblock_reference_mixed(x, w1, w2):
    """Reference with the kernel's precision policy: bf16 matmul operands,
    f32 accumulation, f32 ReLU and residual add."""
    bf = jnp.bfloat16
    h = jax.nn.relu(_conv_nchw(x.astype(bf), w1.astype(bf), jnp.float32))
    return x + _conv_nchw(h.astype(bf), w2.astype(bf), jnp.float32)


if __name__ == "__main__":
    # Small deterministic setup: batch=2, channels=4, spatial=16x16.
    N, C, H, W = 2, 4, 16, 16
    key = jax.random.PRNGKey(0)
    kx, k1, k2 = jax.random.split(key, 3)

    x = jax.random.normal(kx, (N, C, H, W), dtype=jnp.float32)
    # Deterministic conv weights, PyTorch OIHW shape (C, C, 3, 3), bias=False.
    fan_in = C * 3 * 3
    bound = 1.0 / np.sqrt(fan_in)
    w1 = jax.random.uniform(k1, (C, C, 3, 3), jnp.float32, -bound, bound)
    w2 = jax.random.uniform(k2, (C, C, 3, 3), jnp.float32, -bound, bound)

    out = jax.block_until_ready(jax.jit(resblock_forward)(x, w1, w2))

    # Tight check vs. a reference using the same mixed-precision policy.
    ref_mixed = resblock_reference_mixed(x, w1, w2)
    np.testing.assert_allclose(np.asarray(out), np.asarray(ref_mixed),
                               atol=1e-3, rtol=1e-3)

    # Looser check vs. exact f32 torch semantics (difference = bf16 operand rounding).
    ref_f32 = resblock_reference_f32(x, w1, w2)
    np.testing.assert_allclose(np.asarray(out), np.asarray(ref_f32),
                               atol=2e-2, rtol=2e-2)

    print("KERNEL_OK")
</pallas_src>

<mosaic_0001>
module attributes {stable_mosaic.version = 11 : i64} {
  func.func @resblock_kernel(%arg0: i32, %arg1: memref<1x16x16x4xf32, #tpu.memory_space<vmem>>, %arg2: memref<36x4xbf16, #tpu.memory_space<vmem>>, %arg3: memref<36x4xbf16, #tpu.memory_space<vmem>>, %arg4: memref<1x16x16x4xf32, #tpu.memory_space<vmem>>, %arg5: memref<18x18x4xf32, #tpu.memory_space<vmem>>, %arg6: memref<18x18x4xf32, #tpu.memory_space<vmem>>) attributes {dimension_semantics = [#tpu.dimension_semantics<parallel>], iteration_bounds = array<i64: 2>, scalar_prefetch = 0 : i64, scratch_operands = 2 : i64, tpu.core_type = #tpu.core_type<tc>, window_params = [{transform_indices = @transform_0, window_bounds = array<i64: 1, 16, 16, 4>}, {pipeline_mode = #tpu.pipeline_mode<synchronous>, transform_indices = @transform_1, window_bounds = array<i64: 36, 4>}, {pipeline_mode = #tpu.pipeline_mode<synchronous>, transform_indices = @transform_2, window_bounds = array<i64: 36, 4>}, {transform_indices = @transform_3, window_bounds = array<i64: 1, 16, 16, 4>}]} {
    %cst = arith.constant 0.000000e+00 : f32
    %0 = vector.broadcast %cst : f32 to vector<18x18x4xf32>
    %c0 = arith.constant 0 : index
    %c0_0 = arith.constant 0 : index
    %c0_1 = arith.constant 0 : index
    %1 = vector.load %arg5[%c0, %c0_0, %c0_1] : memref<18x18x4xf32, #tpu.memory_space<vmem>>, vector<18x18x4xf32>
    tpu.vector_store %arg5[%c0, %c0_0, %c0_1], %0 {strides = array<i32>} : memref<18x18x4xf32, #tpu.memory_space<vmem>>, vector<18x18x4xf32>,
    %c0_2 = arith.constant 0 : index
    %c0_3 = arith.constant 0 : index
    %c0_4 = arith.constant 0 : index
    %c0_5 = arith.constant 0 : index
    %2 = vector.load %arg1[%c0_2, %c0_3, %c0_4, %c0_5] : memref<1x16x16x4xf32, #tpu.memory_space<vmem>>, vector<1x16x16x4xf32>
    %3 = vector.shape_cast %2 : vector<1x16x16x4xf32> to vector<16x16x4xf32>
    %c1 = arith.constant 1 : index
    %c1_6 = arith.constant 1 : index
    %c0_7 = arith.constant 0 : index
    %4 = vector.load %arg5[%c1, %c1_6, %c0_7] : memref<18x18x4xf32, #tpu.memory_space<vmem>>, vector<16x16x4xf32>
    tpu.vector_store %arg5[%c1, %c1_6, %c0_7], %3 {strides = array<i32>} : memref<18x18x4xf32, #tpu.memory_space<vmem>>, vector<16x16x4xf32>,
    %c0_8 = arith.constant 0 : index
    %c0_9 = arith.constant 0 : index
    %c0_10 = arith.constant 0 : index
    %5 = vector.load %arg5[%c0_8, %c0_9, %c0_10] : memref<18x18x4xf32, #tpu.memory_space<vmem>>, vector<16x16x4xf32>
    %6 = vector.shape_cast %5 : vector<16x16x4xf32> to vector<256x4xf32>
    %c0_11 = arith.constant 0 : index
    %c1_12 = arith.constant 1 : index
    %c0_13 = arith.constant 0 : index
    %7 = vector.load %arg5[%c0_11, %c1_12, %c0_13] : memref<18x18x4xf32, #tpu.memory_space<vmem>>, vector<16x16x4xf32>
    %8 = vector.shape_cast %7 : vector<16x16x4xf32> to vector<256x4xf32>
    %c0_14 = arith.constant 0 : index
    %c2 = arith.constant 2 : index
    %c0_15 = arith.constant 0 : index
    %9 = vector.load %arg5[%c0_14, %c2, %c0_15] : memref<18x18x4xf32, #tpu.memory_space<vmem>>, vector<16x16x4xf32>
    %10 = vector.shape_cast %9 : vector<16x16x4xf32> to vector<256x4xf32>
    %c1_16 = arith.constant 1 : index
    %c0_17 = arith.constant 0 : index
    %c0_18 = arith.constant 0 : index
    %11 = vector.load %arg5[%c1_16, %c0_17, %c0_18] : memref<18x18x4xf32, #tpu.memory_space<vmem>>, vector<16x16x4xf32>
    %12 = vector.shape_cast %11 : vector<16x16x4xf32> to vector<256x4xf32>
    %c1_19 = arith.constant 1 : index
    %c1_20 = arith.constant 1 : index
    %c0_21 = arith.constant 0 : index
    %13 = vector.load %arg5[%c1_19, %c1_20, %c0_21] : memref<18x18x4xf32, #tpu.memory_space<vmem>>, vector<16x16x4xf32>
    %14 = vector.shape_cast %13 : vector<16x16x4xf32> to vector<256x4xf32>
    %c1_22 = arith.constant 1 : index
    %c2_23 = arith.constant 2 : index
    %c0_24 = arith.constant 0 : index
    %15 = vector.load %arg5[%c1_22, %c2_23, %c0_24] : memref<18x18x4xf32, #tpu.memory_space<vmem>>, vector<16x16x4xf32>
    %16 = vector.shape_cast %15 : vector<16x16x4xf32> to vector<256x4xf32>
    %c2_25 = arith.constant 2 : index
    %c0_26 = arith.constant 0 : index
    %c0_27 = arith.constant 0 : index
    %17 = vector.load %arg5[%c2_25, %c0_26, %c0_27] : memref<18x18x4xf32, #tpu.memory_space<vmem>>, vector<16x16x4xf32>
    %18 = vector.shape_cast %17 : vector<16x16x4xf32> to vector<256x4xf32>
    %c2_28 = arith.constant 2 : index
    %c1_29 = arith.constant 1 : index
    %c0_30 = arith.constant 0 : index
    %19 = vector.load %arg5[%c2_28, %c1_29, %c0_30] : memref<18x18x4xf32, #tpu.memory_space<vmem>>, vector<16x16x4xf32>
    %20 = vector.shape_cast %19 : vector<16x16x4xf32> to vector<256x4xf32>
    %c2_31 = arith.constant 2 : index
    %c2_32 = arith.constant 2 : index
    %c0_33 = arith.constant 0 : index
    %21 = vector.load %arg5[%c2_31, %c2_32, %c0_33] : memref<18x18x4xf32, #tpu.memory_space<vmem>>, vector<16x16x4xf32>
    %22 = vector.shape_cast %21 : vector<16x16x4xf32> to vector<256x4xf32>
    %23 = tpu.concatenate %6, %8, %10, %12, %14, %16, %18, %20, %22 in 1 : vector<256x4xf32>, vector<256x4xf32>, vector<256x4xf32>, vector<256x4xf32>, vector<256x4xf32>, vector<256x4xf32>, vector<256x4xf32>, vector<256x4xf32>, vector<256x4xf32> -> vector<256x36xf32>
    %24 = arith.truncf %23 : vector<256x36xf32> to vector<256x36xbf16>
    %c0_34 = arith.constant 0 : index
    %c0_35 = arith.constant 0 : index
    %25 = vector.load %arg2[%c0_34, %c0_35] : memref<36x4xbf16, #tpu.memory_space<vmem>>, vector<36x4xbf16>
    %cst_36 = arith.constant dense<0.000000e+00> : vector<256x4xf32>
    %26 = tpu.matmul %24, %25, %cst_36 {dimension_numbers = #tpu.dot_dimension_numbers<[1], [0], [0], [1], [0, 0, 1, 1], [], []>} : vector<256x36xbf16>, vector<36x4xbf16>, vector<256x4xf32> -> vector<256x4xf32>
    %cst_37 = arith.constant 0.000000e+00 : f32
    %27 = vector.broadcast %cst_37 : f32 to vector<256x4xf32>
    %28 = arith.maximumf %26, %27 : vector<256x4xf32>
    %cst_38 = arith.constant 0.000000e+00 : f32
    %29 = vector.broadcast %cst_38 : f32 to vector<18x18x4xf32>
    %c0_39 = arith.constant 0 : index
    %c0_40 = arith.constant 0 : index
    %c0_41 = arith.constant 0 : index
    %30 = vector.load %arg6[%c0_39, %c0_40, %c0_41] : memref<18x18x4xf32, #tpu.memory_space<vmem>>, vector<18x18x4xf32>
    tpu.vector_store %arg6[%c0_39, %c0_40, %c0_41], %29 {strides = array<i32>} : memref<18x18x4xf32, #tpu.memory_space<vmem>>, vector<18x18x4xf32>,
    %31 = vector.shape_cast %28 : vector<256x4xf32> to vector<16x16x4xf32>
    %c1_42 = arith.constant 1 : index
    %c1_43 = arith.constant 1 : index
    %c0_44 = arith.constant 0 : index
    %32 = vector.load %arg6[%c1_42, %c1_43, %c0_44] : memref<18x18x4xf32, #tpu.memory_space<vmem>>, vector<16x16x4xf32>
    tpu.vector_store %arg6[%c1_42, %c1_43, %c0_44], %31 {strides = array<i32>} : memref<18x18x4xf32, #tpu.memory_space<vmem>>, vector<16x16x4xf32>,
    %c0_45 = arith.constant 0 : index
    %c0_46 = arith.constant 0 : index
    %c0_47 = arith.constant 0 : index
    %c0_48 = arith.constant 0 : index
    %33 = vector.load %arg1[%c0_45, %c0_46, %c0_47, %c0_48] : memref<1x16x16x4xf32, #tpu.memory_space<vmem>>, vector<1x16x16x4xf32>
    %34 = vector.shape_cast %33 : vector<1x16x16x4xf32> to vector<16x16x4xf32>
    %35 = vector.shape_cast %34 : vector<16x16x4xf32> to vector<256x4xf32>
    %c0_49 = arith.constant 0 : index
    %c0_50 = arith.constant 0 : index
    %c0_51 = arith.constant 0 : index
    %36 = vector.load %arg6[%c0_49, %c0_50, %c0_51] : memref<18x18x4xf32, #tpu.memory_space<vmem>>, vector<16x16x4xf32>
    %37 = vector.shape_cast %36 : vector<16x16x4xf32> to vector<256x4xf32>
    %c0_52 = arith.constant 0 : index
    %c1_53 = arith.constant 1 : index
    %c0_54 = arith.constant 0 : index
    %38 = vector.load %arg6[%c0_52, %c1_53, %c0_54] : memref<18x18x4xf32, #tpu.memory_space<vmem>>, vector<16x16x4xf32>
    %39 = vector.shape_cast %38 : vector<16x16x4xf32> to vector<256x4xf32>
    %c0_55 = arith.constant 0 : index
    %c2_56 = arith.constant 2 : index
    %c0_57 = arith.constant 0 : index
    %40 = vector.load %arg6[%c0_55, %c2_56, %c0_57] : memref<18x18x4xf32, #tpu.memory_space<vmem>>, vector<16x16x4xf32>
    %41 = vector.shape_cast %40 : vector<16x16x4xf32> to vector<256x4xf32>
    %c1_58 = arith.constant 1 : index
    %c0_59 = arith.constant 0 : index
    %c0_60 = arith.constant 0 : index
    %42 = vector.load %arg6[%c1_58, %c0_59, %c0_60] : memref<18x18x4xf32, #tpu.memory_space<vmem>>, vector<16x16x4xf32>
    %43 = vector.shape_cast %42 : vector<16x16x4xf32> to vector<256x4xf32>
    %c1_61 = arith.constant 1 : index
    %c1_62 = arith.constant 1 : index
    %c0_63 = arith.constant 0 : index
    %44 = vector.load %arg6[%c1_61, %c1_62, %c0_63] : memref<18x18x4xf32, #tpu.memory_space<vmem>>, vector<16x16x4xf32>
    %45 = vector.shape_cast %44 : vector<16x16x4xf32> to vector<256x4xf32>
    %c1_64 = arith.constant 1 : index
    %c2_65 = arith.constant 2 : index
    %c0_66 = arith.constant 0 : index
    %46 = vector.load %arg6[%c1_64, %c2_65, %c0_66] : memref<18x18x4xf32, #tpu.memory_space<vmem>>, vector<16x16x4xf32>
    %47 = vector.shape_cast %46 : vector<16x16x4xf32> to vector<256x4xf32>
    %c2_67 = arith.constant 2 : index
    %c0_68 = arith.constant 0 : index
    %c0_69 = arith.constant 0 : index
    %48 = vector.load %arg6[%c2_67, %c0_68, %c0_69] : memref<18x18x4xf32, #tpu.memory_space<vmem>>, vector<16x16x4xf32>
    %49 = vector.shape_cast %48 : vector<16x16x4xf32> to vector<256x4xf32>
    %c2_70 = arith.constant 2 : index
    %c1_71 = arith.constant 1 : index
    %c0_72 = arith.constant 0 : index
    %50 = vector.load %arg6[%c2_70, %c1_71, %c0_72] : memref<18x18x4xf32, #tpu.memory_space<vmem>>, vector<16x16x4xf32>
    %51 = vector.shape_cast %50 : vector<16x16x4xf32> to vector<256x4xf32>
    %c2_73 = arith.constant 2 : index
    %c2_74 = arith.constant 2 : index
    %c0_75 = arith.constant 0 : index
    %52 = vector.load %arg6[%c2_73, %c2_74, %c0_75] : memref<18x18x4xf32, #tpu.memory_space<vmem>>, vector<16x16x4xf32>
    %53 = vector.shape_cast %52 : vector<16x16x4xf32> to vector<256x4xf32>
    %54 = tpu.concatenate %37, %39, %41, %43, %45, %47, %49, %51, %53 in 1 : vector<256x4xf32>, vector<256x4xf32>, vector<256x4xf32>, vector<256x4xf32>, vector<256x4xf32>, vector<256x4xf32>, vector<256x4xf32>, vector<256x4xf32>, vector<256x4xf32> -> vector<256x36xf32>
    %55 = arith.truncf %54 : vector<256x36xf32> to vector<256x36xbf16>
    %c0_76 = arith.constant 0 : index
    %c0_77 = arith.constant 0 : index
    %56 = vector.load %arg3[%c0_76, %c0_77] : memref<36x4xbf16, #tpu.memory_space<vmem>>, vector<36x4xbf16>
    %cst_78 = arith.constant dense<0.000000e+00> : vector<256x4xf32>
    %57 = tpu.matmul %55, %56, %cst_78 {dimension_numbers = #tpu.dot_dimension_numbers<[1], [0], [0], [1], [0, 0, 1, 1], [], []>} : vector<256x36xbf16>, vector<36x4xbf16>, vector<256x4xf32> -> vector<256x4xf32>
    %58 = arith.addf %35, %57 : vector<256x4xf32>
    %59 = vector.shape_cast %58 : vector<256x4xf32> to vector<1x16x16x4xf32>
    %c0_79 = arith.constant 0 : index
    %c0_80 = arith.constant 0 : index
    %c0_81 = arith.constant 0 : index
    %c0_82 = arith.constant 0 : index
    %60 = vector.load %arg4[%c0_79, %c0_80, %c0_81, %c0_82] : memref<1x16x16x4xf32, #tpu.memory_space<vmem>>, vector<1x16x16x4xf32>
    tpu.vector_store %arg4[%c0_79, %c0_80, %c0_81, %c0_82], %59 {strides = array<i32>} : memref<1x16x16x4xf32, #tpu.memory_space<vmem>>, vector<1x16x16x4xf32>,
    return
  }
  func.func @transform_0(%arg0: i32) -> (i32, i32, i32, i32) {
    %c0_i32 = arith.constant 0 : i32
    %c0_i32_0 = arith.constant 0 : i32
    %c0_i32_1 = arith.constant 0 : i32
    %c0_i32_2 = arith.constant 0 : i32
    return %arg0, %c0_i32, %c0_i32_0, %c0_i32_1 : i32, i32, i32, i32
  }
  func.func @transform_1(%arg0: i32) -> (i32, i32) {
    %c0_i32 = arith.constant 0 : i32
    %c0_i32_0 = arith.constant 0 : i32
    %c0_i32_1 = arith.constant 0 : i32
    return %c0_i32, %c0_i32_0 : i32, i32
  }
  func.func @transform_2(%arg0: i32) -> (i32, i32) {
    %c0_i32 = arith.constant 0 : i32
    %c0_i32_0 = arith.constant 0 : i32
    %c0_i32_1 = arith.constant 0 : i32
    return %c0_i32, %c0_i32_0 : i32, i32
  }
  func.func @transform_3(%arg0: i32) -> (i32, i32, i32, i32) {
    %c0_i32 = arith.constant 0 : i32
    %c0_i32_0 = arith.constant 0 : i32
    %c0_i32_1 = arith.constant 0 : i32
    %c0_i32_2 = arith.constant 0 : i32
    return %arg0, %c0_i32, %c0_i32_0, %c0_i32_1 : i32, i32, i32, i32
  }
}

</mosaic_0001>

<bundles_post_ra>
// kernel: resblock_forward.1
= control target key start
LH: loop header
LB: loop body
LE: loop exit
PB: predicated region body
PF: predicated region fallthrough
CT: control target
= control target key end

     0   :  { %s5715_s12 = smov 0   ;;  %s8650_s0 = inlined_call_operand.vmem [shape: f32[2,16,16,4], index: 0, kind: input, shape index: {}, may-alias: {0,3}]   ;;  %s8651_s1 = inlined_call_operand.vmem [shape: bf16[36,4], index: 1, kind: input, shape index: {}]   ;;  %s8652_s2 = inlined_call_operand.vmem [shape: bf16[36,4], index: 2, kind: input, shape index: {}]   ;;  %s8653_s3 = inlined_call_operand.vmem [shape: f32[2,16,16,4], index: 3, kind: output, shape index: {}, may-alias: {0,3}]  }
   0x1 LB: > { %s4206_s13 = sadd.s32 4294967295, %s5684_s12   ;;  %p4210_p0 = scmp.ge.s32.totalorder %s5684_s12, 1  ;;  %s5684_s12 = sphi %s5715_s12, %s13_s12  }
   0x2   : > { %p137_p1 = scmp.lt.s32.totalorder %s5684_s12, 3 }
   0x4   : > { %p138_p2 = pnand %p4210_p0, %p137_p1 }
   0x6   : > { %141 = sbr.rel (%p138_p2) target bundleno = 1192 (0x4a8), region = 32 }
   0xb   : > { %vm172_vm0 = vcmask 31744   ;;  %vm175_vm1 = vcmask 25600   ;;  %p5725_p3 = scmp.lt.s32.totalorder %s4206_s13, 1  ;;  %v5686_v0 = vmov 0.0   ;;  %s5687_s19 = smov 4   ;;  %vm1954_vm2 = vcmask 1041408  }
   0xc   : > { %173 = vst.msk [vmem:[#allocation2] sm:$0xff] %vm172_vm0, %v5686_v0  ;;  %174 = vst.msk [vmem:[#allocation2 + $0x8] sm:$0xff] %vm172_vm0, %v5686_v0  ;;  %s5688_s20 = smov 8   ;;  %s5689_s21 = smov 12   ;;  %vm1638_vm3 = vcmask 64512   ;;  %vm1671_vm4 = vcmask 97280  }
   0xd   : > { %176 = vst.msk [vmem:[#allocation2 + $0x10] sm:$0x3] %vm175_vm1, %v5686_v0  ;;  %179 = vst.msk [vmem:[#allocation2 + $0x28] sm:$0x3] %vm175_vm1, %v5686_v0  ;;  %s8917_s13 = smov (!%p5725_p3, %s4206_s13), 1  ;;  %s5690_s22 = smov 16  }
   0xe   : > { %177 = vst.msk [vmem:[#allocation2 + $0x18] sm:$0xff] %vm172_vm0, %v5686_v0  ;;  %178 = vst.msk [vmem:[#allocation2 + $0x20] sm:$0xff] %vm172_vm0, %v5686_v0  ;;  %s4255_s15 = sshll.u32 %s8917_s13, 8  ;;  %s5691_s23 = smov 20   ;;  %vm1704_vm5 = vcmask 130048   ;;  %vm1737_vm6 = vcmask 162816  }
   0xf   : > { %180 = vst.msk [vmem:[#allocation2 + $0x30] sm:$0xff] %vm172_vm0, %v5686_v0  ;;  %181 = vst.msk [vmem:[#allocation2 + $0x38] sm:$0xff] %vm172_vm0, %v5686_v0  ;;  %s5957_s18 = scalar_lea.vmem %s8650_s0, %s4255_s15  ;;  %s5692_s24 = smov 24   ;;  %vm1770_vm7 = vcmask 195584   ;;  %vm1803_vm8 = vcmask 228352   ;;  %vm1836_vm9 = vcmask 261120  }
  0x10   : > { %182 = vst.msk [vmem:[#allocation2 + $0x40] sm:$0x3] %vm175_vm1, %v5686_v0  ;;  %185 = vst.msk [vmem:[#allocation2 + $0x58] sm:$0x3] %vm175_vm1, %v5686_v0  ;;  %v230_v1 = vld [vmem:[%s5957_s18 + $0x10] sm:$0xff]  ;;  %v231_v2 = vld [vmem:[%s5957_s18 + $0x18] sm:$0xff]  ;;  %s8521_s17 = scalar_lea.vmem %s8653_s3, %s4255_s15 }
  0x11   : > { %183 = vst.msk [vmem:[#allocation2 + $0x48] sm:$0xff] %vm172_vm0, %v5686_v0  ;;  %184 = vst.msk [vmem:[#allocation2 + $0x50] sm:$0xff] %vm172_vm0, %v5686_v0  ;;  %v228_v3 = vld [vmem:[%s5957_s18] sm:$0xff]  ;;  %v229_v4 = vld [vmem:[%s5957_s18 + $0x8] sm:$0xff]  ;;  %s5693_s25 = smov 28   ;;  %s5694_s5 = smov 32  }
  0x12   : > { %186 = vst.msk [vmem:[#allocation2 + $0x60] sm:$0xff] %vm172_vm0, %v5686_v0  ;;  %187 = vst.msk [vmem:[#allocation2 + $0x68] sm:$0xff] %vm172_vm0, %v5686_v0  ;;  %v232_v5 = vld [vmem:[%s5957_s18 + $0x20] sm:$0xff]  ;;  %v233_v6 = vld [vmem:[%s5957_s18 + $0x28] sm:$0xff]  ;;  %vm1905_vm10 = vcmask 293888  }
  0x13   : > { %188 = vst.msk [vmem:[#allocation2 + $0x70] sm:$0x3] %vm175_vm1, %v5686_v0  ;;  %191 = vst.msk [vmem:[#allocation2 + $0x88] sm:$0x3] %vm175_vm1, %v5686_v0  ;;  %v325_v7 = vld [vmem:[#allocation2 + $0x1] sm:$0xff]  ;;  %v234_v9 = vld [vmem:[%s5957_s18 + $0x30] sm:$0xff] }
  0x14   : > { %189 = vst.msk [vmem:[#allocation2 + $0x78] sm:$0xff] %vm172_vm0, %v5686_v0  ;;  %190 = vst.msk [vmem:[#allocation2 + $0x80] sm:$0xff] %vm172_vm0, %v5686_v0  ;;  %v326_v8 = vld [vmem:[#allocation2 + $0x9] sm:$0xff]  ;;  %v235_v11 = vld [vmem:[%s5957_s18 + $0x38] sm:$0xff] }
  0x15   : > { %192 = vst.msk [vmem:[#allocation2 + $0x90] sm:$0xff] %vm172_vm0, %v5686_v0  ;;  %193 = vst.msk [vmem:[#allocation2 + $0x98] sm:$0xff] %vm172_vm0, %v5686_v0  ;;  %v4390_v10 = vpack.i.bf16 %v326_v8, %v325_v7  ;;  %v236_v12 = vld [vmem:[%s5957_s18 + $0x40] sm:$0xff]  ;;  %v237_v13 = vld [vmem:[%s5957_s18 + $0x48] sm:$0xff] }
  0x16   : > { %194 = vst.msk [vmem:[#allocation2 + $0xa0] sm:$0x3] %vm175_vm1, %v5686_v0  ;;  %197 = vst.msk [vmem:[#allocation2 + $0xb8] sm:$0x3] %vm175_vm1, %v5686_v0  ;;  %v238_v14 = vld [vmem:[%s5957_s18 + $0x50] sm:$0xff]  ;;  %v239_v15 = vld [vmem:[%s5957_s18 + $0x58] sm:$0xff] }
  0x17   : > { %195 = vst.msk [vmem:[#allocation2 + $0xa8] sm:$0xff] %vm172_vm0, %v5686_v0  ;;  %196 = vst.msk [vmem:[#allocation2 + $0xb0] sm:$0xff] %vm172_vm0, %v5686_v0  ;;  %v240_v16 = vld [vmem:[%s5957_s18 + $0x60] sm:$0xff]  ;;  %4391 = vrot.lane.b32.xlu0 %v4390_v10, %s5687_s19  ;;  %v241_v17 = vld [vmem:[%s5957_s18 + $0x68] sm:$0xff] }
  0x18   : > { %198 = vst.msk [vmem:[#allocation2 + $0xc0] sm:$0xff] %vm172_vm0, %v5686_v0  ;;  %199 = vst.msk [vmem:[#allocation2 + $0xc8] sm:$0xff] %vm172_vm0, %v5686_v0  ;;  %v242_v18 = vld [vmem:[%s5957_s18 + $0x70] sm:$0xff]  ;;  %v243_v19 = vld [vmem:[%s5957_s18 + $0x78] sm:$0xff] }
  0x19   : > { %200 = vst.msk [vmem:[#allocation2 + $0xd0] sm:$0x3] %vm175_vm1, %v5686_v0  ;;  %203 = vst.msk [vmem:[#allocation2 + $0xe8] sm:$0x3] %vm175_vm1, %v5686_v0  ;;  %v244_v20 = vld [vmem:[%s5957_s18 + $0x80] sm:$0xff]  ;;  %v245_v21 = vld [vmem:[%s5957_s18 + $0x88] sm:$0xff] }
  0x1a   : > { %201 = vst.msk [vmem:[#allocation2 + $0xd8] sm:$0xff] %vm172_vm0, %v5686_v0  ;;  %202 = vst.msk [vmem:[#allocation2 + $0xe0] sm:$0xff] %vm172_vm0, %v5686_v0  ;;  %v246_v22 = vld [vmem:[%s5957_s18 + $0x90] sm:$0xff]  ;;  %v247_v23 = vld [vmem:[%s5957_s18 + $0x98] sm:$0xff] }
  0x1b   : > { %204 = vst.msk [vmem:[#allocation2 + $0xf0] sm:$0xff] %vm172_vm0, %v5686_v0  ;;  %205 = vst.msk [vmem:[#allocation2 + $0xf8] sm:$0xff] %vm172_vm0, %v5686_v0  ;;  %v248_v24 = vld [vmem:[%s5957_s18 + $0xa0] sm:$0xff]  ;;  %v249_v25 = vld [vmem:[%s5957_s18 + $0xa8] sm:$0xff] }
  0x1c   : > { %206 = vst.msk [vmem:[#allocation2 + $0x100] sm:$0x3] %vm175_vm1, %v5686_v0  ;;  %209 = vst.msk [vmem:[#allocation2 + $0x118] sm:$0x3] %vm175_vm1, %v5686_v0  ;;  %v250_v35 = vld [vmem:[%s5957_s18 + $0xb0] sm:$0xff]  ;;  %v251_v36 = vld [vmem:[%s5957_s18 + $0xb8] sm:$0xff] }
  0x1d   : > { %207 = vst.msk [vmem:[#allocation2 + $0x108] sm:$0xff] %vm172_vm0, %v5686_v0  ;;  %208 = vst.msk [vmem:[#allocation2 + $0x110] sm:$0xff] %vm172_vm0, %v5686_v0  ;;  %v252_v50 = vld [vmem:[%s5957_s18 + $0xc0] sm:$0xff]  ;;  %v253_v51 = vld [vmem:[%s5957_s18 + $0xc8] sm:$0xff] }
  0x1e   : > { %210 = vst.msk [vmem:[#allocation2 + $0x120] sm:$0xff] %vm172_vm0, %v5686_v0  ;;  %211 = vst.msk [vmem:[#allocation2 + $0x128] sm:$0xff] %vm172_vm0, %v5686_v0  ;;  %v254_v52 = vld [vmem:[%s5957_s18 + $0xd0] sm:$0xff]  ;;  %v255_v53 = vld [vmem:[%s5957_s18 + $0xd8] sm:$0xff] }
  0x1f   : > { %212 = vst.msk [vmem:[#allocation2 + $0x130] sm:$0x3] %vm175_vm1, %v5686_v0  ;;  %215 = vst.msk [vmem:[#allocation2 + $0x148] sm:$0x3] %vm175_vm1, %v5686_v0  ;;  %v256_v54 = vld [vmem:[%s5957_s18 + $0xe0] sm:$0xff]  ;;  %v257_v55 = vld [vmem:[%s5957_s18 + $0xe8] sm:$0xff] }
  0x20   : > { %213 = vst.msk [vmem:[#allocation2 + $0x138] sm:$0xff] %vm172_vm0, %v5686_v0  ;;  %214 = vst.msk [vmem:[#allocation2 + $0x140] sm:$0xff] %vm172_vm0, %v5686_v0 }
  0x21   : > { %216 = vst.msk [vmem:[#allocation2 + $0x150] sm:$0xff] %vm172_vm0, %v5686_v0  ;;  %217 = vst.msk [vmem:[#allocation2 + $0x158] sm:$0xff] %vm172_vm0, %v5686_v0 }
  0x22   : > { %218 = vst.msk [vmem:[#allocation2 + $0x160] sm:$0x3] %vm175_vm1, %v5686_v0  ;;  %221 = vst.msk [vmem:[#allocation2 + $0x178] sm:$0x3] %vm175_vm1, %v5686_v0 }
  0x23   : > { %219 = vst.msk [vmem:[#allocation2 + $0x168] sm:$0xff] %vm172_vm0, %v5686_v0  ;;  %220 = vst.msk [vmem:[#allocation2 + $0x170] sm:$0xff] %vm172_vm0, %v5686_v0 }
  0x24   : > { %222 = vst.msk [vmem:[#allocation2 + $0x180] sm:$0xff] %vm172_vm0, %v5686_v0  ;;  %223 = vst.msk [vmem:[#allocation2 + $0x188] sm:$0xff] %vm172_vm0, %v5686_v0 }
  0x25   : > { %224 = vst.msk [vmem:[#allocation2 + $0x190] sm:$0x3] %vm175_vm1, %v5686_v0  ;;  %227 = vst.msk [vmem:[#allocation2 + $0x1a8] sm:$0x3] %vm175_vm1, %v5686_v0 }
  0x26   : > { %225 = vst.msk [vmem:[#allocation2 + $0x198] sm:$0xff] %vm172_vm0, %v5686_v0  ;;  %226 = vst.msk [vmem:[#allocation2 + $0x1a0] sm:$0xff] %vm172_vm0, %v5686_v0 }
  0x27   : > { %2151 = vst.msk [vmem:[#allocation3] sm:$0xff] %vm172_vm0, %v5686_v0  ;;  %2152 = vst.msk [vmem:[#allocation3 + $0x8] sm:$0xff] %vm172_vm0, %v5686_v0 }
  0x28   : > { %2153 = vst.msk [vmem:[#allocation3 + $0x10] sm:$0x3] %vm175_vm1, %v5686_v0  ;;  %2156 = vst.msk [vmem:[#allocation3 + $0x28] sm:$0x3] %vm175_vm1, %v5686_v0 }
  0x29   : > { %2154 = vst.msk [vmem:[#allocation3 + $0x18] sm:$0xff] %vm172_vm0, %v5686_v0  ;;  %2155 = vst.msk [vmem:[#allocation3 + $0x20] sm:$0xff] %vm172_vm0, %v5686_v0 }
  0x2a   : > { %2157 = vst.msk [vmem:[#allocation3 + $0x30] sm:$0xff] %vm172_vm0, %v5686_v0  ;;  %2158 = vst.msk [vmem:[#allocation3 + $0x38] sm:$0xff] %vm172_vm0, %v5686_v0 }
  0x2b   : > { %2159 = vst.msk [vmem:[#allocation3 + $0x40] sm:$0x3] %vm175_vm1, %v5686_v0  ;;  %2162 = vst.msk [vmem:[#allocation3 + $0x58] sm:$0x3] %vm175_vm1, %v5686_v0 }
  0x2c   : > { %2160 = vst.msk [vmem:[#allocation3 + $0x48] sm:$0xff] %vm172_vm0, %v5686_v0  ;;  %2161 = vst.msk [vmem:[#allocation3 + $0x50] sm:$0xff] %vm172_vm0, %v5686_v0 }
  0x2d   : > { %2163 = vst.msk [vmem:[#allocation3 + $0x60] sm:$0xff] %vm172_vm0, %v5686_v0  ;;  %2164 = vst.msk [vmem:[#allocation3 + $0x68] sm:$0xff] %vm172_vm0, %v5686_v0 }
  0x2e   : > { %2165 = vst.msk [vmem:[#allocation3 + $0x70] sm:$0x3] %vm175_vm1, %v5686_v0  ;;  %2168 = vst.msk [vmem:[#allocation3 + $0x88] sm:$0x3] %vm175_vm1, %v5686_v0 }
  0x2f   : > { %2166 = vst.msk [vmem:[#allocation3 + $0x78] sm:$0xff] %vm172_vm0, %v5686_v0  ;;  %2167 = vst.msk [vmem:[#allocation3 + $0x80] sm:$0xff] %vm172_vm0, %v5686_v0 }
  0x30   : > { %2169 = vst.msk [vmem:[#allocation3 + $0x90] sm:$0xff] %vm172_vm0, %v5686_v0  ;;  %2170 = vst.msk [vmem:[#allocation3 + $0x98] sm:$0xff] %vm172_vm0, %v5686_v0 }
  0x31   : > { %2171 = vst.msk [vmem:[#allocation3 + $0xa0] sm:$0x3] %vm175_vm1, %v5686_v0  ;;  %2174 = vst.msk [vmem:[#allocation3 + $0xb8] sm:$0x3] %vm175_vm1, %v5686_v0 }
  0x32   : > { %2172 = vst.msk [vmem:[#allocation3 + $0xa8] sm:$0xff] %vm172_vm0, %v5686_v0  ;;  %2173 = vst.msk [vmem:[#allocation3 + $0xb0] sm:$0xff] %vm172_vm0, %v5686_v0 }
  0x33   : > { %2175 = vst.msk [vmem:[#allocation3 + $0xc0] sm:$0xff] %vm172_vm0, %v5686_v0  ;;  %2176 = vst.msk [vmem:[#allocation3 + $0xc8] sm:$0xff] %vm172_vm0, %v5686_v0 }
  0x34   : > { %2177 = vst.msk [vmem:[#allocation3 + $0xd0] sm:$0x3] %vm175_vm1, %v5686_v0  ;;  %2180 = vst.msk [vmem:[#allocation3 + $0xe8] sm:$0x3] %vm175_vm1, %v5686_v0 }
  0x35   : > { %2178 = vst.msk [vmem:[#allocation3 + $0xd8] sm:$0xff] %vm172_vm0, %v5686_v0  ;;  %2179 = vst.msk [vmem:[#allocation3 + $0xe0] sm:$0xff] %vm172_vm0, %v5686_v0 }
  0x36   : > { %2181 = vst.msk [vmem:[#allocation3 + $0xf0] sm:$0xff] %vm172_vm0, %v5686_v0  ;;  %2182 = vst.msk [vmem:[#allocation3 + $0xf8] sm:$0xff] %vm172_vm0, %v5686_v0 }
  0x37   : > { %2183 = vst.msk [vmem:[#allocation3 + $0x100] sm:$0x3] %vm175_vm1, %v5686_v0  ;;  %2186 = vst.msk [vmem:[#allocation3 + $0x118] sm:$0x3] %vm175_vm1, %v5686_v0 }
  0x38   : > { %2184 = vst.msk [vmem:[#allocation3 + $0x108] sm:$0xff] %vm172_vm0, %v5686_v0  ;;  %2185 = vst.msk [vmem:[#allocation3 + $0x110] sm:$0xff] %vm172_vm0, %v5686_v0 }
  0x39   : > { %2187 = vst.msk [vmem:[#allocation3 + $0x120] sm:$0xff] %vm172_vm0, %v5686_v0  ;;  %2188 = vst.msk [vmem:[#allocation3 + $0x128] sm:$0xff] %vm172_vm0, %v5686_v0 }
  0x3a   : > { %2189 = vst.msk [vmem:[#allocation3 + $0x130] sm:$0x3] %vm175_vm1, %v5686_v0  ;;  %2192 = vst.msk [vmem:[#allocation3 + $0x148] sm:$0x3] %vm175_vm1, %v5686_v0 }
  0x3b   : > { %2190 = vst.msk [vmem:[#allocation3 + $0x138] sm:$0xff] %vm172_vm0, %v5686_v0  ;;  %2191 = vst.msk [vmem:[#allocation3 + $0x140] sm:$0xff] %vm172_vm0, %v5686_v0 }
  0x3c   : > { %2193 = vst.msk [vmem:[#allocation3 + $0x150] sm:$0xff] %vm172_vm0, %v5686_v0  ;;  %2194 = vst.msk [vmem:[#allocation3 + $0x158] sm:$0xff] %vm172_vm0, %v5686_v0 }
  0x3d   : > { %2195 = vst.msk [vmem:[#allocation3 + $0x160] sm:$0x3] %vm175_vm1, %v5686_v0  ;;  %2198 = vst.msk [vmem:[#allocation3 + $0x178] sm:$0x3] %vm175_vm1, %v5686_v0 }
  0x3e   : > { %2196 = vst.msk [vmem:[#allocation3 + $0x168] sm:$0xff] %vm172_vm0, %v5686_v0  ;;  %2197 = vst.msk [vmem:[#allocation3 + $0x170] sm:$0xff] %vm172_vm0, %v5686_v0 }
  0x3f   : > { %2199 = vst.msk [vmem:[#allocation3 + $0x180] sm:$0xff] %vm172_vm0, %v5686_v0  ;;  %2200 = vst.msk [vmem:[#allocation3 + $0x188] sm:$0xff] %vm172_vm0, %v5686_v0 }
  0x40   : > { %2201 = vst.msk [vmem:[#allocation3 + $0x190] sm:$0x3] %vm175_vm1, %v5686_v0  ;;  %2204 = vst.msk [vmem:[#allocation3 + $0x1a8] sm:$0x3] %vm175_vm1, %v5686_v0 }
  0x41   : > { %2202 = vst.msk [vmem:[#allocation3 + $0x198] sm:$0xff] %vm172_vm0, %v5686_v0  ;;  %2203 = vst.msk [vmem:[#allocation3 + $0x1a0] sm:$0xff] %vm172_vm0, %v5686_v0 }
  0x42   : > { %263 = vst.msk [vmem:[#allocation2 + $0x31] sm:$0xff] %vm172_vm0, %v230_v1  ;;  %264 = vst.msk [vmem:[#allocation2 + $0x39] sm:$0xff] %vm172_vm0, %v231_v2 }
  0x43   : > { %261 = vst.msk [vmem:[#allocation2 + $0x19] sm:$0xff] %vm172_vm0, %v228_v3  ;;  %262 = vst.msk [vmem:[#allocation2 + $0x21] sm:$0xff] %vm172_vm0, %v229_v4 }
  0x44   : > { %265 = vst.msk [vmem:[#allocation2 + $0x49] sm:$0xff] %vm172_vm0, %v232_v5  ;;  %266 = vst.msk [vmem:[#allocation2 + $0x51] sm:$0xff] %vm172_vm0, %v233_v6 }
  0x45   : > { %267 = vst.msk [vmem:[#allocation2 + $0x61] sm:$0xff] %vm172_vm0, %v234_v9  ;;  %268 = vst.msk [vmem:[#allocation2 + $0x69] sm:$0xff] %vm172_vm0, %v235_v11 }
  0x46   : > { %269 = vst.msk [vmem:[#allocation2 + $0x79] sm:$0xff] %vm172_vm0, %v236_v12  ;;  %270 = vst.msk [vmem:[#allocation2 + $0x81] sm:$0xff] %vm172_vm0, %v237_v13 }
  0x47   : > { %271 = vst.msk [vmem:[#allocation2 + $0x91] sm:$0xff] %vm172_vm0, %v238_v14  ;;  %272 = vst.msk [vmem:[#allocation2 + $0x99] sm:$0xff] %vm172_vm0, %v239_v15  ;;  %v357_v14 = vld [vmem:[#allocation2 + $0x2] sm:$0xff]  ;;  %v358_v15 = vld [vmem:[#allocation2 + $0xa] sm:$0xff] }
  0x48   : > { %273 = vst.msk [vmem:[#allocation2 + $0xa9] sm:$0xff] %vm172_vm0, %v240_v16  ;;  %274 = vst.msk [vmem:[#allocation2 + $0xb1] sm:$0xff] %vm172_vm0, %v241_v17  ;;  %v4470_v17 = vpack.i.bf16 %v358_v15, %v357_v14 }
  0x49   : > { %275 = vst.msk [vmem:[#allocation2 + $0xc1] sm:$0xff] %vm172_vm0, %v242_v18  ;;  %276 = vst.msk [vmem:[#allocation2 + $0xc9] sm:$0xff] %vm172_vm0, %v243_v19  ;;  %v329_v26 = vld [vmem:[#allocation2 + $0x31] sm:$0xff]  ;;  %v330_v27 = vld [vmem:[#allocation2 + $0x39] sm:$0xff] }
  0x4a   : > { %277 = vst.msk [vmem:[#allocation2 + $0xd9] sm:$0xff] %vm172_vm0, %v244_v20  ;;  %278 = vst.msk [vmem:[#allocation2 + $0xe1] sm:$0xff] %vm172_vm0, %v245_v21  ;;  %v327_v28 = vld [vmem:[#allocation2 + $0x19] sm:$0xff]  ;;  %v6004_v29 = vpack.i.bf16 %v330_v27, %v329_v26  ;;  %v328_v30 = vld [vmem:[#allocation2 + $0x21] sm:$0xff] }
  0x4b   : > { %279 = vst.msk [vmem:[#allocation2 + $0xf1] sm:$0xff] %vm172_vm0, %v246_v22  ;;  %280 = vst.msk [vmem:[#allocation2 + $0xf9] sm:$0xff] %vm172_vm0, %v247_v23  ;;  %v331_v31 = vld [vmem:[#allocation2 + $0x49] sm:$0xff]  ;;  %v332_v32 = vld [vmem:[#allocation2 + $0x51] sm:$0xff]  ;;  %v6006_v33 = vpack.i.bf16 %v328_v30, %v327_v28 }
  0x4c   : > { %281 = vst.msk [vmem:[#allocation2 + $0x109] sm:$0xff] %vm172_vm0, %v248_v24  ;;  %282 = vst.msk [vmem:[#allocation2 + $0x111] sm:$0xff] %vm172_vm0, %v249_v25  ;;  %v333_v34 = vld [vmem:[#allocation2 + $0x61] sm:$0xff]  ;;  %4401 = vrot.lane.b32.xlu1 %v6004_v29, %s5687_s19  ;;  %v6012_v37 = vpack.i.bf16 %v332_v32, %v331_v31  ;;  %v334_v38 = vld [vmem:[#allocation2 + $0x69] sm:$0xff] }
  0x4d   : > { %283 = vst.msk [vmem:[#allocation2 + $0x121] sm:$0xff] %vm172_vm0, %v250_v35  ;;  %284 = vst.msk [vmem:[#allocation2 + $0x129] sm:$0xff] %vm172_vm0, %v251_v36  ;;  %4396 = vrot.lane.b32.xlu0 %v6006_v33, %s5687_s19  ;;  %v6018_v39 = vpack.i.bf16 %v334_v38, %v333_v34  ;;  %v335_v40 = vld [vmem:[#allocation2 + $0x79] sm:$0xff]  ;;  %v336_v41 = vld [vmem:[#allocation2 + $0x81] sm:$0xff] }
  0x4e   : > { %v337_v42 = vld [vmem:[#allocation2 + $0x91] sm:$0xff]  ;;  %v338_v43 = vld [vmem:[#allocation2 + $0x99] sm:$0xff]  ;;  %v6022_v45 = vpack.i.bf16 %v336_v41, %v335_v40  ;;  %285 = vst.msk [vmem:[#allocation2 + $0x139] sm:$0xff] %vm172_vm0, %v252_v50  ;;  %286 = vst.msk [vmem:[#allocation2 + $0x141] sm:$0xff] %vm172_vm0, %v253_v51 }
  0x4f   : > { %v339_v44 = vld [vmem:[#allocation2 + $0xa9] sm:$0xff]  ;;  %v340_v46 = vld [vmem:[#allocation2 + $0xb1] sm:$0xff]  ;;  %v6026_v49 = vpack.i.bf16 %v338_v43, %v337_v42  ;;  %287 = vst.msk [vmem:[#allocation2 + $0x151] sm:$0xff] %vm172_vm0, %v254_v52  ;;  %288 = vst.msk [vmem:[#allocation2 + $0x159] sm:$0xff] %vm172_vm0, %v255_v53 }
  0x50   : > { %4406 = vrot.lane.b32.xlu1 %v6012_v37, %s5687_s19  ;;  %v341_v47 = vld [vmem:[#allocation2 + $0xc1] sm:$0xff]  ;;  %v342_v48 = vld [vmem:[#allocation2 + $0xc9] sm:$0xff]  ;;  %289 = vst.msk [vmem:[#allocation2 + $0x169] sm:$0xff] %vm172_vm0, %v256_v54  ;;  %290 = vst.msk [vmem:[#allocation2 + $0x171] sm:$0xff] %vm172_vm0, %v257_v55  ;;  %v6042_v56 = vpack.i.bf16 %v340_v46, %v339_v44 }
  0x51   : > { %4411 = vrot.lane.b32.xlu0 %v6018_v39, %s5687_s19  ;;  %v6046_v57 = vpack.i.bf16 %v342_v48, %v341_v47  ;;  %v343_v58 = vld [vmem:[#allocation2 + $0xd9] sm:$0xff]  ;;  %v344_v59 = vld [vmem:[#allocation2 + $0xe1] sm:$0xff]  ;;  %v363_v24 = vld [vmem:[#allocation2 + $0x4a] sm:$0xff] }
  0x52   : > { %v345_v60 = vld [vmem:[#allocation2 + $0xf1] sm:$0xff]  ;;  %v346_v61 = vld [vmem:[#allocation2 + $0xf9] sm:$0xff]  ;;  %v6050_v62 = vpack.i.bf16 %v344_v59, %v343_v58  ;;  %v360_v19 = vld [vmem:[#allocation2 + $0x22] sm:$0xff] }
  0x53   : > { %v6054_v63 = vpack.i.bf16 %v346_v61, %v345_v60  ;;  %v347_v0 = vld [vmem:[#allocation2 + $0x109] sm:$0xff]  ;;  %v348_v1 = vld [vmem:[#allocation2 + $0x111] sm:$0xff]  ;;  %v359_v18 = vld [vmem:[#allocation2 + $0x1a] sm:$0xff] }
  0x54   : > { %4416 = vrot.lane.b32.xlu1 %v6022_v45, %s5687_s19  ;;  %v349_v2 = vld [vmem:[#allocation2 + $0x121] sm:$0xff]  ;;  %v350_v3 = vld [vmem:[#allocation2 + $0x129] sm:$0xff]  ;;  %v6058_v4 = vpack.i.bf16 %v348_v1, %v347_v0  ;;  %v361_v20 = vld [vmem:[#allocation2 + $0x32] sm:$0xff]  ;;  %v6080_v22 = vpack.i.bf16 %v360_v19, %v359_v18 }
  0x55   : > { %4421 = vrot.lane.b32.xlu0 %v6026_v49, %s5687_s19  ;;  %v6062_v5 = vpack.i.bf16 %v350_v3, %v349_v2  ;;  %v351_v6 = vld [vmem:[#allocation2 + $0x139] sm:$0xff]  ;;  %v352_v7 = vld [vmem:[#allocation2 + $0x141] sm:$0xff]  ;;  %v366_v27 = vld [vmem:[#allocation2 + $0x6a] sm:$0xff] }
  0x56   : > { %v353_v8 = vld [vmem:[#allocation2 + $0x151] sm:$0xff]  ;;  %v354_v9 = vld [vmem:[#allocation2 + $0x159] sm:$0xff]  ;;  %v6066_v10 = vpack.i.bf16 %v352_v7, %v351_v6  ;;  %v365_v26 = vld [vmem:[#allocation2 + $0x62] sm:$0xff] }
  0x57   : > { %v6070_v11 = vpack.i.bf16 %v354_v9, %v353_v8  ;;  %v355_v12 = vld [vmem:[#allocation2 + $0x169] sm:$0xff]  ;;  %v356_v13 = vld [vmem:[#allocation2 + $0x171] sm:$0xff]  ;;  %v362_v21 = vld [vmem:[#allocation2 + $0x3a] sm:$0xff]  ;;  %v6095_v32 = vpack.i.bf16 %v366_v27, %v365_v26 }
  0x58   : > { %4426 = vrot.lane.b32.xlu1 %v6042_v56, %s5687_s19  ;;  %v6074_v16 = vpack.i.bf16 %v356_v13, %v355_v12  ;;  %v6083_v23 = vpack.i.bf16 %v362_v21, %v361_v20  ;;  %v364_v25 = vld [vmem:[#allocation2 + $0x52] sm:$0xff]  ;;  %v367_v34 = vld [vmem:[#allocation2 + $0x7a] sm:$0xff]  ;;  %v368_v35 = vld [vmem:[#allocation2 + $0x82] sm:$0xff] }
  0x59   : > { %4431 = vrot.lane.b32.xlu0 %v6046_v57, %s5687_s19  ;;  %v258_v28 = vld [vmem:[%s5957_s18 + $0xf0] sm:$0xff]  ;;  %v259_v30 = vld [vmem:[%s5957_s18 + $0xf8] sm:$0xff]  ;;  %v6091_v31 = vpack.i.bf16 %v364_v25, %v363_v24  ;;  %v6099_v40 = vpack.i.bf16 %v368_v35, %v367_v34  ;;  %v373_v44 = vld [vmem:[#allocation2 + $0xc2] sm:$0xff] }
  0x5a   : > { %291 = vst.msk [vmem:[#allocation2 + $0x181] sm:$0xff] %vm172_vm0, %v258_v28  ;;  %292 = vst.msk [vmem:[#allocation2 + $0x189] sm:$0xff] %vm172_vm0, %v259_v30  ;;  %v369_v36 = vld [vmem:[#allocation2 + $0x92] sm:$0xff]  ;;  %v370_v38 = vld [vmem:[#allocation2 + $0x9a] sm:$0xff] }
  0x5b   : > { %v6103_v41 = vpack.i.bf16 %v370_v38, %v369_v36  ;;  %v371_v42 = vld [vmem:[#allocation2 + $0xaa] sm:$0xff]  ;;  %v372_v43 = vld [vmem:[#allocation2 + $0xb2] sm:$0xff]  ;;  %v375_v50 = vld [vmem:[#allocation2 + $0xda] sm:$0xff] }
  0x5c   : > { %4436 = vrot.lane.b32.xlu1 %v6050_v62, %s5687_s19  ;;  %v374_v46 = vld [vmem:[#allocation2 + $0xca] sm:$0xff]  ;;  %v6107_v47 = vpack.i.bf16 %v372_v43, %v371_v42  ;;  %v376_v51 = vld [vmem:[#allocation2 + $0xe2] sm:$0xff]  ;;  %v377_v52 = vld [vmem:[#allocation2 + $0xf2] sm:$0xff] }
  0x5d   : > { %4441 = vrot.lane.b32.xlu0 %v6054_v63, %s5687_s19  ;;  %v6111_v48 = vpack.i.bf16 %v374_v46, %v373_v44  ;;  %v378_v53 = vld [vmem:[#allocation2 + $0xfa] sm:$0xff]  ;;  %v6115_v54 = vpack.i.bf16 %v376_v51, %v375_v50  ;;  %v379_v58 = vld [vmem:[#allocation2 + $0x10a] sm:$0xff]  ;;  %v380_v59 = vld [vmem:[#allocation2 + $0x112] sm:$0xff] }
  0x5e   : > { %v6119_v55 = vpack.i.bf16 %v378_v53, %v377_v52  ;;  %v381_v60 = vld [vmem:[#allocation2 + $0x122] sm:$0xff]  ;;  %v382_v61 = vld [vmem:[#allocation2 + $0x12a] sm:$0xff]  ;;  %v6123_v0 = vpack.i.bf16 %v380_v59, %v379_v58  ;;  %v383_v2 = vld [vmem:[#allocation2 + $0x13a] sm:$0xff] }
  0x5f   : > { %v6127_v1 = vpack.i.bf16 %v382_v61, %v381_v60  ;;  %v384_v3 = vld [vmem:[#allocation2 + $0x142] sm:$0xff]  ;;  %v385_v6 = vld [vmem:[#allocation2 + $0x152] sm:$0xff]  ;;  %v386_v7 = vld [vmem:[#allocation2 + $0x15a] sm:$0xff] }
  0x60   : > { %4446 = vrot.lane.b32.xlu1 %v6058_v4, %s5687_s19  ;;  %v6131_v8 = vpack.i.bf16 %v384_v3, %v383_v2  ;;  %v6135_v9 = vpack.i.bf16 %v386_v7, %v385_v6  ;;  %v387_v12 = vld [vmem:[#allocation2 + $0x16a] sm:$0xff]  ;;  %v388_v13 = vld [vmem:[#allocation2 + $0x172] sm:$0xff]  ;;  %v6139_v15 = vld [vmem:[#allocation2 + $0x20] sm:$0xff] }
  0x61   : > { %4451 = vrot.lane.b32.xlu0 %v6062_v5, %s5687_s19  ;;  %v6137_v14 = vld [vmem:[#allocation2 + $0x18] sm:$0xff]  ;;  %v6149_v19 = vld [vmem:[#allocation2 + $0x30] sm:$0xff]  ;;  %v6153_v21 = vld [vmem:[#allocation2 + $0x48] sm:$0xff] }
  0x62   : > { %v4550_v18 = vpack.i.bf16 %v6139_v15, %v6137_v14  ;;  %v6151_v20 = vld [vmem:[#allocation2 + $0x38] sm:$0xff]  ;;  %v6155_v24 = vld [vmem:[#allocation2 + $0x50] sm:$0xff]  ;;  %v6168_v27 = vld [vmem:[#allocation2 + $0x60] sm:$0xff] }
  0x63   : > { %v6161_v25 = vpack.i.bf16 %v6151_v20, %v6149_v19  ;;  %v6166_v26 = vpack.i.bf16 %v6155_v24, %v6153_v21  ;;  %v6170_v28 = vld [vmem:[#allocation2 + $0x68] sm:$0xff]  ;;  %v6172_v30 = vld [vmem:[#allocation2 + $0x78] sm:$0xff]  ;;  %v6174_v34 = vld [vmem:[#allocation2 + $0x80] sm:$0xff] }
  0x64   : > { %4456 = vrot.lane.b32.xlu1 %v6066_v10, %s5687_s19  ;;  %v6180_v35 = vpack.i.bf16 %v6170_v28, %v6168_v27  ;;  %v6186_v36 = vpack.i.bf16 %v6174_v34, %v6172_v30  ;;  %v6188_v38 = vld [vmem:[#allocation2 + $0x90] sm:$0xff]  ;;  %v6190_v42 = vld [vmem:[#allocation2 + $0x98] sm:$0xff]  ;;  %v6192_v43 = vld [vmem:[#allocation2 + $0xa8] sm:$0xff] }
  0x65   : > { %4461 = vrot.lane.b32.xlu0 %v6070_v11, %s5687_s19  ;;  %8741 = vst [vmem:[#allocation4_spill] sm:$0xff] %v6192_v43  ;;  %v6194_v44 = vld [vmem:[#allocation2 + $0xb0] sm:$0xff]  ;;  %v6200_v46 = vpack.i.bf16 %v6190_v42, %v6188_v38  ;;  %v6208_v51 = vld [vmem:[#allocation2 + $0xc0] sm:$0xff]  ;;  %v6210_v52 = vld [vmem:[#allocation2 + $0xc8] sm:$0xff] }
  0x66   : > { %v6206_v50 = vpack.i.bf16 %v6194_v44, %v6192_v43  ;;  %8742 = vst [vmem:[#allocation5_spill] sm:$0xff] %v6208_v51  ;;  %8743 = vst [vmem:[#allocation6_spill] sm:$0xff] %v6210_v52  ;;  %v6212_v53 = vld [vmem:[#allocation2 + $0xd8] sm:$0xff]  ;;  %v6214_v58 = vld [vmem:[#allocation2 + $0xe0] sm:$0xff]  ;;  %v6220_v59 = vpack.i.bf16 %v6210_v52, %v6208_v51 }
  0x67   : > { %8744 = vst [vmem:[#allocation7_spill] sm:$0xff] %v6212_v53  ;;  %8745 = vst [vmem:[#allocation8_spill] sm:$0xff] %v6214_v58  ;;  %v6226_v60 = vpack.i.bf16 %v6214_v58, %v6212_v53  ;;  %v6228_v61 = vld [vmem:[#allocation2 + $0xf0] sm:$0xff]  ;;  %v6230_v2 = vld [vmem:[#allocation2 + $0xf8] sm:$0xff] }
  0x68   : > { %4466 = vrot.lane.b32.xlu1 %v6074_v16, %s5687_s19  ;;  %8746 = vst [vmem:[#allocation9_spill] sm:$0xff] %v6228_v61  ;;  %8747 = vst [vmem:[#allocation10_spill] sm:$0xff] %v6230_v2  ;;  %v6232_v3 = vld [vmem:[#allocation2 + $0x108] sm:$0xff]  ;;  %v6234_v6 = vld [vmem:[#allocation2 + $0x110] sm:$0xff]  ;;  %v6240_v7 = vpack.i.bf16 %v6230_v2, %v6228_v61 }
  0x69   : > { %4471 = vrot.lane.b32.xlu0 %v4470_v17, %s5688_s20  ;;  %v6143_v17 = vpack.i.bf16 %v388_v13, %v387_v12  ;;  %8748 = vst [vmem:[#allocation11_spill] sm:$0xff] %v6232_v3  ;;  %8749 = vst [vmem:[#allocation12_spill] sm:$0xff] %v6234_v6  ;;  %v6246_v12 = vpack.i.bf16 %v6234_v6, %v6232_v3  ;;  %v6248_v13 = vld [vmem:[#allocation2 + $0x120] sm:$0xff]  ;;  %v6252_v53 = vld [vmem:[#allocation2 + $0x138] sm:$0xff] }
  0x6a   : > { %8750 = vst [vmem:[#allocation13_spill] sm:$0xff] %v6248_v13  ;;  %8752 = vst [vmem:[#allocation15_spill] sm:$0xff] %v6252_v53  ;;  %v6254_v58 = vld [vmem:[#allocation2 + $0x140] sm:$0xff]  ;;  %v6268_v6 = vld [vmem:[#allocation2 + $0x150] sm:$0xff] }
  0x6b   : > { %8753 = vst [vmem:[#allocation16_spill] sm:$0xff] %v6254_v58  ;;  %v6266_v3 = vpack.i.bf16 %v6254_v58, %v6252_v53  ;;  %v6270_v2 = vld [vmem:[#allocation2 + $0x158] sm:$0xff]  ;;  %v6272_v51 = vld [vmem:[#allocation2 + $0x168] sm:$0xff]  ;;  %v6274_v52 = vld [vmem:[#allocation2 + $0x170] sm:$0xff] }
  0x6c   : > { %4476 = vrot.lane.b32.xlu1 %v6080_v22, %s5688_s20  ;;  %v6286_v53 = vpack.i.bf16 %v6274_v52, %v6272_v51  ;;  %v419_v58 = vld [vmem:[#allocation2 + $0x180] sm:$0xff] }
  0x6d   : > { %4481 = vrot.lane.b32.xlu0 %v6083_v23, %s5688_s20 }
  0x70   : > { %4486 = vrot.lane.b32.xlu1 %v6091_v31, %s5688_s20 }
  0x71   : > { %4491 = vrot.lane.b32.xlu0 %v6095_v32, %s5688_s20 }
  0x74   : > { %4496 = vrot.lane.b32.xlu1 %v6099_v40, %s5688_s20 }
  0x75   : > { %4501 = vrot.lane.b32.xlu0 %v6103_v41, %s5688_s20 }
  0x78   : > { %4506 = vrot.lane.b32.xlu1 %v6107_v47, %s5688_s20 }
  0x79   : > { %4511 = vrot.lane.b32.xlu0 %v6111_v48, %s5688_s20 }
  0x7c   : > { %4516 = vrot.lane.b32.xlu1 %v6115_v54, %s5688_s20 }
  0x7d   : > { %4521 = vrot.lane.b32.xlu0 %v6119_v55, %s5688_s20 }
  0x80   : > { %4526 = vrot.lane.b32.xlu1 %v6123_v0, %s5688_s20 }
  0x81   : > { %4531 = vrot.lane.b32.xlu0 %v6127_v1, %s5688_s20 }
  0x84   : > { %4536 = vrot.lane.b32.xlu1 %v6131_v8, %s5688_s20 }
  0x85   : > { %4541 = vrot.lane.b32.xlu0 %v6135_v9, %s5688_s20 }
  0x88   : > { %4546 = vrot.lane.b32.xlu1 %v6143_v17, %s5688_s20 }
  0x89   : > { %4551 = vrot.lane.b32.xlu0 %v4550_v18, %s5689_s21  ;;  %v6250_v18 = vld [vmem:[#allocation2 + $0x128] sm:$0xff] }
  0x8a   : > { %8751 = vst [vmem:[#allocation14_spill] sm:$0xff] %v6250_v18  ;;  %v6260_v61 = vpack.i.bf16 %v6250_v18, %v6248_v13  ;;  %v6280_v13 = vpack.i.bf16 %v6270_v2, %v6268_v6  ;;  %v420_v18 = vld [vmem:[#allocation2 + $0x188] sm:$0xff] }
  0x8b   : > { %v6290_v43 = vpack.i.bf16 %v420_v18, %v419_v58 }
  0x8c   : > { %4556 = vrot.lane.b32.xlu1 %v6161_v25, %s5689_s21 }
  0x8d   : > { %4561 = vrot.lane.b32.xlu0 %v6166_v26, %s5689_s21 }
  0x90   : > { %4566 = vrot.lane.b32.xlu1 %v6180_v35, %s5689_s21 }
  0x91   : > { %4571 = vrot.lane.b32.xlu0 %v6186_v36, %s5689_s21 }
  0x94   : > { %4576 = vrot.lane.b32.xlu1 %v6200_v46, %s5689_s21 }
  0x95   : > { %4581 = vrot.lane.b32.xlu0 %v6206_v50, %s5689_s21 }
  0x98   : > { %4586 = vrot.lane.b32.xlu1 %v6220_v59, %s5689_s21 }
  0x99   : > { %4591 = vrot.lane.b32.xlu0 %v6226_v60, %s5689_s21 }
  0x9c   : > { %4596 = vrot.lane.b32.xlu1 %v6240_v7, %s5689_s21 }
  0x9d   : > { %4601 = vrot.lane.b32.xlu0 %v6246_v12, %s5689_s21 }
  0xa0   : > { %4606 = vrot.lane.b32.xlu1 %v6260_v61, %s5689_s21 }
  0xa1   : > { %4611 = vrot.lane.b32.xlu0 %v6266_v3, %s5689_s21 }
  0xa4   : > { %4616 = vrot.lane.b32.xlu1 %v6280_v13, %s5689_s21 }
  0xa5   : > { %4621 = vrot.lane.b32.xlu0 %v6286_v53, %s5689_s21 }
  0xa8   : > { %4626 = vrot.lane.b32.xlu1 %v6290_v43, %s5689_s21 }
  0xa9   : > { %4631 = vrot.lane.b32.xlu0 %v6006_v33, %s5690_s22 }
  0xac   : > { %4636 = vrot.lane.b32.xlu1 %v6004_v29, %s5690_s22  ;;  %v6314_v29 = vpop.permute.xlu0 %4391 }
  0xad   : > { %4641 = vrot.lane.b32.xlu0 %v6012_v37, %s5690_s22 }
  0xb0   : > { %4646 = vrot.lane.b32.xlu1 %v6018_v39, %s5690_s22  ;;  %v451_v39 = vld [vmem:[#allocation2 + $0x181] sm:$0xff] }
  0xb1   : > { %4651 = vrot.lane.b32.xlu0 %v6022_v45, %s5690_s22  ;;  %v452_v45 = vld [vmem:[#allocation2 + $0x189] sm:$0xff] }
  0xb4   : > { %4656 = vrot.lane.b32.xlu1 %v6026_v49, %s5690_s22 }
  0xb5   : > { %4661 = vrot.lane.b32.xlu0 %v6042_v56, %s5690_s22 }
  0xb8   : > { %4666 = vrot.lane.b32.xlu1 %v6046_v57, %s5690_s22  ;;  %v4705_v57 = vpack.i.bf16 %v452_v45, %v451_v39 }
  0xb9   : > { %4671 = vrot.lane.b32.xlu0 %v6050_v62, %s5690_s22 }
  0xbc   : > { %4676 = vrot.lane.b32.xlu1 %v6054_v63, %s5690_s22 }
  0xbd   : > { %4681 = vrot.lane.b32.xlu0 %v6058_v4, %s5690_s22 }
  0xbe   : > { %v6320_v33 = vpop.permute.xlu1 %4401 }
  0xbf   : > { %v6322_v37 = vpop.permute.xlu0 %4396 }
  0xc0   : > { %4686 = vrot.lane.b32.xlu1 %v6062_v5, %s5690_s22 }
  0xc1   : > { %4691 = vrot.lane.b32.xlu0 %v6066_v10, %s5690_s22 }
  0xc2   : > { %v6328_v49 = vpop.permute.xlu1 %4406 }
  0xc3   : > { %v6330_v56 = vpop.permute.xlu0 %4411 }
  0xc4   : > { %4696 = vrot.lane.b32.xlu1 %v6070_v11, %s5690_s22 }
  0xc5   : > { %4701 = vrot.lane.b32.xlu0 %v6074_v16, %s5690_s22 }
  0xc6   : > { %v6336_v62 = vpop.permute.xlu1 %4416 }
  0xc7   : > { %v6338_v63 = vpop.permute.xlu0 %4421 }
  0xc8   : > { %4706 = vrot.lane.b32.xlu1 %v4705_v57, %s5690_s22 }
  0xc9   : > { %4711 = vrot.lane.b32.xlu0 %v6080_v22, %s5691_s23 }
  0xca   : > { %v6343_v4 = vpop.permute.xlu1 %4426 }
  0xcb   : > { %v6345_v5 = vpop.permute.xlu0 %4431 }
  0xcc   : > { %4716 = vrot.lane.b32.xlu1 %v6083_v23, %s5691_s23 }
  0xcd   : > { %4721 = vrot.lane.b32.xlu0 %v6091_v31, %s5691_s23 }
  0xce   : > { %v6351_v10 = vpop.permute.xlu1 %4436 }
  0xcf   : > { %v6353_v11 = vpop.permute.xlu0 %4441 }
  0xd0   : > { %4726 = vrot.lane.b32.xlu1 %v6095_v32, %s5691_s23 }
  0xd1   : > { %4731 = vrot.lane.b32.xlu0 %v6099_v40, %s5691_s23 }
  0xd2   : > { %v6359_v16 = vpop.permute.xlu1 %4446 }
  0xd3   : > { %v6361_v22 = vpop.permute.xlu0 %4451 }
  0xd4   : > { %4736 = vrot.lane.b32.xlu1 %v6103_v41, %s5691_s23 }
  0xd5   : > { %4741 = vrot.lane.b32.xlu0 %v6107_v47, %s5691_s23 }
  0xd6   : > { %v6367_v23 = vpop.permute.xlu1 %4456 }
  0xd7   : > { %v6369_v31 = vpop.permute.xlu0 %4461 }
  0xd8   : > { %4746 = vrot.lane.b32.xlu1 %v6111_v48, %s5691_s23  ;;  %v483_v48 = vld [vmem:[#allocation2 + $0x182] sm:$0xff] }
  0xd9   : > { %4751 = vrot.lane.b32.xlu0 %v6115_v54, %s5691_s23  ;;  %v484_v54 = vld [vmem:[#allocation2 + $0x18a] sm:$0xff] }
  0xda   : > { %v6375_v32 = vpop.permute.xlu1 %4466 }
  0xdb   : > { %v6377_v40 = vpop.permute.xlu0 %4471 }
  0xdc   : > { %4756 = vrot.lane.b32.xlu1 %v6119_v55, %s5691_s23  ;;  %v6397_v55 = vpack.i.bf16 %v484_v54, %v483_v48  ;;  %v518_v48 = vld [vmem:[#allocation2 + $0x31] sm:$0xff]  ;;  %v519_v54 = vld [vmem:[#allocation2 + $0x39] sm:$0xff] }
  0xdd   : > { %4761 = vrot.lane.b32.xlu0 %v6123_v0, %s5691_s23 }
  0xde   : > { %v6383_v41 = vpop.permute.xlu1 %4476 }
  0xdf   : > { %v6385_v47 = vpop.permute.xlu0 %4481 }
  0xe0   : > { %4766 = vrot.lane.b32.xlu1 %v6127_v1, %s5691_s23 }
  0xe1   : > { %4771 = vrot.lane.b32.xlu0 %v6131_v8, %s5691_s23 }
  0xe2   : > { %v6391_v58 = vpop.permute.xlu1 %4486 }
  0xe3   : > { %v6393_v18 = vpop.permute.xlu0 %4491 }
  0xe4   : > { %4776 = vrot.lane.b32.xlu1 %v6135_v9, %s5691_s23 }
  0xe5   : > { %4781 = vrot.lane.b32.xlu0 %v6143_v17, %s5691_s23 }
  0xe6   : > { %v6401_v0 = vpop.permute.xlu1 %4496 }
  0xe7   : > { %v6403_v1 = vpop.permute.xlu0 %4501 }
  0xe8   : > { %4786 = vrot.lane.b32.xlu1 %v6397_v55, %s5691_s23 }
  0xe9   : > { %4791 = vrot.lane.b32.xlu0 %v6161_v25, %s5692_s24 }
  0xea   : > { %v6409_v8 = vpop.permute.xlu1 %4506 }
  0xeb   : > { %v6411_v39 = vpop.permute.xlu0 %4511 }
  0xec   : > { %4796 = vrot.lane.b32.xlu1 %v6166_v26, %s5692_s24 }
  0xed   : > { %4801 = vrot.lane.b32.xlu0 %v6180_v35, %s5692_s24 }
  0xee   : > { %v6417_v9 = vpop.permute.xlu1 %4516 }
  0xef   : > { %v6419_v17 = vpop.permute.xlu0 %4521 }
  0xf0   : > { %4806 = vrot.lane.b32.xlu1 %v6186_v36, %s5692_s24 }
  0xf1   : > { %4811 = vrot.lane.b32.xlu0 %v6200_v46, %s5692_s24 }
  0xf2   : > { %v6425_v25 = vpop.permute.xlu1 %4526 }
  0xf3   : > { %v6427_v45 = vpop.permute.xlu0 %4531 }
  0xf4   : > { %4816 = vrot.lane.b32.xlu1 %v6206_v50, %s5692_s24 }
  0xf5   : > { %4821 = vrot.lane.b32.xlu0 %v6220_v59, %s5692_s24 }
  0xf6   : > { %v6433_v26 = vpop.permute.xlu1 %4536 }
  0xf7   : > { %8754 = vst [vmem:[#allocation17_spill] sm:$0xff] %v6433_v26  ;;  %v6435_v35 = vpop.permute.xlu0 %4541  ;;  %v535_v26 = vld [vmem:[#allocation2 + $0xf9] sm:$0xff] }
  0xf8   : > { %8755 = vst [vmem:[#allocation18_spill] sm:$0xff] %v6435_v35  ;;  %4826 = vrot.lane.b32.xlu1 %v6226_v60, %s5692_s24  ;;  %v516_v60 = vld [vmem:[#allocation2 + $0x198] sm:$0xff] }
  0xf9   : > { %4831 = vrot.lane.b32.xlu0 %v6240_v7, %s5692_s24  ;;  %v517_v7 = vld [vmem:[#allocation2 + $0x1a0] sm:$0xff] }
  0xfa   : > { %v6441_v36 = vpop.permute.xlu1 %4546 }
  0xfb   : > { %8756 = vst [vmem:[#allocation19_spill] sm:$0xff] %v6441_v36  ;;  %v6443_v46 = vpop.permute.xlu0 %4551  ;;  %v523_v36 = vld [vmem:[#allocation2 + $0x69] sm:$0xff] }
  0xfc   : > { %8757 = vst [vmem:[#allocation20_spill] sm:$0xff] %v6443_v46  ;;  %4836 = vrot.lane.b32.xlu1 %v6246_v12, %s5692_s24 }
  0xfd   : > { %4841 = vrot.lane.b32.xlu0 %v6260_v61, %s5692_s24  ;;  %v4865_v61 = vpack.i.bf16 %v517_v7, %v516_v60  ;;  %v524_v60 = vld [vmem:[#allocation2 + $0x79] sm:$0xff]  ;;  %v525_v7 = vld [vmem:[#allocation2 + $0x81] sm:$0xff] }
  0xfe   : > { %v6449_v50 = vpop.permute.xlu1 %4556 }
  0xff   : > { %8758 = vst [vmem:[#allocation21_spill] sm:$0xff] %v6449_v50  ;;  %v6451_v59 = vpop.permute.xlu0 %4561  ;;  %v521_v50 = vld [vmem:[#allocation2 + $0x51] sm:$0xff] }
 0x100   : > { %8759 = vst [vmem:[#allocation22_spill] sm:$0xff] %v6451_v59  ;;  %4846 = vrot.lane.b32.xlu1 %v6266_v3, %s5692_s24  ;;  %v4870_v59 = vpack.i.bf16 %v519_v54, %v518_v48  ;;  %v520_v3 = vld [vmem:[#allocation2 + $0x49] sm:$0xff]  ;;  %v527_v48 = vld [vmem:[#allocation2 + $0x99] sm:$0xff] }
 0x101   : > { %4851 = vrot.lane.b32.xlu0 %v6280_v13, %s5692_s24  ;;  %v522_v13 = vld [vmem:[#allocation2 + $0x61] sm:$0xff] }
 0x102   : > { %v6457_v57 = vpop.permute.xlu1 %4566 }
 0x103   : > { %8760 = vst [vmem:[#allocation23_spill] sm:$0xff] %v6457_v57  ;;  %v6459_v12 = vpop.permute.xlu0 %4571  ;;  %v4875_v57 = vpack.i.bf16 %v521_v50, %v520_v3 }
 0x104   : > { %8761 = vst [vmem:[#allocation24_spill] sm:$0xff] %v6459_v12  ;;  %4856 = vrot.lane.b32.xlu1 %v6286_v53, %s5692_s24  ;;  %v4880_v53 = vpack.i.bf16 %v523_v36, %v522_v13  ;;  %v529_v36 = vld [vmem:[#allocation2 + $0xb1] sm:$0xff]  ;;  %v530_v13 = vld [vmem:[#allocation2 + $0xc1] sm:$0xff] }
 0x105   : > { %4861 = vrot.lane.b32.xlu0 %v6290_v43, %s5692_s24  ;;  %v526_v43 = vld [vmem:[#allocation2 + $0x91] sm:$0xff] }
 0x106   : > { %v6465_v46 = vpop.permute.xlu1 %4576  ;;  %v4890_v50 = vpack.i.bf16 %v527_v48, %v526_v43  ;;  %v532_v43 = vld [vmem:[#allocation2 + $0xd9] sm:$0xff]  ;;  %v533_v48 = vld [vmem:[#allocation2 + $0xe1] sm:$0xff] }
 0x107   : > { %8762 = vst [vmem:[#allocation25_spill] sm:$0xff] %v6465_v46  ;;  %v6467_v35 = vpop.permute.xlu0 %4581  ;;  %v4885_v46 = vpack.i.bf16 %v525_v7, %v524_v60 }
 0x108   : > { %8763 = vst [vmem:[#allocation26_spill] sm:$0xff] %v6467_v35  ;;  %4866 = vrot.lane.b32.xlu1 %v4865_v61, %s5692_s24  ;;  %v5670_v61 = vld [vmem:[%s8651_s1 + $0x10] ss:$0 sps:$4 sm:$0x33]   ;;  %v534_v35 = vld [vmem:[#allocation2 + $0xf1] sm:$0xff] }
 0x109   : > { %4871 = vrot.lane.b32.xlu0 %v4870_v59, %s5693_s25  ;;  %v528_v59 = vld [vmem:[#allocation2 + $0xa9] sm:$0xff]  ;;  %4371 = vmatprep.subr.msk.bf16.mxu0 %vm1954_vm2, %v5670_v61 }
 0x10a   : > { %v6471_v12 = vpop.permute.xlu1 %4586  ;;  %v4895_v60 = vpack.i.bf16 %v529_v36, %v528_v59  ;;  %v537_v59 = vld [vmem:[#allocation2 + $0x111] sm:$0xff] }
 0x10b   : > { %8764 = vst [vmem:[#allocation27_spill] sm:$0xff] %v6471_v12  ;;  %v6473_v54 = vpop.permute.xlu0 %4591  ;;  %v531_v12 = vld [vmem:[#allocation2 + $0xc9] sm:$0xff] }
 0x10c   : > { %8765 = vst [vmem:[#allocation28_spill] sm:$0xff] %v6473_v54  ;;  %4876 = vrot.lane.b32.xlu1 %v4875_v57, %s5693_s25  ;;  %v1956_v54 = vsel %vm1954_vm2, %v5670_v61, 0  ;;  %v4900_v7 = vpack.i.bf16 %v531_v12, %v530_v13  ;;  %v4910_v12 = vpack.i.bf16 %v535_v26, %v534_v35  ;;  %v538_v13 = vld [vmem:[#allocation2 + $0x121] sm:$0xff]  ;;  %v552_v26 = vld [vmem:[#allocation2 + $0x4a] sm:$0xff]  ;;  %v553_v35 = vld [vmem:[#allocation2 + $0x52] sm:$0xff] }
 0x10d   : > { %4881 = vrot.lane.b32.xlu0 %v4880_v53, %s5693_s25  ;;  %4296 = vmatpush3.bf16.msra.mxu0 %v1956_v54  ;;  %v5671_v53 = vld [vmem:[%s8651_s1 + $0x8] sm:$0xff]   ;;  %v5672_v54 = vld [vmem:[%s8651_s1] sm:$0xff]  }
 0x10e   : > { %v6480_v3 = vpop.permute.xlu1 %4596  ;;  %4297 = vmatprep.subr.bf16.mxu0 %v5671_v53 }
 0x10f   : > { %8766 = vst [vmem:[#allocation29_spill] sm:$0xff] %v6480_v3  ;;  %v6484_v57 = vpop.permute.xlu0 %4601 }
 0x110   : > { %8767 = vst [vmem:[#allocation30_spill] sm:$0xff] %v6484_v57  ;;  %4886 = vrot.lane.b32.xlu1 %v4885_v46, %s5693_s25  ;;  %v4905_v46 = vpack.i.bf16 %v533_v48, %v532_v43  ;;  %v550_v43 = vld [vmem:[#allocation2 + $0x32] sm:$0xff]  ;;  %v551_v48 = vld [vmem:[#allocation2 + $0x3a] sm:$0xff] }
 0x111   : > { %4891 = vrot.lane.b32.xlu0 %v4890_v50, %s5693_s25  ;;  %4298 = vmatpush3.bf16.msra.mxu0 %v5671_v53  ;;  %v536_v50 = vld [vmem:[#allocation2 + $0x109] sm:$0xff] }
 0x112   : > { %v6491_v3 = vpop.permute.xlu1 %4606  ;;  %4299 = vmatprep.subr.bf16.mxu0 %v5672_v54 }
 0x113   : > { %8768 = vst [vmem:[#allocation31_spill] sm:$0xff] %v6491_v3  ;;  %v6493_v61 = vpop.permute.xlu0 %4611  ;;  %v539_v3 = vld [vmem:[#allocation2 + $0x129] sm:$0xff] }
 0x114   : > { %8769 = vst [vmem:[#allocation32_spill] sm:$0xff] %v6493_v61  ;;  %4896 = vrot.lane.b32.xlu1 %v4895_v60, %s5693_s25  ;;  %v4915_v60 = vpack.i.bf16 %v537_v59, %v536_v50  ;;  %v4920_v53 = vpack.i.bf16 %v539_v3, %v538_v13  ;;  %v557_v3 = vld [vmem:[#allocation2 + $0x82] sm:$0xff] }
 0x115   : > { %4901 = vrot.lane.b32.xlu0 %v4900_v7, %s5693_s25  ;;  %4300 = vmatpush3.bf16.msra.mxu0 %v5672_v54  ;;  %v4930_v54 = vpack.i.bf16 %v553_v35, %v552_v26  ;;  %v561_v26 = vld [vmem:[#allocation2 + $0xb2] sm:$0xff] }
 0x116   : > { %v6500_v36 = vpop.permute.xlu1 %4616 }
 0x117   : > { %8770 = vst [vmem:[#allocation33_spill] sm:$0xff] %v6500_v36  ;;  %v6502_v57 = vpop.permute.xlu0 %4621  ;;  %v4925_v36 = vpack.i.bf16 %v551_v48, %v550_v43  ;;  %v559_v43 = vld [vmem:[#allocation2 + $0x9a] sm:$0xff] }
 0x118   : > { %8771 = vst [vmem:[#allocation34_spill] sm:$0xff] %v6502_v57  ;;  %4906 = vrot.lane.b32.xlu1 %v4905_v46, %s5693_s25  ;;  %v554_v57 = vld [vmem:[#allocation2 + $0x62] sm:$0xff]  ;;  %v555_v46 = vld [vmem:[#allocation2 + $0x6a] sm:$0xff] }
 0x119   : > { %4911 = vrot.lane.b32.xlu0 %v4910_v12, %s5693_s25  ;;  %v556_v12 = vld [vmem:[#allocation2 + $0x7a] sm:$0xff]  ;;  %v4935_v13 = vpack.i.bf16 %v555_v46, %v554_v57  ;;  %v565_v46 = vld [vmem:[#allocation2 + $0xe2] sm:$0xff] }
 0x11a   : > { %v6506_v7 = vpop.permute.xlu1 %4626 }
 0x11b   : > { %8772 = vst [vmem:[#allocation35_spill] sm:$0xff] %v6506_v7  ;;  %v6508_v61 = vpop.permute.xlu0 %4631  ;;  %v4940_v7 = vpack.i.bf16 %v557_v3, %v556_v12 }
 0x11c   : > { %8773 = vst [vmem:[#allocation36_spill] sm:$0xff] %v6508_v61  ;;  %4916 = vrot.lane.b32.xlu1 %v4915_v60, %s5693_s25  ;;  %v558_v60 = vld [vmem:[#allocation2 + $0x92] sm:$0xff]  ;;  %v562_v61 = vld [vmem:[#allocation2 + $0xc2] sm:$0xff] }
 0x11d   : > { %4921 = vrot.lane.b32.xlu0 %v4920_v53, %s5693_s25  ;;  %v560_v53 = vld [vmem:[#allocation2 + $0xaa] sm:$0xff] }
 0x11e   : > { %v6512_v50 = vpop.permute.xlu1 %4636 }
 0x11f   : > { %8774 = vst [vmem:[#allocation37_spill] sm:$0xff] %v6512_v50  ;;  %v6514_v59 = vpop.permute.xlu0 %4641  ;;  %v4945_v50 = vpack.i.bf16 %v559_v43, %v558_v60  ;;  %v569_v43 = vld [vmem:[#allocation2 + $0x112] sm:$0xff] }
 0x120   : > { %8775 = vst [vmem:[#allocation38_spill] sm:$0xff] %v6514_v59  ;;  %4926 = vrot.lane.b32.xlu1 %v4925_v36, %s5694_s5  ;;  %v4950_v59 = vpack.i.bf16 %v561_v26, %v560_v53  ;;  %v563_v36 = vld [vmem:[#allocation2 + $0xca] sm:$0xff] }
 0x121   : > { %4931 = vrot.lane.b32.xlu0 %v4930_v54, %s5694_s5  ;;  %v564_v54 = vld [vmem:[#allocation2 + $0xda] sm:$0xff]  ;;  %v4955_v3 = vpack.i.bf16 %v563_v36, %v562_v61  ;;  %v571_v36 = vld [vmem:[#allocation2 + $0x12a] sm:$0xff] }
 0x122   : > { %v6518_v48 = vpop.permute.xlu1 %4646 }
 0x123   : > { %8776 = vst [vmem:[#allocation39_spill] sm:$0xff] %v6518_v48  ;;  %v6520_v35 = vpop.permute.xlu0 %4651  ;;  %v566_v48 = vld [vmem:[#allocation2 + $0xf2] sm:$0xff] }
 0x124   : > { %8777 = vst [vmem:[#allocation40_spill] sm:$0xff] %v6520_v35  ;;  %4936 = vrot.lane.b32.xlu1 %v4935_v13, %s5694_s5  ;;  %v4960_v35 = vpack.i.bf16 %v565_v46, %v564_v54  ;;  %v567_v13 = vld [vmem:[#allocation2 + $0xfa] sm:$0xff] }
 0x125   : > { %4941 = vrot.lane.b32.xlu0 %v4940_v7, %s5694_s5  ;;  %v568_v7 = vld [vmem:[#allocation2 + $0x10a] sm:$0xff]  ;;  %v4965_v26 = vpack.i.bf16 %v567_v13, %v566_v48  ;;  %v543_v13 = vld [vmem:[#allocation2 + $0x159] sm:$0xff] }
 0x126   : > { %v6524_v57 = vpop.permute.xlu1 %4656 }
 0x127   : > { %8778 = vst [vmem:[#allocation41_spill] sm:$0xff] %v6524_v57  ;;  %v6526_v12 = vpop.permute.xlu0 %4661  ;;  %v540_v57 = vld [vmem:[#allocation2 + $0x139] sm:$0xff] }
 0x128   : > { %8779 = vst [vmem:[#allocation42_spill] sm:$0xff] %v6526_v12  ;;  %4946 = vrot.lane.b32.xlu1 %v4945_v50, %s5694_s5  ;;  %v4970_v12 = vpack.i.bf16 %v569_v43, %v568_v7  ;;  %v541_v50 = vld [vmem:[#allocation2 + $0x141] sm:$0xff] }
 0x129   : > { %4951 = vrot.lane.b32.xlu0 %v4950_v59, %s5694_s5  ;;  %v570_v59 = vld [vmem:[#allocation2 + $0x122] sm:$0xff]  ;;  %v4975_v46 = vpack.i.bf16 %v541_v50, %v540_v57  ;;  %v575_v50 = vld [vmem:[#allocation2 + $0x15a] sm:$0xff] }
 0x12a   : > { %v6530_v60 = vpop.permute.xlu1 %4666 }
 0x12b   : > { %8780 = vst [vmem:[#allocation43_spill] sm:$0xff] %v6530_v60  ;;  %v6532_v53 = vpop.permute.xlu0 %4671  ;;  %v572_v60 = vld [vmem:[#allocation2 + $0x13a] sm:$0xff] }
 0x12c   : > { %8781 = vst [vmem:[#allocation44_spill] sm:$0xff] %v6532_v53  ;;  %4956 = vrot.lane.b32.xlu1 %v4955_v3, %s5694_s5  ;;  %v4980_v53 = vpack.i.bf16 %v571_v36, %v570_v59  ;;  %v573_v3 = vld [vmem:[#allocation2 + $0x142] sm:$0xff] }
 0x12d   : > { %4961 = vrot.lane.b32.xlu0 %v4960_v35, %s5694_s5  ;;  %v542_v35 = vld [vmem:[#allocation2 + $0x151] sm:$0xff]  ;;  %v4985_v43 = vpack.i.bf16 %v573_v3, %v572_v60  ;;  %v547_v3 = vld [vmem:[#allocation2 + $0x189] sm:$0xff] }
 0x12e   : > { %v6536_v61 = vpop.permute.xlu1 %4676 }
 0x12f   : > { %8782 = vst [vmem:[#allocation45_spill] sm:$0xff] %v6536_v61  ;;  %v6538_v54 = vpop.permute.xlu0 %4681  ;;  %v544_v61 = vld [vmem:[#allocation2 + $0x169] sm:$0xff] }
 0x130   : > { %8783 = vst [vmem:[#allocation46_spill] sm:$0xff] %v6538_v54  ;;  %4966 = vrot.lane.b32.xlu1 %v4965_v26, %s5694_s5  ;;  %v4990_v54 = vpack.i.bf16 %v543_v13, %v542_v35  ;;  %v545_v26 = vld [vmem:[#allocation2 + $0x171] sm:$0xff] }
 0x131   : > { %4971 = vrot.lane.b32.xlu0 %v4970_v12, %s5694_s5  ;;  %v574_v12 = vld [vmem:[#allocation2 + $0x152] sm:$0xff]  ;;  %v4995_v36 = vpack.i.bf16 %v545_v26, %v544_v61 }
 0x132   : > { %v6542_v48 = vpop.permute.xlu1 %4686 }
 0x133   : > { %8784 = vst [vmem:[#allocation47_spill] sm:$0xff] %v6542_v48  ;;  %v6544_v7 = vpop.permute.xlu0 %4691  ;;  %v576_v48 = vld [vmem:[#allocation2 + $0x16a] sm:$0xff] }
 0x134   : > { %8785 = vst [vmem:[#allocation48_spill] sm:$0xff] %v6544_v7  ;;  %4976 = vrot.lane.b32.xlu1 %v4975_v46, %s5693_s25  ;;  %v5000_v7 = vpack.i.bf16 %v575_v50, %v574_v12  ;;  %v577_v46 = vld [vmem:[#allocation2 + $0x172] sm:$0xff]  ;;  %v580_v12 = vld [vmem:[#allocation2 + $0x19a] sm:$0xff]  ;;  %v581_v50 = vld [vmem:[#allocation2 + $0x1a2] sm:$0xff] }
 0x135   : > { %4981 = vrot.lane.b32.xlu0 %v4980_v53, %s5694_s5  ;;  %v546_v53 = vld [vmem:[#allocation2 + $0x181] sm:$0xff]  ;;  %v5005_v13 = vpack.i.bf16 %v577_v46, %v576_v48  ;;  %v5025_v48 = vpack.i.bf16 %v581_v50, %v580_v12  ;;  %v4399_v12 = vunpack.i.h.bf16 %v6322_v37  ;;  %v4408_v50 = vunpack.i.l.bf16 %v6328_v49 }
 0x136   : > { %v6548_v57 = vpop.permute.xlu1 %4696 }
 0x137   : > { %8786 = vst [vmem:[#allocation49_spill] sm:$0xff] %v6548_v57  ;;  %v6550_v59 = vpop.permute.xlu0 %4701  ;;  %v548_v57 = vld [vmem:[#allocation2 + $0x199] sm:$0xff] }
 0x138   : > { %8787 = vst [vmem:[#allocation50_spill] sm:$0xff] %v6550_v59  ;;  %4986 = vrot.lane.b32.xlu1 %v4985_v43, %s5694_s5  ;;  %v5010_v59 = vpack.i.bf16 %v547_v3, %v546_v53  ;;  %v549_v43 = vld [vmem:[#allocation2 + $0x1a1] sm:$0xff]  ;;  %v4403_v3 = vunpack.i.l.bf16 %v6320_v33 }
 0x139   : > { %4991 = vrot.lane.b32.xlu0 %v4990_v54, %s5693_s25  ;;  %v5015_v26 = vpack.i.bf16 %v549_v43, %v548_v57  ;;  %v294_v53 = vld [vmem:[#allocation2 + $0x8] sm:$0xff]  ;;  %v4393_v57 = vunpack.i.l.bf16 %v6314_v29 }
 0x13a   : > { %v6554_v60 = vpop.permute.xlu1 %4706 }
 0x13b   : > { %8788 = vst [vmem:[#allocation51_spill] sm:$0xff] %v6554_v60  ;;  %v6556_v35 = vpop.permute.xlu0 %4711 }
 0x13c   : > { %4996 = vrot.lane.b32.xlu1 %v4995_v36, %s5693_s25 }
 0x13d   : > { %5001 = vrot.lane.b32.xlu0 %v5000_v7, %s5694_s5  ;;  %v4394_v7 = vunpack.i.h.bf16 %v6314_v29  ;;  %v4413_v29 = vunpack.i.l.bf16 %v6330_v56 }
 0x13e   : > { %v6560_v61 = vpop.permute.xlu1 %4716 }
 0x13f   : > { %v6562_v54 = vpop.permute.xlu0 %4721 }
 0x140   : > { %8789 = vst [vmem:[#allocation52_spill] sm:$0xff] %v6562_v54  ;;  %5006 = vrot.lane.b32.xlu1 %v5005_v13, %s5694_s5  ;;  %v4398_v13 = vunpack.i.l.bf16 %v6322_v37  ;;  %v4423_v37 = vunpack.i.l.bf16 %v6338_v63 }
 0x141   : > { %5011 = vrot.lane.b32.xlu0 %v5010_v59, %s5693_s25  ;;  %v4404_v59 = vunpack.i.h.bf16 %v6320_v33  ;;  %v6590_v33 = vsel %vm172_vm0, %v294_v53, %v4394_v7 }
 0x142   : > { %v6566_v60 = vpop.permute.xlu1 %4726 }
 0x143   : > { %8790 = vst [vmem:[#allocation53_spill] sm:$0xff] %v6566_v60  ;;  %v6568_v36 = vpop.permute.xlu0 %4731  ;;  %v4424_v60 = vunpack.i.h.bf16 %v6338_v63  ;;  %v6616_v63 = vsel %vm172_vm0, %v6139_v15, %v4399_v12  ;;  %v4459_v12 = vunpack.i.h.bf16 %v6367_v23 }
 0x144   : > { %8791 = vst [vmem:[#allocation54_spill] sm:$0xff] %v6568_v36  ;;  %5016 = vrot.lane.b32.xlu1 %v5015_v26, %s5693_s25  ;;  %v293_v26 = vld [vmem:[#allocation2] sm:$0xff]  ;;  %v4419_v36 = vunpack.i.h.bf16 %v6336_v62 }
 0x145   : > { %5021 = vrot.lane.b32.xlu0 %v6397_v55, %s5694_s5  ;;  %v4409_v55 = vunpack.i.h.bf16 %v6328_v49  ;;  %v6598_v49 = vsel %vm172_vm0, %v293_v26, %v4393_v57  ;;  %v4429_v57 = vunpack.i.h.bf16 %v6343_v4  ;;  %v4453_v26 = vunpack.i.l.bf16 %v6361_v22 }
 0x146   : > { %v6574_v46 = vpop.permute.xlu1 %4736  ;;  %v6636_v15 = vsel %vm172_vm0, %v6174_v34, %v4419_v36  ;;  %v4433_v36 = vunpack.i.l.bf16 %v6345_v5 }
 0x147   : > { %8792 = vst [vmem:[#allocation55_spill] sm:$0xff] %v6574_v46  ;;  %v6580_v43 = vpop.permute.xlu0 %4741  ;;  %v4414_v46 = vunpack.i.h.bf16 %v6330_v56  ;;  %v6606_v56 = vsel %vm172_vm0, %v6151_v20, %v4404_v59  ;;  %v6620_v53 = vsel %vm172_vm0, %v6155_v24, %v4409_v55  ;;  %v4428_v24 = vunpack.i.l.bf16 %v6343_v4  ;;  %v8797_v55 = vld [vmem:[#allocation6_spill] sm:$0xff] }
 0x148   : > { %8793 = vst [vmem:[#allocation56_spill] sm:$0xff] %v6580_v43  ;;  %5026 = vrot.lane.b32.xlu1 %v5025_v48, %s5694_s5  ;;  %v4418_v43 = vunpack.i.l.bf16 %v6336_v62  ;;  %v6602_v48 = vsel %vm172_vm0, %v6149_v19, %v4403_v3  ;;  %v6610_v62 = vsel %vm172_vm0, %v6137_v14, %v4398_v13  ;;  %v6624_v19 = vsel %vm172_vm0, %v6153_v21, %v4408_v50 }
 0x149   : > { %v6628_v20 = vsel %vm172_vm0, %v6170_v28, %v4414_v46  ;;  %v6632_v14 = vsel %vm172_vm0, %v6168_v27, %v4413_v29  ;;  %v6646_v28 = vsel %vm172_vm0, %v6190_v42, %v4424_v60  ;;  %v6650_v27 = vsel %vm172_vm0, %v6188_v38, %v4423_v37  ;;  %v8799_v37 = vld [vmem:[#allocation5_spill] sm:$0xff] }
 0x14a   : > { %v6595_v54 = vpop.permute.xlu1 %4746  ;;  %v6642_v21 = vsel %vm172_vm0, %v6172_v30, %v4418_v43  ;;  %v4434_v46 = vunpack.i.h.bf16 %v6345_v5  ;;  %v4439_v4 = vunpack.i.h.bf16 %v6351_v10  ;;  %v4438_v59 = vunpack.i.l.bf16 %v6351_v10  ;;  %v8796_v43 = vld [vmem:[#allocation4_spill] sm:$0xff] }
 0x14b   : > { %v6612_v7 = vpop.permute.xlu0 %4751  ;;  %v4444_v30 = vunpack.i.h.bf16 %v6353_v11  ;;  %v4443_v42 = vunpack.i.l.bf16 %v6353_v11  ;;  %v4449_v38 = vunpack.i.h.bf16 %v6359_v16  ;;  %v4448_v60 = vunpack.i.l.bf16 %v6359_v16 }
 0x14c   : > { %v4454_v13 = vunpack.i.h.bf16 %v6361_v22  ;;  %v6667_v5 = vsel %vm172_vm0, %v6194_v44, %v4429_v57  ;;  %v6671_v10 = vsel %vm172_vm0, %v8796_v43, %v4428_v24  ;;  %v6677_v11 = vsel %vm172_vm0, %v8797_v55, %v4434_v46  ;;  %v8800_v24 = vld [vmem:[#allocation8_spill] sm:$0xff]  ;;  %v8801_v43 = vld [vmem:[#allocation7_spill] sm:$0xff]  ;;  %v8802_v55 = vld [vmem:[#allocation10_spill] sm:$0xff] }
 0x14d   : > { %v4458_v16 = vunpack.i.l.bf16 %v6367_v23  ;;  %v4464_v50 = vunpack.i.h.bf16 %v6369_v31  ;;  %v4463_v29 = vunpack.i.l.bf16 %v6369_v31  ;;  %v6686_v57 = vsel %vm172_vm0, %v8799_v37, %v4433_v36  ;;  %v8804_v31 = vld [vmem:[#allocation9_spill] sm:$0xff]  ;;  %v8805_v36 = vld [vmem:[#allocation12_spill] sm:$0xff] }
 0x14e   : > { %v6653_v34 = vpop.permute.xlu1 %4756  ;;  %v6690_v22 = vsel %vm172_vm0, %v8800_v24, %v4439_v4  ;;  %v6694_v46 = vsel %vm172_vm0, %v8801_v43, %v4438_v59  ;;  %v6698_v23 = vsel %vm172_vm0, %v8802_v55, %v4444_v30  ;;  %v6708_v37 = vsel %vm172_vm0, %v8805_v36, %v4449_v38  ;;  %v8806_v4 = vld [vmem:[#allocation11_spill] sm:$0xff]  ;;  %v8807_v59 = vld [vmem:[#allocation14_spill] sm:$0xff]  ;;  %v8808_v30 = vld [vmem:[#allocation13_spill] sm:$0xff] }
 0x14f   : > { %8794 = vst [vmem:[#allocation57_spill] sm:$0xff] %v6653_v34  ;;  %v6659_v3 = vpop.permute.xlu0 %4761  ;;  %v6712_v24 = vsel %vm172_vm0, %v8806_v4, %v4448_v60  ;;  %v6716_v43 = vsel %vm172_vm0, %v8807_v59, %v4454_v13  ;;  %v6720_v55 = vsel %vm172_vm0, %v8808_v30, %v4453_v26  ;;  %v4468_v38 = vunpack.i.l.bf16 %v6375_v32  ;;  %v8810_v36 = vld [vmem:[#allocation15_spill] sm:$0xff] }
 0x150   : > { %8795 = vst [vmem:[#allocation58_spill] sm:$0xff] %v6659_v3  ;;  %v6730_v60 = vsel %vm172_vm0, %v8810_v36, %v4458_v16  ;;  %v6734_v13 = vsel %vm172_vm0, %v6270_v2, %v4464_v50  ;;  %v6738_v26 = vsel %vm172_vm0, %v6268_v6, %v4463_v29  ;;  %v4474_v4 = vunpack.i.h.bf16 %v6377_v40 }
 0x151   : > { %v4478_v59 = vunpack.i.l.bf16 %v6383_v41  ;;  %v4484_v16 = vunpack.i.h.bf16 %v6385_v47  ;;  %v4483_v2 = vunpack.i.l.bf16 %v6385_v47  ;;  %v4489_v50 = vunpack.i.h.bf16 %v6391_v58 }
 0x152   : > { %v6682_v44 = vpop.permute.xlu1 %4766  ;;  %v4488_v6 = vunpack.i.l.bf16 %v6391_v58  ;;  %v4493_v29 = vunpack.i.l.bf16 %v6393_v18  ;;  %v6765_v47 = vsel %vm1638_vm3, %v6590_v33, %v4474_v4  ;;  %v4498_v58 = vunpack.i.l.bf16 %v6401_v0 }
 0x153   : > { %8798 = vst [vmem:[#allocation4_spill] sm:$0xff] %v6682_v44  ;;  %v6700_v3 = vpop.permute.xlu0 %4771  ;;  %v6704_v44 = vsel %vm172_vm0, %v8804_v31, %v4443_v42  ;;  %v4469_v31 = vunpack.i.h.bf16 %v6375_v32  ;;  %v4479_v32 = vunpack.i.h.bf16 %v6383_v41  ;;  %v4494_v41 = vunpack.i.h.bf16 %v6393_v18 }
 0x154   : > { %8803 = vst [vmem:[#allocation6_spill] sm:$0xff] %v6700_v3  ;;  %v8809_v3 = vld [vmem:[#allocation16_spill] sm:$0xff]  ;;  %v4503_v34 = vunpack.i.l.bf16 %v6403_v1  ;;  %v6778_v18 = vsel %vm1638_vm3, %v6610_v62, %v4478_v59  ;;  %v6800_v62 = vsel %vm1638_vm3, %v6624_v19, %v4488_v6  ;;  %v6818_v19 = vsel %vm1638_vm3, %v6642_v21, %v4498_v58 }
 0x155   : > { %v6724_v42 = vsel %vm172_vm0, %v8809_v3, %v4459_v12  ;;  %v4473_v12 = vunpack.i.l.bf16 %v6377_v40  ;;  %v6755_v36 = vsel %vm172_vm0, %v6274_v52, %v4469_v31  ;;  %v6759_v40 = vsel %vm172_vm0, %v6272_v51, %v4468_v38 }
 0x156   : > { %v6741_v3 = vpop.permute.xlu1 %4776  ;;  %v6782_v33 = vsel %vm1638_vm3, %v6616_v63, %v4479_v32  ;;  %v6804_v63 = vsel %vm1638_vm3, %v6632_v14, %v4493_v29  ;;  %v4509_v38 = vunpack.i.h.bf16 %v6409_v8  ;;  %v6822_v14 = vsel %vm1638_vm3, %v6650_v27, %v4503_v34 }
 0x157   : > { %8811 = vst [vmem:[#allocation5_spill] sm:$0xff] %v6741_v3  ;;  %v6747_v30 = vpop.permute.xlu0 %4781  ;;  %v4504_v3 = vunpack.i.h.bf16 %v6403_v1  ;;  %v6774_v51 = vsel %vm1638_vm3, %v6598_v49, %v4473_v12  ;;  %v6792_v1 = vsel %vm1638_vm3, %v6602_v48, %v4483_v2  ;;  %v6796_v49 = vsel %vm1638_vm3, %v6620_v53, %v4489_v50  ;;  %v8815_v50 = vld [vmem:[#allocation18_spill] sm:$0xff] }
 0x158   : > { %8812 = vst [vmem:[#allocation8_spill] sm:$0xff] %v6747_v30  ;;  %v4499_v30 = vunpack.i.h.bf16 %v6401_v0  ;;  %v6786_v0 = vsel %vm1638_vm3, %v6606_v56, %v4484_v16  ;;  %v6808_v56 = vsel %vm1638_vm3, %v6628_v20, %v4494_v41  ;;  %v4508_v53 = vunpack.i.l.bf16 %v6409_v8 }
 0x159   : > { %v6826_v20 = vsel %vm1638_vm3, %v6646_v28, %v4504_v3  ;;  %v4513_v4 = vunpack.i.l.bf16 %v6411_v39  ;;  %v4514_v12 = vunpack.i.h.bf16 %v6411_v39  ;;  %v4519_v8 = vunpack.i.h.bf16 %v6417_v9 }
 0x15a   : > { %v6770_v52 = vpop.permute.xlu1 %4786  ;;  %v6812_v48 = vsel %vm1638_vm3, %v6636_v15, %v4499_v30  ;;  %v4518_v32 = vunpack.i.l.bf16 %v6417_v9  ;;  %v4523_v21 = vunpack.i.l.bf16 %v6419_v17  ;;  %v4524_v27 = vunpack.i.h.bf16 %v6419_v17  ;;  %v8814_v30 = vld [vmem:[#allocation17_spill] sm:$0xff] }
 0x15b   : > { %8813 = vst [vmem:[#allocation7_spill] sm:$0xff] %v6770_v52  ;;  %v6788_v31 = vpop.permute.xlu0 %4791  ;;  %v4529_v28 = vunpack.i.h.bf16 %v6425_v25  ;;  %v4528_v34 = vunpack.i.l.bf16 %v6425_v25  ;;  %v4533_v3 = vunpack.i.l.bf16 %v6427_v45  ;;  %v6843_v39 = vsel %vm1638_vm3, %v6667_v5, %v4509_v38 }
 0x15c   : > { %v6847_v9 = vsel %vm1638_vm3, %v6671_v10, %v4508_v53  ;;  %v4534_v16 = vunpack.i.h.bf16 %v6427_v45  ;;  %v4539_v2 = vunpack.i.h.bf16 %v8814_v30  ;;  %v6853_v17 = vsel %vm1638_vm3, %v6686_v57, %v4513_v4  ;;  %v8816_v53 = vld [vmem:[#allocation19_spill] sm:$0xff] }
 0x15d   : > { %v4538_v25 = vunpack.i.l.bf16 %v8814_v30  ;;  %v4544_v6 = vunpack.i.h.bf16 %v8815_v50  ;;  %v4543_v29 = vunpack.i.l.bf16 %v8815_v50  ;;  %v6862_v10 = vsel %vm1638_vm3, %v6677_v11, %v4514_v12  ;;  %v8817_v12 = vld [vmem:[#allocation20_spill] sm:$0xff] }
 0x15e   : > { %v6829_v15 = vpop.permute.xlu1 %4796  ;;  %v6866_v45 = vsel %vm1638_vm3, %v6690_v22, %v4519_v8  ;;  %v6870_v57 = vsel %vm1638_vm3, %v6694_v46, %v4518_v32  ;;  %v6874_v41 = vsel %vm1638_vm3, %v6704_v44, %v4523_v21  ;;  %v6880_v38 = vsel %vm1638_vm3, %v6698_v23, %v4524_v27  ;;  %v8818_v21 = vld [vmem:[#allocation21_spill] sm:$0xff] }
 0x15f   : > { %v6835_v59 = vpop.permute.xlu0 %4801  ;;  %v6884_v11 = vsel %vm1638_vm3, %v6708_v37, %v4529_v28  ;;  %v6888_v22 = vsel %vm1638_vm3, %v6712_v24, %v4528_v34  ;;  %v6892_v46 = vsel %vm1638_vm3, %v6720_v55, %v4533_v3  ;;  %v6896_v44 = vsel %vm1638_vm3, %v6716_v43, %v4534_v16  ;;  %v8821_v16 = vld [vmem:[#allocation23_spill] sm:$0xff] }
 0x160   : > { %v6900_v23 = vsel %vm1638_vm3, %v6724_v42, %v4539_v2  ;;  %v4549_v4 = vunpack.i.h.bf16 %v8816_v53  ;;  %v4548_v37 = vunpack.i.l.bf16 %v8816_v53  ;;  %v6906_v24 = vsel %vm1638_vm3, %v6730_v60, %v4538_v25  ;;  %v8819_v60 = vld [vmem:[#allocation22_spill] sm:$0xff]  ;;  %v8822_v2 = vld [vmem:[#allocation24_spill] sm:$0xff]  ;;  %v8825_v53 = vld [vmem:[#allocation25_spill] sm:$0xff] }
 0x161   : > { %v6910_v55 = vsel %vm1638_vm3, %v6738_v26, %v4543_v29  ;;  %v6914_v43 = vsel %vm1638_vm3, %v6734_v13, %v4544_v6  ;;  %v4553_v8 = vunpack.i.l.bf16 %v8817_v12  ;;  %v4554_v32 = vunpack.i.h.bf16 %v8817_v12 }
 0x162   : > { %v6858_v5 = vpop.permute.xlu1 %4806  ;;  %v4559_v27 = vunpack.i.h.bf16 %v8818_v21  ;;  %v4558_v28 = vunpack.i.l.bf16 %v8818_v21  ;;  %v4563_v34 = vunpack.i.l.bf16 %v8819_v60  ;;  %v4564_v26 = vunpack.i.h.bf16 %v8819_v60 }
 0x163   : > { %v6876_v58 = vpop.permute.xlu0 %4811  ;;  %v4569_v30 = vunpack.i.h.bf16 %v8821_v16  ;;  %v4568_v13 = vunpack.i.l.bf16 %v8821_v16  ;;  %v4573_v25 = vunpack.i.l.bf16 %v8822_v2  ;;  %v6931_v50 = vsel %vm1638_vm3, %v6755_v36, %v4549_v4  ;;  %v8826_v16 = vld [vmem:[#allocation26_spill] sm:$0xff] }
 0x164   : > { %8823 = vst [vmem:[#allocation9_spill] sm:$0xff] %v6931_v50  ;;  %v6935_v6 = vsel %vm1638_vm3, %v6759_v40, %v4548_v37  ;;  %v4574_v29 = vunpack.i.h.bf16 %v8822_v2  ;;  %v4578_v12 = vunpack.i.l.bf16 %v8825_v53  ;;  %v6941_v21 = vsel %vm1671_vm4, %v6774_v51, %v4553_v8 }
 0x165   : > { %8824 = vst [vmem:[#allocation12_spill] sm:$0xff] %v6935_v6  ;;  %v4579_v60 = vunpack.i.h.bf16 %v8825_v53  ;;  %v4584_v52 = vunpack.i.h.bf16 %v8826_v16  ;;  %v6950_v40 = vsel %vm1671_vm4, %v6765_v47, %v4554_v32  ;;  %v6954_v4 = vsel %vm1671_vm4, %v6778_v18, %v4558_v28  ;;  %v8828_v32 = vld [vmem:[#allocation27_spill] sm:$0xff]  ;;  %v8829_v28 = vld [vmem:[#allocation28_spill] sm:$0xff]  ;;  %v8837_v6 = vld [vmem:[#allocation34_spill] sm:$0xff] }
 0x166   : > { %v6917_v42 = vpop.permute.xlu1 %4816  ;;  %v6958_v51 = vsel %vm1671_vm4, %v6782_v33, %v4559_v27  ;;  %v6962_v37 = vsel %vm1671_vm4, %v6792_v1, %v4563_v34  ;;  %v6968_v2 = vsel %vm1671_vm4, %v6786_v0, %v4564_v26  ;;  %v6972_v47 = vsel %vm1671_vm4, %v6800_v62, %v4568_v13 }
 0x167   : > { %v6923_v3 = vpop.permute.xlu0 %4821  ;;  %v6976_v18 = vsel %vm1671_vm4, %v6796_v49, %v4569_v30  ;;  %v6980_v33 = vsel %vm1671_vm4, %v6804_v63, %v4573_v25  ;;  %v6984_v1 = vsel %vm1671_vm4, %v6808_v56, %v4574_v29  ;;  %v6988_v0 = vsel %vm1671_vm4, %v6818_v19, %v4578_v12  ;;  %v8831_v30 = vld [vmem:[#allocation29_spill] sm:$0xff]  ;;  %v8832_v25 = vld [vmem:[#allocation30_spill] sm:$0xff]  ;;  %v8835_v12 = vld [vmem:[#allocation32_spill] sm:$0xff] }
 0x168   : > { %8820 = vst [vmem:[#allocation10_spill] sm:$0xff] %v6923_v3  ;;  %v4583_v3 = vunpack.i.l.bf16 %v8826_v16  ;;  %v4589_v27 = vunpack.i.h.bf16 %v8828_v32  ;;  %v4588_v62 = vunpack.i.l.bf16 %v8828_v32  ;;  %v6994_v49 = vsel %vm1671_vm4, %v6812_v48, %v4579_v60 }
 0x169   : > { %v7002_v56 = vsel %vm1671_vm4, %v6826_v20, %v4584_v52  ;;  %v4593_v34 = vunpack.i.l.bf16 %v8829_v28  ;;  %v4594_v26 = vunpack.i.h.bf16 %v8829_v28  ;;  %v4599_v13 = vunpack.i.h.bf16 %v8831_v30 }
 0x16a   : > { %v6946_v36 = vpop.permute.xlu1 %4826  ;;  %v6998_v63 = vsel %vm1671_vm4, %v6822_v14, %v4583_v3  ;;  %v4598_v48 = vunpack.i.l.bf16 %v8831_v30  ;;  %v4603_v29 = vunpack.i.l.bf16 %v8832_v25  ;;  %v4604_v14 = vunpack.i.h.bf16 %v8832_v25  ;;  %v8834_v3 = vld [vmem:[#allocation31_spill] sm:$0xff]  ;;  %v8836_v30 = vld [vmem:[#allocation33_spill] sm:$0xff] }
 0x16b   : > { %v6964_v8 = vpop.permute.xlu0 %4831  ;;  %v4609_v52 = vunpack.i.h.bf16 %v8834_v3  ;;  %v4608_v20 = vunpack.i.l.bf16 %v8834_v3  ;;  %v4613_v60 = vunpack.i.l.bf16 %v8835_v12  ;;  %v7019_v16 = vsel %vm1671_vm4, %v6847_v9, %v4588_v62 }
 0x16c   : > { %8827 = vst [vmem:[#allocation11_spill] sm:$0xff] %v6964_v8  ;;  %v7023_v32 = vsel %vm1671_vm4, %v6843_v39, %v4589_v27  ;;  %v4614_v28 = vunpack.i.h.bf16 %v8835_v12  ;;  %v4618_v50 = vunpack.i.l.bf16 %v8836_v30  ;;  %v7029_v25 = vsel %vm1671_vm4, %v6853_v17, %v4593_v34 }
 0x16d   : > { %v4619_v3 = vunpack.i.h.bf16 %v8836_v30  ;;  %v7038_v39 = vsel %vm1671_vm4, %v6862_v10, %v4594_v26  ;;  %v7042_v27 = vsel %vm1671_vm4, %v6870_v57, %v4598_v48  ;;  %v7046_v17 = vsel %vm1671_vm4, %v6866_v45, %v4599_v13  ;;  %v8840_v26 = vld [vmem:[#allocation36_spill] sm:$0xff]  ;;  %v8841_v48 = vld [vmem:[#allocation37_spill] sm:$0xff] }
 0x16e   : > { %v7005_v19 = vpop.permute.xlu1 %4836  ;;  %v7050_v62 = vsel %vm1671_vm4, %v6874_v41, %v4603_v29  ;;  %v7060_v10 = vsel %vm1671_vm4, %v6888_v22, %v4608_v20  ;;  %v7064_v57 = vsel %vm1671_vm4, %v6884_v11, %v4609_v52  ;;  %v7068_v45 = vsel %vm1671_vm4, %v6892_v46, %v4613_v60 }
 0x16f   : > { %8830 = vst [vmem:[#allocation14_spill] sm:$0xff] %v7005_v19  ;;  %v7011_v53 = vpop.permute.xlu0 %4841  ;;  %v4623_v19 = vunpack.i.l.bf16 %v8837_v6  ;;  %v7072_v41 = vsel %vm1671_vm4, %v6896_v44, %v4614_v28  ;;  %v4634_v13 = vunpack.i.h.bf16 %v8840_v26  ;;  %v4633_v22 = vunpack.i.l.bf16 %v8840_v26  ;;  %v8849_v28 = vld [vmem:[#allocation42_spill] sm:$0xff] }
 0x170   : > { %8833 = vst [vmem:[#allocation13_spill] sm:$0xff] %v7011_v53  ;;  %v4624_v53 = vunpack.i.h.bf16 %v8837_v6  ;;  %v7056_v6 = vsel %vm1671_vm4, %v6880_v38, %v4604_v14  ;;  %v7076_v38 = vsel %vm1671_vm4, %v6906_v24, %v4618_v50  ;;  %v7082_v11 = vsel %vm1671_vm4, %v6900_v23, %v4619_v3  ;;  %v8843_v14 = vld [vmem:[#allocation38_spill] sm:$0xff]  ;;  %v8844_v23 = vld [vmem:[#allocation39_spill] sm:$0xff] }
 0x171   : > { %v7086_v46 = vsel %vm1671_vm4, %v6910_v55, %v4623_v19  ;;  %v4638_v29 = vunpack.i.l.bf16 %v8841_v48  ;;  %v4639_v50 = vunpack.i.h.bf16 %v8841_v48  ;;  %v4644_v52 = vunpack.i.h.bf16 %v8843_v14 }
 0x172   : > { %v7034_v9 = vpop.permute.xlu1 %4846  ;;  %v7090_v44 = vsel %vm1671_vm4, %v6914_v43, %v4624_v53  ;;  %v4643_v20 = vunpack.i.l.bf16 %v8843_v14  ;;  %v4648_v12 = vunpack.i.l.bf16 %v8844_v23  ;;  %v4649_v43 = vunpack.i.h.bf16 %v8844_v23  ;;  %v8847_v53 = vld [vmem:[#allocation40_spill] sm:$0xff]  ;;  %v8848_v14 = vld [vmem:[#allocation41_spill] sm:$0xff] }
 0x173   : > { %8838 = vst [vmem:[#allocation16_spill] sm:$0xff] %v7034_v9  ;;  %v7052_v34 = vpop.permute.xlu0 %4851  ;;  %v4653_v30 = vunpack.i.l.bf16 %v8847_v53  ;;  %v7107_v3 = vsel %vm1704_vm5, %v6941_v21, %v4633_v22  ;;  %v7111_v26 = vsel %vm1704_vm5, %v6950_v40, %v4634_v13  ;;  %v4654_v48 = vunpack.i.h.bf16 %v8847_v53  ;;  %v8853_v53 = vld [vmem:[#allocation45_spill] sm:$0xff] }
 0x174   : > { %8839 = vst [vmem:[#allocation15_spill] sm:$0xff] %v7052_v34  ;;  %v7117_v19 = vsel %vm1704_vm5, %v6954_v4, %v4638_v29  ;;  %v4659_v23 = vunpack.i.h.bf16 %v8848_v14  ;;  %v4664_v55 = vunpack.i.h.bf16 %v8849_v28  ;;  %v7126_v40 = vsel %vm1704_vm5, %v6958_v51, %v4639_v50 }
 0x175   : > { %v7130_v13 = vsel %vm1704_vm5, %v6962_v37, %v4643_v20  ;;  %v7134_v4 = vsel %vm1704_vm5, %v6968_v2, %v4644_v52  ;;  %v7138_v22 = vsel %vm1704_vm5, %v6972_v47, %v4648_v12  ;;  %v7148_v51 = vsel %vm1704_vm5, %v6980_v33, %v4653_v30  ;;  %v8851_v37 = vld [vmem:[#allocation43_spill] sm:$0xff]  ;;  %v8852_v52 = vld [vmem:[#allocation44_spill] sm:$0xff] }
 0x176   : > { %v7093_v24 = vpop.permute.xlu1 %4856  ;;  %v4669_v50 = vunpack.i.h.bf16 %v8851_v37  ;;  %v4668_v20 = vunpack.i.l.bf16 %v8851_v37  ;;  %v7154_v2 = vsel %vm1704_vm5, %v6984_v1, %v4654_v48  ;;  %v4674_v12 = vunpack.i.h.bf16 %v8852_v52  ;;  %v8854_v48 = vld [vmem:[#allocation46_spill] sm:$0xff] }
 0x177   : > { %8842 = vst [vmem:[#allocation17_spill] sm:$0xff] %v7093_v24  ;;  %v7099_v60 = vpop.permute.xlu0 %4861  ;;  %v4663_v24 = vunpack.i.l.bf16 %v8849_v28  ;;  %v7144_v28 = vsel %vm1704_vm5, %v6976_v18, %v4649_v43  ;;  %v4673_v18 = vunpack.i.l.bf16 %v8852_v52  ;;  %v7164_v33 = vsel %vm1704_vm5, %v6994_v49, %v4659_v23  ;;  %v8855_v49 = vld [vmem:[#allocation47_spill] sm:$0xff] }
 0x178   : > { %8845 = vst [vmem:[#allocation18_spill] sm:$0xff] %v7099_v60  ;;  %v4658_v60 = vunpack.i.l.bf16 %v8848_v14  ;;  %v7172_v1 = vsel %vm1704_vm5, %v7002_v56, %v4664_v55  ;;  %v4679_v30 = vunpack.i.h.bf16 %v8853_v53  ;;  %v4684_v14 = vunpack.i.h.bf16 %v8854_v48  ;;  %v8856_v55 = vld [vmem:[#allocation48_spill] sm:$0xff] }
 0x179   : > { %v7168_v43 = vsel %vm1704_vm5, %v6998_v63, %v4663_v24  ;;  %v4683_v37 = vunpack.i.l.bf16 %v8854_v48  ;;  %v4688_v23 = vunpack.i.l.bf16 %v8855_v49  ;;  %v7185_v63 = vsel %vm1704_vm5, %v7019_v16, %v4668_v20  ;;  %v8857_v16 = vld [vmem:[#allocation49_spill] sm:$0xff] }
 0x17a   : > { %v7122_v21 = vpop.permute.xlu1 %4866  ;;  %v7158_v47 = vsel %vm1704_vm5, %v6988_v0, %v4658_v60  ;;  %v4678_v0 = vunpack.i.l.bf16 %v8853_v53  ;;  %v7189_v56 = vsel %vm1704_vm5, %v7023_v32, %v4669_v50  ;;  %v4689_v24 = vunpack.i.h.bf16 %v8855_v49  ;;  %v8858_v49 = vld [vmem:[#allocation50_spill] sm:$0xff] }
 0x17b   : > { %8850 = vst [vmem:[#allocation19_spill] sm:$0xff] %v7122_v21  ;;  %v7140_v29 = vpop.permute.xlu0 %4871  ;;  %v4693_v53 = vunpack.i.l.bf16 %v8856_v55  ;;  %v7195_v21 = vsel %vm1704_vm5, %v7029_v25, %v4673_v18  ;;  %v7199_v48 = vsel %vm1704_vm5, %v7038_v39, %v4674_v12  ;;  %v4694_v34 = vunpack.i.h.bf16 %v8856_v55 }
 0x17c   : > { %v4698_v20 = vunpack.i.l.bf16 %v8857_v16  ;;  %v7205_v32 = vsel %vm1704_vm5, %v7042_v27, %v4678_v0  ;;  %v4699_v50 = vunpack.i.h.bf16 %v8857_v16  ;;  %v4704_v9 = vunpack.i.h.bf16 %v8858_v49 }
 0x17d   : > { %v4703_v8 = vunpack.i.l.bf16 %v8858_v49  ;;  %v7214_v39 = vsel %vm1704_vm5, %v7046_v17, %v4679_v30  ;;  %v7218_v12 = vsel %vm1704_vm5, %v7050_v62, %v4683_v37  ;;  %v7222_v27 = vsel %vm1704_vm5, %v7056_v6, %v4684_v14 }
 0x17e   : > { %v7175_v60 = vpop.permute.xlu1 %4876  ;;  %v7226_v18 = vsel %vm1704_vm5, %v7060_v10, %v4688_v23  ;;  %v7232_v55 = vsel %vm1704_vm5, %v7064_v57, %v4689_v24  ;;  %v7236_v17 = vsel %vm1704_vm5, %v7068_v45, %v4693_v53  ;;  %v4714_v62 = vunpack.i.h.bf16 %v6556_v35 }
 0x17f   : > { %v7181_v52 = vpop.permute.xlu0 %4881  ;;  %v4713_v30 = vunpack.i.l.bf16 %v6556_v35  ;;  %v7242_v6 = vsel %vm1704_vm5, %v7072_v41, %v4694_v34  ;;  %v7246_v10 = vsel %vm1704_vm5, %v7076_v38, %v4698_v20  ;;  %v4719_v57 = vunpack.i.h.bf16 %v6560_v61  ;;  %v8861_v41 = vld [vmem:[#allocation52_spill] sm:$0xff] }
 0x180   : > { %v4718_v14 = vunpack.i.l.bf16 %v6560_v61  ;;  %v7252_v45 = vsel %vm1704_vm5, %v7082_v11, %v4699_v50  ;;  %v7256_v35 = vsel %vm1704_vm5, %v7086_v46, %v4703_v8  ;;  %v7260_v34 = vsel %vm1704_vm5, %v7090_v44, %v4704_v9  ;;  %v8863_v11 = vld [vmem:[#allocation53_spill] sm:$0xff]  ;;  %v8864_v44 = vld [vmem:[#allocation54_spill] sm:$0xff]  ;;  %v8865_v61 = vld [vmem:[#allocation55_spill] sm:$0xff] }
 0x181   : > { %8859 = vst [vmem:[#allocation20_spill] sm:$0xff] %v7256_v35  ;;  %8860 = vst [vmem:[#allocation21_spill] sm:$0xff] %v7260_v34  ;;  %v4723_v37 = vunpack.i.l.bf16 %v8861_v41  ;;  %v4724_v53 = vunpack.i.h.bf16 %v8861_v41  ;;  %v4728_v16 = vunpack.i.l.bf16 %v8863_v11  ;;  %v1738_v8 = vsel %vm1737_vm6, %v7107_v3, %v4713_v30 }
 0x182   : > { %v7210_v25 = vpop.permute.xlu1 %4886  ;;  %v1739_v9 = vsel %vm1737_vm6, %v7111_v26, %v4714_v62  ;;  %v4729_v46 = vunpack.i.h.bf16 %v8863_v11  ;;  %v4733_v50 = vunpack.i.l.bf16 %v8864_v44  ;;  %v1740_v49 = vsel %vm1737_vm6, %v7117_v19, %v4718_v14  ;;  %v8866_v62 = vld [vmem:[#allocation56_spill] sm:$0xff] }
 0x183   : > { %v7228_v0 = vpop.permute.xlu0 %4891  ;;  %v1741_v41 = vsel %vm1737_vm6, %v7126_v40, %v4719_v57  ;;  %v4734_v24 = vunpack.i.h.bf16 %v8864_v44  ;;  %v4738_v23 = vunpack.i.l.bf16 %v8865_v61  ;;  %v1742_v3 = vsel %vm1737_vm6, %v7130_v13, %v4723_v37 }
 0x184   : > { %v4739_v26 = vunpack.i.h.bf16 %v8865_v61  ;;  %v4744_v30 = vunpack.i.h.bf16 %v8866_v62  ;;  %v4743_v11 = vunpack.i.l.bf16 %v8866_v62  ;;  %v1743_v19 = vsel %vm1737_vm6, %v7134_v4, %v4724_v53 }
 0x185   : > { %v7294_v40 = vsel %vm1737_vm6, %v7138_v22, %v4728_v16  ;;  %v4794_v57 = vunpack.i.h.bf16 %v6788_v31  ;;  %v4793_v13 = vunpack.i.l.bf16 %v6788_v31  ;;  %v7302_v37 = vsel %vm1737_vm6, %v7144_v28, %v4729_v46 }
 0x186   : > { %v7263_v38 = vpop.permute.xlu1 %4896  ;;  %v7306_v61 = vsel %vm1737_vm6, %v7148_v51, %v4733_v50  ;;  %v4799_v4 = vunpack.i.h.bf16 %v6829_v15  ;;  %v4798_v53 = vunpack.i.l.bf16 %v6829_v15  ;;  %v7312_v22 = vsel %vm1737_vm6, %v7154_v2, %v4734_v24 }
 0x187   : > { %v7269_v20 = vpop.permute.xlu0 %4901  ;;  %v7316_v31 = vsel %vm1737_vm6, %v7158_v47, %v4738_v23  ;;  %v4804_v16 = vunpack.i.h.bf16 %v6835_v59  ;;  %v4803_v28 = vunpack.i.l.bf16 %v6835_v59  ;;  %v7322_v51 = vsel %vm1737_vm6, %v7164_v33, %v4739_v26 }
 0x188   : > { %v7326_v15 = vsel %vm1737_vm6, %v7168_v43, %v4743_v11  ;;  %v7330_v2 = vsel %vm1737_vm6, %v7172_v1, %v4744_v30  ;;  %v4874_v24 = vunpack.i.h.bf16 %v7140_v29  ;;  %v4873_v59 = vunpack.i.l.bf16 %v7140_v29 }
 0x189   : > { %v1771_v33 = vsel %vm1770_vm7, %v1738_v8, %v4793_v13  ;;  %v1772_v44 = vsel %vm1770_vm7, %v1739_v9, %v4794_v57  ;;  %v1773_v43 = vsel %vm1770_vm7, %v1740_v49, %v4798_v53  ;;  %v1774_v50 = vsel %vm1770_vm7, %v1741_v41, %v4799_v4 }
 0x18a   : > { %v7288_v34 = vpop.permute.xlu1 %4906  ;;  %v4879_v1 = vunpack.i.h.bf16 %v7175_v60  ;;  %v4878_v26 = vunpack.i.l.bf16 %v7175_v60  ;;  %v1775_v62 = vsel %vm1770_vm7, %v1742_v3, %v4803_v28  ;;  %v1776_v30 = vsel %vm1770_vm7, %v1743_v19, %v4804_v16 }
 0x18b   : > { %v7298_v14 = vpop.permute.xlu0 %4911  ;;  %v4884_v29 = vunpack.i.h.bf16 %v7181_v52  ;;  %v4883_v11 = vunpack.i.l.bf16 %v7181_v52  ;;  %v4809_v8 = vunpack.i.h.bf16 %v6858_v5  ;;  %v4808_v9 = vunpack.i.l.bf16 %v6858_v5 }
 0x18c   : > { %v4814_v49 = vunpack.i.h.bf16 %v6876_v58  ;;  %v4813_v41 = vunpack.i.l.bf16 %v6876_v58  ;;  %v1804_v3 = vsel %vm1803_vm8, %v1771_v33, %v4873_v59  ;;  %v1805_v19 = vsel %vm1803_vm8, %v1772_v44, %v4874_v24 }
 0x18d   : > { %v1806_v53 = vsel %vm1803_vm8, %v1773_v43, %v4878_v26  ;;  %v1807_v52 = vsel %vm1803_vm8, %v1774_v50, %v4879_v1  ;;  %v1808_v5 = vsel %vm1803_vm8, %v1775_v62, %v4883_v11  ;;  %v1809_v47 = vsel %vm1803_vm8, %v1776_v30, %v4884_v29 }
 0x18e   : > { %v7333_v23 = vpop.permute.xlu1 %4916  ;;  %v4888_v43 = vunpack.i.l.bf16 %v7210_v25  ;;  %v4894_v30 = vunpack.i.h.bf16 %v7228_v0  ;;  %v4893_v29 = vunpack.i.l.bf16 %v7228_v0  ;;  %v1779_v0 = vsel %vm1770_vm7, %v7306_v61, %v4813_v41 }
 0x18f   : > { %v7337_v46 = vpop.permute.xlu0 %4921 }
 0x192   : > { %v4927_v57 = vpop.permute.xlu1 %4926 }
 0x193   : > { %v4929_v13 = vunpack.i.h.bf16 %v4927_v57  ;;  %v4928_v4 = vunpack.i.l.bf16 %v4927_v57  ;;  %v4932_v60 = vpop.permute.xlu0 %4931  ;;  %v4889_v57 = vunpack.i.h.bf16 %v7210_v25 }
 0x194   : > { %v4934_v16 = vunpack.i.h.bf16 %v4932_v60  ;;  %v4933_v28 = vunpack.i.l.bf16 %v4932_v60  ;;  %v1777_v60 = vsel %vm1770_vm7, %v7294_v40, %v4808_v9 }
 0x195   : > { %v1837_v58 = vsel %vm1836_vm9, %v1804_v3, %v4928_v4  ;;  %v1838_v35 = vsel %vm1836_vm9, %v1805_v19, %v4929_v13  ;;  %v4748_v4 = vunpack.i.l.bf16 %v6595_v54  ;;  %v1778_v3 = vsel %vm1770_vm7, %v7302_v37, %v4809_v8 }
 0x196   : > { %v1839_v59 = vsel %vm1836_vm9, %v1806_v53, %v4933_v28  ;;  %v1840_v24 = vsel %vm1836_vm9, %v1807_v52, %v4934_v16  ;;  %v4937_v33 = vpop.permute.xlu1 %4936  ;;  %v1869_v44 = vpack.c.bf16 %v1838_v35, %v1837_v58  ;;  %v1780_v19 = vsel %vm1770_vm7, %v7312_v22, %v4814_v49 }
 0x197   : > { %v4939_v50 = vunpack.i.h.bf16 %v4937_v33  ;;  %v4938_v1 = vunpack.i.l.bf16 %v4937_v33  ;;  %v4942_v26 = vpop.permute.xlu0 %4941  ;;  %v1870_v62 = vpack.c.bf16 %v1840_v24, %v1839_v59  ;;  %v1810_v16 = vsel %vm1803_vm8, %v1777_v60, %v4888_v43  ;;  %v8867_v24 = vld [vmem:[#allocation10_spill] sm:$0xff] }
 0x198   : > { %v4944_v11 = vunpack.i.h.bf16 %v4942_v26  ;;  %v4943_v13 = vunpack.i.l.bf16 %v4942_v26  ;;  %4301 = vmatprep.mubr.msk.bf16.mxu0 %vm1905_vm10, %v1869_v44  ;;  %v1811_v40 = vsel %vm1803_vm8, %v1778_v3, %v4889_v57  ;;  %v1813_v58 = vsel %vm1803_vm8, %v1780_v19, %v4894_v30 }
 0x199   : > { %v1841_v35 = vsel %vm1836_vm9, %v1808_v5, %v4938_v1  ;;  %v1842_v25 = vsel %vm1836_vm9, %v1809_v47, %v4939_v50  ;;  %4302 = vmatmul.mubr.msk.bf16.vlgmr.msra.gmra.mxu0 %vm1905_vm10, %v1870_v62  ;;  %v1812_v5 = vsel %vm1803_vm8, %v1779_v0, %v4893_v29  ;;  %v4754_v22 = vunpack.i.h.bf16 %v6612_v7 }
 0x19a   : > { %v4947_v53 = vpop.permute.xlu1 %4946  ;;  %v1871_v52 = vpack.c.bf16 %v1842_v25, %v1841_v35  ;;  %v1844_v37 = vsel %vm1836_vm9, %v1811_v40, %v4944_v11  ;;  %v1843_v61 = vsel %vm1836_vm9, %v1810_v16, %v4943_v13  ;;  %v4753_v8 = vunpack.i.l.bf16 %v6612_v7  ;;  %v8869_v16 = vld [vmem:[#allocation57_spill] sm:$0xff] }
 0x19b   : > { %v4949_v9 = vunpack.i.h.bf16 %v4947_v53  ;;  %v4948_v28 = vunpack.i.l.bf16 %v4947_v53  ;;  %v4952_v47 = vpop.permute.xlu0 %4951  ;;  %v4819_v57 = vunpack.i.h.bf16 %v6917_v42  ;;  %v4818_v59 = vunpack.i.l.bf16 %v6917_v42 }
 0x19c   : > { %4305 = vmatprep.mubr.msk.bf16.mxu0 %vm1905_vm10, %v1871_v52  ;;  %v4824_v33 = vunpack.i.h.bf16 %v8867_v24  ;;  %v4823_v44 = vunpack.i.l.bf16 %v8867_v24  ;;  %v4899_v50 = vunpack.i.h.bf16 %v7263_v38  ;;  %v4898_v1 = vunpack.i.l.bf16 %v7263_v38 }
 0x19d   : > { %v1845_v49 = vsel %vm1836_vm9, %v1812_v5, %v4948_v28  ;;  %v1846_v41 = vsel %vm1836_vm9, %v1813_v58, %v4949_v9  ;;  %v4904_v26 = vunpack.i.h.bf16 %v7269_v20  ;;  %v1872_v62 = vpack.c.bf16 %v1844_v37, %v1843_v61  ;;  %v8870_v5 = vld [vmem:[#allocation11_spill] sm:$0xff] }
 0x19e   : > { %v4957_v43 = vpop.permute.xlu1 %4956  ;;  %v4903_v30 = vunpack.i.l.bf16 %v7269_v20  ;;  %v4954_v29 = vunpack.i.h.bf16 %v4952_v47  ;;  %v4953_v11 = vunpack.i.l.bf16 %v4952_v47  ;;  %v1873_v13 = vpack.c.bf16 %v1846_v41, %v1845_v49 }
 0x19f   : > { %v7398_v7 = vpop.permute.xlu0 %4961  ;;  %v1752_v42 = vsel %vm1737_vm6, %v7185_v63, %v4748_v4  ;;  %v8868_v60 = vunpack.i.h.bf16 %v6595_v54  ;;  %v4959_v25 = vunpack.i.h.bf16 %v4957_v43  ;;  %v4958_v38 = vunpack.i.l.bf16 %v4957_v43 }
 0x1a0   : > { %v1754_v3 = vsel %vm1737_vm6, %v7195_v21, %v4753_v8  ;;  %v1755_v20 = vsel %vm1737_vm6, %v7199_v48, %v4754_v22  ;;  %v1781_v0 = vsel %vm1770_vm7, %v7316_v31, %v4818_v59  ;;  %v1782_v63 = vsel %vm1770_vm7, %v7322_v51, %v4819_v57 }
 0x1a1   : > { %v1753_v35 = vsel %vm1737_vm6, %v7189_v56, %v8868_v60  ;;  %4306 = vmatmul.mubr.msk.bf16.gmra.mxu0 %vm1905_vm10, %v1872_v62  ;;  %v1783_v56 = vsel %vm1770_vm7, %v7326_v15, %v4823_v44  ;;  %v1784_v4 = vsel %vm1770_vm7, %v7330_v2, %v4824_v33  ;;  %v1814_v21 = vsel %vm1803_vm8, %v1781_v0, %v4898_v1  ;;  %v8871_v44 = vld [vmem:[#allocation58_spill] sm:$0xff] }
 0x1a2   : > { %v4967_v54 = vpop.permute.xlu1 %4966  ;;  %4309 = vmatprep.mubr.msk.bf16.mxu0 %vm1905_vm10, %v1873_v13  ;;  %v1815_v19 = vsel %vm1803_vm8, %v1782_v63, %v4899_v50  ;;  %v1816_v31 = vsel %vm1803_vm8, %v1783_v56, %v4903_v30  ;;  %v1817_v53 = vsel %vm1803_vm8, %v1784_v4, %v4904_v26  ;;  %v1847_v52 = vsel %vm1836_vm9, %v1814_v21, %v4953_v11  ;;  %v8872_v63 = vld [vmem:[#allocation14_spill] sm:$0xff]  ;;  %v8873_v4 = vld [vmem:[#allocation13_spill] sm:$0xff] }
 0x1a3   : > { %v7423_v48 = vpop.permute.xlu0 %4971  ;;  %v1848_v51 = vsel %vm1836_vm9, %v1815_v19, %v4954_v29  ;;  %v4759_v40 = vunpack.i.h.bf16 %v8869_v16  ;;  %v4758_v15 = vunpack.i.l.bf16 %v8869_v16  ;;  %v1849_v2 = vsel %vm1836_vm9, %v1816_v31, %v4958_v38 }
 0x1a4   : > { %v1850_v9 = vsel %vm1836_vm9, %v1817_v53, %v4959_v25  ;;  %v4829_v28 = vunpack.i.h.bf16 %v6946_v36  ;;  %v4828_v47 = vunpack.i.l.bf16 %v6946_v36  ;;  %v4834_v58 = vunpack.i.h.bf16 %v8870_v5 }
 0x1a5   : > { %v4833_v37 = vunpack.i.l.bf16 %v8870_v5  ;;  %v4909_v61 = vunpack.i.h.bf16 %v7288_v34  ;;  %v4908_v22 = vunpack.i.l.bf16 %v7288_v34  ;;  %v4914_v8 = vunpack.i.h.bf16 %v7298_v14 }
 0x1a6   : > { %v7440_v49 = vpop.permute.xlu1 %4976  ;;  %v1874_v57 = vpack.c.bf16 %v1848_v51, %v1847_v52  ;;  %v4913_v59 = vunpack.i.l.bf16 %v7298_v14  ;;  %v4964_v24 = vunpack.i.h.bf16 %v7398_v7  ;;  %v4963_v36 = vunpack.i.l.bf16 %v7398_v7 }
 0x1a7   : > { %v7442_v41 = vpop.permute.xlu0 %4981  ;;  %v1875_v33 = vpack.c.bf16 %v1850_v9, %v1849_v2  ;;  %v4764_v43 = vunpack.i.h.bf16 %v8871_v44  ;;  %v4763_v50 = vunpack.i.l.bf16 %v8871_v44  ;;  %v4969_v1 = vunpack.i.h.bf16 %v4967_v54 }
 0x1a8   : > { %v4968_v34 = vunpack.i.l.bf16 %v4967_v54  ;;  %v1756_v26 = vsel %vm1737_vm6, %v7205_v32, %v4758_v15  ;;  %v1757_v62 = vsel %vm1737_vm6, %v7214_v39, %v4759_v40  ;;  %v1785_v14 = vsel %vm1770_vm7, %v1752_v42, %v4828_v47  ;;  %v8874_v15 = vld [vmem:[#allocation4_spill] sm:$0xff] }
 0x1a9   : > { %4310 = vmatmul.mubr.msk.bf16.gmra.mxu0 %vm1905_vm10, %v1874_v57  ;;  %v1786_v30 = vsel %vm1770_vm7, %v1753_v35, %v4829_v28  ;;  %v1787_v7 = vsel %vm1770_vm7, %v1754_v3, %v4833_v37  ;;  %v1788_v29 = vsel %vm1770_vm7, %v1755_v20, %v4834_v58  ;;  %v1818_v11 = vsel %vm1803_vm8, %v1785_v14, %v4908_v22  ;;  %v8877_v14 = vld [vmem:[#allocation15_spill] sm:$0xff] }
 0x1aa   : > { %4313 = vmatprep.mubr.msk.bf16.mxu0 %vm1905_vm10, %v1875_v33  ;;  %v1819_v13 = vsel %vm1803_vm8, %v1786_v30, %v4909_v61  ;;  %v1820_v60 = vsel %vm1803_vm8, %v1787_v7, %v4913_v59  ;;  %v1821_v32 = vsel %vm1803_vm8, %v1788_v29, %v4914_v8  ;;  %v1851_v42 = vsel %vm1836_vm9, %v1818_v11, %v4963_v36  ;;  %v7473_v0 = vpop.permute.xlu1 %4986 }
 0x1ab   : > { %v1852_v39 = vsel %vm1836_vm9, %v1819_v13, %v4964_v24  ;;  %v7465_v25 = vpop.permute.xlu0 %4991  ;;  %v1758_v35 = vsel %vm1737_vm6, %v7218_v12, %v4763_v50  ;;  %v1759_v38 = vsel %vm1737_vm6, %v7222_v27, %v4764_v43  ;;  %v1853_v3 = vsel %vm1836_vm9, %v1820_v60, %v4968_v34  ;;  %v8876_v34 = vld [vmem:[#allocation16_spill] sm:$0xff] }
 0x1ac   : > { %v1854_v20 = vsel %vm1836_vm9, %v1821_v32, %v4969_v1  ;;  %v4839_v54 = vunpack.i.h.bf16 %v8872_v63  ;;  %v4838_v56 = vunpack.i.l.bf16 %v8872_v63  ;;  %v4844_v21 = vunpack.i.h.bf16 %v8873_v4  ;;  %v8878_v63 = vld [vmem:[#allocation5_spill] sm:$0xff] }
 0x1ad   : > { %v4843_v19 = vunpack.i.l.bf16 %v8873_v4  ;;  %v4919_v31 = vunpack.i.h.bf16 %v7333_v23  ;;  %v4918_v12 = vunpack.i.l.bf16 %v7333_v23  ;;  %v4924_v27 = vunpack.i.h.bf16 %v7337_v46  ;;  %v8875_v23 = vld [vmem:[#allocation6_spill] sm:$0xff] }
 0x1ae   : > { %v1876_v53 = vpack.c.bf16 %v1852_v39, %v1851_v42  ;;  %v4923_v51 = vunpack.i.l.bf16 %v7337_v46  ;;  %v4974_v52 = vunpack.i.h.bf16 %v7423_v48  ;;  %v4973_v16 = vunpack.i.l.bf16 %v7423_v48  ;;  %v7499_v57 = vpop.permute.xlu1 %4996 }
 0x1af   : > { %v1877_v40 = vpack.c.bf16 %v1854_v20, %v1853_v3  ;;  %v4769_v2 = vunpack.i.h.bf16 %v8874_v15  ;;  %v4768_v9 = vunpack.i.l.bf16 %v8874_v15  ;;  %v4984_v28 = vunpack.i.h.bf16 %v7442_v41  ;;  %v5002_v48 = vpop.permute.xlu0 %5001  ;;  %v8880_v15 = vld [vmem:[#allocation17_spill] sm:$0xff] }
 0x1b0   : > { %v4983_v47 = vunpack.i.l.bf16 %v7442_v41  ;;  %v4774_v5 = vunpack.i.h.bf16 %v8875_v23  ;;  %v4773_v58 = vunpack.i.l.bf16 %v8875_v23  ;;  %v1789_v46 = vsel %vm1770_vm7, %v1756_v26, %v4838_v56 }
 0x1b1   : > { %4314 = vmatmul.mubr.msk.bf16.gmra.mxu0 %vm1905_vm10, %v1876_v53  ;;  %v1790_v37 = vsel %vm1770_vm7, %v1757_v62, %v4839_v54  ;;  %v1791_v61 = vsel %vm1770_vm7, %v1758_v35, %v4843_v19  ;;  %v1792_v22 = vsel %vm1770_vm7, %v1759_v38, %v4844_v21  ;;  %v1822_v8 = vsel %vm1803_vm8, %v1789_v46, %v4918_v12  ;;  %v8879_v53 = vld [vmem:[#allocation8_spill] sm:$0xff] }
 0x1b2   : > { %4317 = vmatprep.mubr.msk.bf16.mxu0 %vm1905_vm10, %v1877_v40  ;;  %v1823_v41 = vsel %vm1803_vm8, %v1790_v37, %v4919_v31  ;;  %v1824_v59 = vsel %vm1803_vm8, %v1791_v61, %v4923_v51  ;;  %v1825_v24 = vsel %vm1803_vm8, %v1792_v22, %v4924_v27  ;;  %v1855_v33 = vsel %vm1836_vm9, %v1822_v8, %v4973_v16 }
 0x1b3   : > { %v1856_v36 = vsel %vm1836_vm9, %v1823_v41, %v4974_v52  ;;  %v1760_v44 = vsel %vm1737_vm6, %v7226_v18, %v4768_v9  ;;  %v1761_v43 = vsel %vm1737_vm6, %v7232_v55, %v4769_v2  ;;  %v1857_v50 = vsel %vm1836_vm9, %v1824_v59, %v4983_v47  ;;  %v5012_v39 = vpop.permute.xlu0 %5011 }
 0x1b4   : > { %v1858_v1 = vsel %vm1836_vm9, %v1825_v24, %v4984_v28  ;;  %v4849_v26 = vunpack.i.h.bf16 %v8876_v34  ;;  %v4848_v62 = vunpack.i.l.bf16 %v8876_v34  ;;  %v4854_v30 = vunpack.i.h.bf16 %v8877_v14  ;;  %v8881_v28 = vld [vmem:[#allocation18_spill] sm:$0xff] }
 0x1b5   : > { %v4853_v7 = vunpack.i.l.bf16 %v8877_v14  ;;  %v4979_v29 = vunpack.i.h.bf16 %v7440_v49  ;;  %v4978_v11 = vunpack.i.l.bf16 %v7440_v49  ;;  %v4989_v18 = vunpack.i.h.bf16 %v7473_v0  ;;  %v5007_v49 = vpop.permute.xlu1 %5006 }
 0x1b6   : > { %v1878_v13 = vpack.c.bf16 %v1856_v36, %v1855_v33  ;;  %v4988_v55 = vunpack.i.l.bf16 %v7473_v0  ;;  %v4994_v60 = vunpack.i.h.bf16 %v7465_v25  ;;  %v4993_v32 = vunpack.i.l.bf16 %v7465_v25 }
 0x1b7   : > { %v1879_v42 = vpack.c.bf16 %v1858_v1, %v1857_v50  ;;  %v1762_v35 = vsel %vm1737_vm6, %v7236_v17, %v4773_v58  ;;  %v1763_v38 = vsel %vm1737_vm6, %v7242_v6, %v4774_v5  ;;  %v5004_v3 = vunpack.i.h.bf16 %v5002_v48  ;;  %v5022_v5 = vpop.permute.xlu0 %5021  ;;  %v8883_v50 = vld [vmem:[#allocation21_spill] sm:$0xff] }
 0x1b8   : > { %v5003_v20 = vunpack.i.l.bf16 %v5002_v48  ;;  %v4779_v54 = vunpack.i.h.bf16 %v8878_v63  ;;  %v4778_v0 = vunpack.i.l.bf16 %v8878_v63  ;;  %v1793_v56 = vsel %vm1770_vm7, %v1760_v44, %v4848_v62 }
 0x1b9   : > { %4318 = vmatmul.mubr.msk.bf16.gmra.mxu0 %vm1905_vm10, %v1878_v13  ;;  %v1794_v25 = vsel %vm1770_vm7, %v1761_v43, %v4849_v26  ;;  %v1795_v17 = vsel %vm1770_vm7, %v1762_v35, %v4853_v7  ;;  %v1796_v4 = vsel %vm1770_vm7, %v1763_v38, %v4854_v30  ;;  %v1826_v6 = vsel %vm1803_vm8, %v1793_v56, %v4978_v11  ;;  %v5017_v48 = vpop.permute.xlu1 %5016  ;;  %v8882_v43 = vld [vmem:[#allocation20_spill] sm:$0xff] }
 0x1ba   : > { %4321 = vmatprep.mubr.msk.bf16.mxu0 %vm1905_vm10, %v1879_v42  ;;  %v1827_v21 = vsel %vm1803_vm8, %v1794_v25, %v4979_v29  ;;  %v1859_v19 = vsel %vm1836_vm9, %v1826_v6, %v4988_v55  ;;  %v1828_v12 = vsel %vm1803_vm8, %v1795_v17, %v4993_v32  ;;  %v1829_v27 = vsel %vm1803_vm8, %v1796_v4, %v4994_v60  ;;  %v8885_v42 = vld [vmem:[#allocation35_spill] sm:$0xff]  ;;  %v8887_v38 = vld [vmem:[#allocation12_spill] sm:$0xff] }
 0x1bb   : > { %v1860_v31 = vsel %vm1836_vm9, %v1827_v21, %v4989_v18  ;;  %v4784_v51 = vunpack.i.h.bf16 %v8879_v53  ;;  %v4783_v52 = vunpack.i.l.bf16 %v8879_v53  ;;  %v1861_v16 = vsel %vm1836_vm9, %v1828_v12, %v5003_v20  ;;  %v8884_v18 = vld [vmem:[#allocation7_spill] sm:$0xff] }
 0x1bc   : > { %v1862_v40 = vsel %vm1836_vm9, %v1829_v27, %v5004_v3  ;;  %v4859_v2 = vunpack.i.h.bf16 %v8880_v15  ;;  %v4858_v9 = vunpack.i.l.bf16 %v8880_v15  ;;  %v4864_v47 = vunpack.i.h.bf16 %v8881_v28  ;;  %v8891_v25 = vld [vmem:[#allocation51_spill] sm:$0xff] }
 0x1bd   : > { %v4863_v23 = vunpack.i.l.bf16 %v8881_v28  ;;  %v4999_v58 = vunpack.i.h.bf16 %v7499_v57  ;;  %v4998_v46 = vunpack.i.l.bf16 %v7499_v57  ;;  %v5009_v37 = vunpack.i.h.bf16 %v5007_v49 }
 0x1be   : > { %v1880_v61 = vpack.c.bf16 %v1860_v31, %v1859_v19  ;;  %v5008_v22 = vunpack.i.l.bf16 %v5007_v49  ;;  %v5014_v8 = vunpack.i.h.bf16 %v5012_v39  ;;  %v5013_v41 = vunpack.i.l.bf16 %v5012_v39  ;;  %v5027_v39 = vpop.permute.xlu1 %5026  ;;  %v8889_v49 = vld [vmem:[#allocation9_spill] sm:$0xff] }
 0x1bf   : > { %v1881_v59 = vpack.c.bf16 %v1862_v40, %v1861_v16  ;;  %v1764_v24 = vsel %vm1737_vm6, %v7246_v10, %v4778_v0  ;;  %v1765_v36 = vsel %vm1737_vm6, %v7252_v45, %v4779_v54  ;;  %v5024_v33 = vunpack.i.h.bf16 %v5022_v5  ;;  %v8890_v54 = vld [vmem:[#allocation19_spill] sm:$0xff] }
 0x1c0   : > { %v5023_v44 = vunpack.i.l.bf16 %v5022_v5  ;;  %v1766_v57 = vsel %vm1737_vm6, %v8882_v43, %v4783_v52  ;;  %v1767_v1 = vsel %vm1737_vm6, %v8883_v50, %v4784_v51  ;;  %v1797_v34 = vsel %vm1770_vm7, %v1764_v24, %v4858_v9  ;;  %v2302_v5 = vld [vmem:[#allocation3 + $0x1] sm:$0xff] }
 0x1c1   : > { %4322 = vmatmul.mubr.msk.bf16.gmra.mxu0 %vm1905_vm10, %v1880_v61  ;;  %v1798_v26 = vsel %vm1770_vm7, %v1765_v36, %v4859_v2  ;;  %v1799_v10 = vsel %vm1770_vm7, %v1766_v57, %v4863_v23  ;;  %v1800_v45 = vsel %vm1770_vm7, %v1767_v1, %v4864_v47  ;;  %v1830_v62 = vsel %vm1803_vm8, %v1797_v34, %v4998_v46 }
 0x1c2   : > { %4325 = vmatprep.mubr.msk.bf16.mxu0 %vm1905_vm10, %v1881_v59  ;;  %v1831_v14 = vsel %vm1803_vm8, %v1798_v26, %v4999_v58  ;;  %v1863_v30 = vsel %vm1836_vm9, %v1830_v62, %v5008_v22  ;;  %v1832_v29 = vsel %vm1803_vm8, %v1799_v10, %v5013_v41  ;;  %v1833_v11 = vsel %vm1803_vm8, %v1800_v45, %v5014_v8  ;;  %v2303_v58 = vld [vmem:[#allocation3 + $0x9] sm:$0xff] }
 0x1c3   : > { %v1864_v7 = vsel %vm1836_vm9, %v1831_v14, %v5009_v37  ;;  %v4789_v13 = vunpack.i.h.bf16 %v8884_v18  ;;  %v4788_v55 = vunpack.i.l.bf16 %v8884_v18  ;;  %v1865_v60 = vsel %vm1836_vm9, %v1832_v29, %v5023_v44  ;;  %v2334_v37 = vld [vmem:[#allocation3 + $0x2] sm:$0xff] }
 0x1c4   : > { %v1866_v32 = vsel %vm1836_vm9, %v1833_v11, %v5024_v33  ;;  %v8886_v35 = vunpack.i.l.bf16 %v8885_v42  ;;  %v8888_v20 = vunpack.i.h.bf16 %v8885_v42  ;;  %v4869_v0 = vunpack.i.h.bf16 %v8890_v54 }
 0x1c5   : > { %v4868_v56 = vunpack.i.l.bf16 %v8890_v54  ;;  %v8892_v17 = vunpack.i.l.bf16 %v8891_v25  ;;  %v5019_v6 = vunpack.i.h.bf16 %v5017_v48  ;;  %v5018_v21 = vunpack.i.l.bf16 %v5017_v48  ;;  %v2335_v48 = vld [vmem:[#allocation3 + $0xa] sm:$0xff] }
 0x1c6   : > { %v1702_v3 = vsel %vm1671_vm4, %v8887_v38, %v8886_v35  ;;  %v1703_v63 = vsel %vm1671_vm4, %v8889_v49, %v8888_v20  ;;  %v1882_v19 = vpack.c.bf16 %v1864_v7, %v1863_v30  ;;  %v8893_v31 = vunpack.i.h.bf16 %v8891_v25 }
 0x1c7   : > { %v1735_v4 = vsel %vm1704_vm5, %v1702_v3, %v8892_v17  ;;  %v5029_v27 = vunpack.i.h.bf16 %v5027_v39  ;;  %v5028_v53 = vunpack.i.l.bf16 %v5027_v39  ;;  %v1883_v51 = vpack.c.bf16 %v1866_v32, %v1865_v60 }
 0x1c8   : > { %v1736_v12 = vsel %vm1704_vm5, %v1703_v63, %v8893_v31  ;;  %v1768_v52 = vsel %vm1737_vm6, %v1735_v4, %v4788_v55  ;;  %v5030_v46 = vpack.i.bf16 %v2303_v58, %v2302_v5  ;;  %v5035_v61 = vpack.i.bf16 %v2335_v48, %v2334_v37 }
 0x1c9   : > { %v1769_v16 = vsel %vm1737_vm6, %v1736_v12, %v4789_v13  ;;  %4326 = vmatmul.mubr.msk.bf16.gmra.mxu0 %vm1905_vm10, %v1882_v19  ;;  %v1801_v40 = vsel %vm1770_vm7, %v1768_v52, %v4868_v56 }
 0x1ca   : > { %v1802_v15 = vsel %vm1770_vm7, %v1769_v16, %v4869_v0  ;;  %4329 = vmatprep.mubr.msk.bf16.mxu0 %vm1905_vm10, %v1883_v51  ;;  %v1834_v2 = vsel %vm1803_vm8, %v1801_v40, %v5018_v21  ;;  %5031 = vrot.lane.b32.xlu0 %v5030_v46, %s5687_s19 }
 0x1cb   : > { %v1835_v9 = vsel %vm1803_vm8, %v1802_v15, %v5019_v6  ;;  %v1867_v28 = vsel %vm1836_vm9, %v1834_v2, %v5028_v53 }
 0x1cc   : > { %v1868_v47 = vsel %vm1836_vm9, %v1835_v9, %v5029_v27 }
 0x1cd   : > { %v1884_v23 = vpack.c.bf16 %v1868_v47, %v1867_v28 }
 0x1ce   : > { %5036 = vrot.lane.b32.xlu0 %v5035_v61, %s5688_s20 }
 0x1d1   : > { %4330 = vmatmul.mubr.msk.bf16.gmra.mxu0 %vm1905_vm10, %v1884_v23 }
 0x259   : > { %v4303_v22 = vpop.f32.mrf.mxu0 }
 0x25a   : > { %v2121_v8 = vmax.f32 %v4303_v22, 0.0 }
 0x25b   : > { %v1992_v41 = vpop.f32.mrf.mxu0 }
 0x25c   : > { %2208 = vst.msk [vmem:[#allocation3 + $0x31] sm:$0xff] %vm172_vm0, %v2121_v8  ;;  %v2119_v59 = vmax.f32 %v1992_v41, 0.0 }
 0x25d   : > { %v4304_v24 = vpop.f32.mrf.mxu0 }
 0x25e   : > { %2206 = vst.msk [vmem:[#allocation3 + $0x19] sm:$0xff] %vm172_vm0, %v2119_v59  ;;  %v2122_v36 = vmax.f32 %v4304_v24, 0.0 }
 0x25f   : > { %v1995_v33 = vpop.f32.mrf.mxu0 }
 0x260   : > { %2209 = vst.msk [vmem:[#allocation3 + $0x39] sm:$0xff] %vm172_vm0, %v2122_v36  ;;  %v2120_v44 = vmax.f32 %v1995_v33, 0.0 }
 0x261   : > { %v4307_v43 = vpop.f32.mrf.mxu0 }
 0x262   : > { %2207 = vst.msk [vmem:[#allocation3 + $0x21] sm:$0xff] %vm172_vm0, %v2120_v44  ;;  %v2125_v57 = vmax.f32 %v4307_v43, 0.0 }
 0x263   : > { %v2008_v50 = vpop.f32.mrf.mxu0  ;;  %v7608_v10 = vld [vmem:[#allocation3 + $0x30] sm:$0xff] }
 0x264   : > { %2212 = vst.msk [vmem:[#allocation3 + $0x61] sm:$0xff] %vm172_vm0, %v2125_v57  ;;  %v2123_v1 = vmax.f32 %v2008_v50, 0.0  ;;  %v2306_v14 = vld [vmem:[#allocation3 + $0x31] sm:$0xff] }
 0x265   : > { %v4308_v34 = vpop.f32.mrf.mxu0  ;;  %v2304_v56 = vld [vmem:[#allocation3 + $0x19] sm:$0xff] }
 0x266   : > { %2210 = vst.msk [vmem:[#allocation3 + $0x49] sm:$0xff] %vm172_vm0, %v2123_v1  ;;  %v2126_v26 = vmax.f32 %v4308_v34, 0.0  ;;  %v7636_v15 = vld [vmem:[#allocation3 + $0x18] sm:$0xff] }
 0x267   : > { %v2011_v45 = vpop.f32.mrf.mxu0  ;;  %v7610_v62 = vld [vmem:[#allocation3 + $0x38] sm:$0xff] }
 0x268   : > { %v2307_v30 = vld [vmem:[#allocation3 + $0x39] sm:$0xff]  ;;  %2213 = vst.msk [vmem:[#allocation3 + $0x69] sm:$0xff] %vm172_vm0, %v2126_v26  ;;  %v2124_v7 = vmax.f32 %v2011_v45, 0.0  ;;  %v5050_v29 = vpack.i.bf16 %v7610_v62, %v7608_v10 }
 0x269   : > { %v5040_v11 = vpack.i.bf16 %v2307_v30, %v2306_v14  ;;  %v4311_v18 = vpop.f32.mrf.mxu0  ;;  %v2338_v13 = vld [vmem:[#allocation3 + $0x32] sm:$0xff]  ;;  %v2339_v55 = vld [vmem:[#allocation3 + $0x3a] sm:$0xff]  ;;  %v2337_v21 = vld [vmem:[#allocation3 + $0x22] sm:$0xff] }
 0x26a   : > { %2211 = vst.msk [vmem:[#allocation3 + $0x51] sm:$0xff] %vm172_vm0, %v2124_v7  ;;  %v2129_v60 = vmax.f32 %v4311_v18, 0.0  ;;  %5051 = vrot.lane.b32.xlu1 %v5050_v29, %s5689_s21  ;;  %v5045_v42 = vpack.i.bf16 %v2339_v55, %v2338_v13  ;;  %v2305_v63 = vld [vmem:[#allocation3 + $0x21] sm:$0xff]  ;;  %v5673_v45 = vld [vmem:[%s8652_s2 + $0x10] ss:$0 sps:$4 sm:$0x33]  }
 0x26b   : > { %5041 = vrot.lane.b32.xlu0 %v5040_v11, %s5687_s19  ;;  %v2024_v32 = vpop.f32.mrf.mxu0  ;;  %v5080_v17 = vpack.i.bf16 %v2305_v63, %v2304_v56  ;;  %v2336_v6 = vld [vmem:[#allocation3 + $0x1a] sm:$0xff]  ;;  %4372 = vmatprep.subr.msk.bf16.mxu1 %vm1954_vm2, %v5673_v45 }
 0x26c   : > { %2216 = vst.msk [vmem:[#allocation3 + $0x91] sm:$0xff] %vm172_vm0, %v2129_v60  ;;  %v2127_v39 = vmax.f32 %v2024_v32, 0.0  ;;  %v5085_v27 = vpack.i.bf16 %v2337_v21, %v2336_v6  ;;  %v7631_v51 = vld [vmem:[#allocation3 + $0x20] sm:$0xff]  ;;  %v5674_v13 = vld [vmem:[%s8652_s2 + $0x8] sm:$0xff]  }
 0x26d   : > { %v4312_v35 = vpop.f32.mrf.mxu0  ;;  %v2372_v2 = vld [vmem:[#allocation3 + $0x60] sm:$0xff]  ;;  %v5090_v28 = vpack.i.bf16 %v7631_v51, %v7636_v15  ;;  %v2308_v1 = vld [vmem:[#allocation3 + $0x49] sm:$0xff] }
 0x26e   : > { %2214 = vst.msk [vmem:[#allocation3 + $0x79] sm:$0xff] %vm172_vm0, %v2127_v39  ;;  %v2130_v38 = vmax.f32 %v4312_v35, 0.0  ;;  %5056 = vrot.lane.b32.xlu1 %v5040_v11, %s5690_s22  ;;  %v2404_v37 = vld [vmem:[#allocation3 + $0x61] sm:$0xff] }
 0x26f   : > { %5046 = vrot.lane.b32.xlu0 %v5045_v42, %s5688_s20  ;;  %v2027_v3 = vpop.f32.mrf.mxu0  ;;  %v2373_v52 = vld [vmem:[#allocation3 + $0x68] sm:$0xff] }
 0x270   : > { %2217 = vst.msk [vmem:[#allocation3 + $0x99] sm:$0xff] %vm172_vm0, %v2130_v38  ;;  %v2128_v20 = vmax.f32 %v2027_v3, 0.0  ;;  %v7641_v47 = vpack.i.bf16 %v2373_v52, %v2372_v2  ;;  %v2405_v5 = vld [vmem:[#allocation3 + $0x69] sm:$0xff] }
 0x271   : > { %v4315_v49 = vpop.f32.mrf.mxu0  ;;  %v7648_v61 = vpack.i.bf16 %v2405_v5, %v2404_v37  ;;  %v2436_v8 = vld [vmem:[#allocation3 + $0x62] sm:$0xff]  ;;  %v2437_v41 = vld [vmem:[#allocation3 + $0x6a] sm:$0xff]  ;;  %v2341_v7 = vld [vmem:[#allocation3 + $0x52] sm:$0xff] }
 0x272   : > { %2215 = vst.msk [vmem:[#allocation3 + $0x81] sm:$0xff] %vm172_vm0, %v2128_v20  ;;  %v2133_v54 = vmax.f32 %v4315_v49, 0.0  ;;  %5061 = vrot.lane.b32.xlu1 %v5045_v42, %s5691_s23  ;;  %v5125_v33 = vpack.i.bf16 %v2437_v41, %v2436_v8  ;;  %v2309_v43 = vld [vmem:[#allocation3 + $0x51] sm:$0xff]  ;;  %v7677_v38 = vld [vmem:[#allocation3 + $0x48] sm:$0xff] }
 0x273   : > { %5066 = vrot.lane.b32.xlu0 %v5050_v29, %s5692_s24  ;;  %v2040_v0 = vpop.f32.mrf.mxu0  ;;  %v5145_v26 = vpack.i.bf16 %v2309_v43, %v2308_v1  ;;  %v2340_v30 = vld [vmem:[#allocation3 + $0x4a] sm:$0xff] }
 0x274   : > { %2220 = vst.msk [vmem:[#allocation3 + $0xc1] sm:$0xff] %vm172_vm0, %v2133_v54  ;;  %v2131_v25 = vmax.f32 %v2040_v0, 0.0  ;;  %v5150_v60 = vpack.i.bf16 %v2341_v7, %v2340_v30  ;;  %v7672_v39 = vld [vmem:[#allocation3 + $0x50] sm:$0xff] }
 0x275   : > { %v4316_v4 = vpop.f32.mrf.mxu0  ;;  %v5160_v20 = vpack.i.bf16 %v7672_v39, %v7677_v38  ;;  %v5675_v49 = vld [vmem:[%s8652_s2] sm:$0xff]  }
 0x276   : > { %2218 = vst.msk [vmem:[#allocation3 + $0xa9] sm:$0xff] %vm172_vm0, %v2131_v25  ;;  %v2134_v19 = vmax.f32 %v4316_v4, 0.0  ;;  %5081 = vrot.lane.b32.xlu1 %v5080_v17, %s5687_s19 }
 0x277   : > { %5071 = vrot.lane.b32.xlu0 %v5040_v11, %s5693_s25  ;;  %v2043_v31 = vpop.f32.mrf.mxu0  ;;  %v3924_v11 = vsel %vm1954_vm2, %v5673_v45, 0  ;;  %v7695_v21 = vld [vmem:[#allocation3 + $0x98] sm:$0xff] }
 0x278   : > { %2221 = vst.msk [vmem:[#allocation3 + $0xc9] sm:$0xff] %vm172_vm0, %v2134_v19  ;;  %v2132_v12 = vmax.f32 %v2043_v31, 0.0  ;;  %4334 = vmatpush3.bf16.msra.mxu1 %v3924_v11  ;;  %v7700_v19 = vld [vmem:[#allocation3 + $0x90] sm:$0xff] }
 0x279   : > { %v4319_v53 = vpop.f32.mrf.mxu0  ;;  %4335 = vmatprep.subr.bf16.mxu1 %v5674_v13  ;;  %v5195_v31 = vpack.i.bf16 %v7695_v21, %v7700_v19  ;;  %v2440_v52 = vld [vmem:[#allocation3 + $0x92] sm:$0xff]  ;;  %v2313_v2 = vld [vmem:[#allocation3 + $0x81] sm:$0xff] }
 0x27a   : > { %2219 = vst.msk [vmem:[#allocation3 + $0xb1] sm:$0xff] %vm172_vm0, %v2132_v12  ;;  %v2137_v16 = vmax.f32 %v4319_v53, 0.0  ;;  %5086 = vrot.lane.b32.xlu1 %v5085_v27, %s5688_s20  ;;  %v2409_v12 = vld [vmem:[#allocation3 + $0x99] sm:$0xff] }
 0x27b   : > { %5076 = vrot.lane.b32.xlu0 %v5045_v42, %s5694_s5  ;;  %v2056_v40 = vpop.f32.mrf.mxu0 }
 0x27c   : > { %2224 = vst.msk [vmem:[#allocation3 + $0xf1] sm:$0xff] %vm172_vm0, %v2137_v16  ;;  %v2135_v9 = vmax.f32 %v2056_v40, 0.0  ;;  %4336 = vmatpush3.bf16.msra.mxu1 %v5674_v13  ;;  %v2441_v16 = vld [vmem:[#allocation3 + $0x9a] sm:$0xff] }
 0x27d   : > { %v4320_v23 = vpop.f32.mrf.mxu0  ;;  %4337 = vmatprep.subr.bf16.mxu1 %v5675_v49  ;;  %v7711_v40 = vpack.i.bf16 %v2441_v16, %v2440_v52  ;;  %v7763_v45 = vld [vmem:[#allocation3 + $0xa8] sm:$0xff] }
 0x27e   : > { %2222 = vst.msk [vmem:[#allocation3 + $0xd9] sm:$0xff] %vm172_vm0, %v2135_v9  ;;  %v2138_v58 = vmax.f32 %v4320_v23, 0.0  ;;  %5116 = vrot.lane.b32.xlu1 %v7641_v47, %s5689_s21  ;;  %v2312_v9 = vld [vmem:[#allocation3 + $0x79] sm:$0xff]  ;;  %v2345_v23 = vld [vmem:[#allocation3 + $0x82] sm:$0xff]  ;;  %8897 = vst [vmem:[#allocation25_spill] sm:$0xff] %v7763_v45 }
 0x27f   : > { %5091 = vrot.lane.b32.xlu0 %v5090_v28, %s5689_s21  ;;  %v2059_v46 = vpop.f32.mrf.mxu0  ;;  %v5215_v28 = vpack.i.bf16 %v2313_v2, %v2312_v9  ;;  %v2319_v8 = vld [vmem:[#allocation3 + $0xc9] sm:$0xff] }
 0x280   : > { %2225 = vst.msk [vmem:[#allocation3 + $0xf9] sm:$0xff] %vm172_vm0, %v2138_v58  ;;  %v2136_v48 = vmax.f32 %v2059_v46, 0.0  ;;  %4338 = vmatpush3.bf16.msra.mxu1 %v5675_v49  ;;  %v7719_v58 = vld [vmem:[#allocation3 + $0x80] sm:$0xff]  ;;  %v7724_v46 = vld [vmem:[#allocation3 + $0x78] sm:$0xff]  ;;  %v2351_v43 = vld [vmem:[#allocation3 + $0xca] sm:$0xff] }
 0x281   : > { %v4323_v22 = vpop.f32.mrf.mxu0  ;;  %v5230_v37 = vpack.i.bf16 %v7719_v58, %v7724_v46  ;;  %v2317_v41 = vld [vmem:[#allocation3 + $0xb1] sm:$0xff] }
 0x282   : > { %2223 = vst.msk [vmem:[#allocation3 + $0xe1] sm:$0xff] %vm172_vm0, %v2136_v48  ;;  %v2141_v59 = vmax.f32 %v4323_v22, 0.0  ;;  %5121 = vrot.lane.b32.xlu1 %v7648_v61, %s5690_s22  ;;  %v7732_v48 = vld [vmem:[#allocation3 + $0xc8] sm:$0xff] }
 0x283   : > { %5096 = vrot.lane.b32.xlu0 %v5080_v17, %s5690_s22  ;;  %v2072_v24 = vpop.f32.mrf.mxu0  ;;  %8894 = vst [vmem:[#allocation22_spill] sm:$0xff] %v7732_v48  ;;  %v2322_v11 = vld [vmem:[#allocation3 + $0xf1] sm:$0xff] }
 0x284   : > { %2228 = vst.msk [vmem:[#allocation3 + $0x121] sm:$0xff] %vm172_vm0, %v2141_v59  ;;  %v2139_v36 = vmax.f32 %v2072_v24, 0.0  ;;  %v2318_v59 = vld [vmem:[#allocation3 + $0xc1] sm:$0xff]  ;;  %v2316_v24 = vld [vmem:[#allocation3 + $0xa9] sm:$0xff] }
 0x285   : > { %v4324_v44 = vpop.f32.mrf.mxu0 }
 0x286   : > { %2226 = vst.msk [vmem:[#allocation3 + $0x109] sm:$0xff] %vm172_vm0, %v2139_v36  ;;  %v2142_v57 = vmax.f32 %v4324_v44, 0.0  ;;  %5126 = vrot.lane.b32.xlu1 %v5125_v33, %s5691_s23  ;;  %v7745_v36 = vpack.i.bf16 %v2319_v8, %v2318_v59  ;;  %v2350_v44 = vld [vmem:[#allocation3 + $0xc2] sm:$0xff] }
 0x287   : > { %5101 = vrot.lane.b32.xlu0 %v5085_v27, %s5691_s23  ;;  %v2075_v50 = vpop.f32.mrf.mxu0  ;;  %v2408_v27 = vld [vmem:[#allocation3 + $0x91] sm:$0xff]  ;;  %v7753_v1 = vpack.i.bf16 %v2351_v43, %v2350_v44  ;;  %v2323_v7 = vld [vmem:[#allocation3 + $0xf9] sm:$0xff] }
 0x288   : > { %2229 = vst.msk [vmem:[#allocation3 + $0x129] sm:$0xff] %vm172_vm0, %v2142_v57  ;;  %v2140_v34 = vmax.f32 %v2075_v50, 0.0  ;;  %v7706_v53 = vpack.i.bf16 %v2409_v12, %v2408_v27  ;;  %v2348_v57 = vld [vmem:[#allocation3 + $0xaa] sm:$0xff]  ;;  %v2349_v50 = vld [vmem:[#allocation3 + $0xb2] sm:$0xff]  ;;  %v7771_v13 = vpack.i.bf16 %v2323_v7, %v2322_v11 }
 0x289   : > { %v4327_v14 = vpop.f32.mrf.mxu0  ;;  %v2385_v30 = vld [vmem:[#allocation3 + $0xf8] sm:$0xff]  ;;  %v2383_v49 = vld [vmem:[#allocation3 + $0xe0] sm:$0xff] }
 0x28a   : > { %2227 = vst.msk [vmem:[#allocation3 + $0x111] sm:$0xff] %vm172_vm0, %v2140_v34  ;;  %v2145_v29 = vmax.f32 %v4327_v14, 0.0  ;;  %5146 = vrot.lane.b32.xlu1 %v5145_v26, %s5687_s19  ;;  %v7755_v34 = vpack.i.bf16 %v2349_v50, %v2348_v57 }
 0x28b   : > { %5106 = vrot.lane.b32.xlu0 %v7648_v61, %s5687_s19  ;;  %v2088_v18 = vpop.f32.mrf.mxu0  ;;  %v2326_v12 = vld [vmem:[#allocation3 + $0x121] sm:$0xff] }
 0x28c   : > { %2232 = vst.msk [vmem:[#allocation3 + $0x151] sm:$0xff] %vm172_vm0, %v2145_v29  ;;  %v2143_v55 = vmax.f32 %v2088_v18, 0.0  ;;  %v2384_v29 = vld [vmem:[#allocation3 + $0xf0] sm:$0xff] }
 0x28d   : > { %v4328_v32 = vpop.f32.mrf.mxu0  ;;  %v7769_v18 = vpack.i.bf16 %v2385_v30, %v2384_v29 }
 0x28e   : > { %2230 = vst.msk [vmem:[#allocation3 + $0x139] sm:$0xff] %vm172_vm0, %v2143_v55  ;;  %v2146_v42 = vmax.f32 %v4328_v32, 0.0  ;;  %5151 = vrot.lane.b32.xlu1 %v5150_v60, %s5688_s20  ;;  %v2354_v55 = vld [vmem:[#allocation3 + $0xf2] sm:$0xff]  ;;  %v2321_v32 = vld [vmem:[#allocation3 + $0xe1] sm:$0xff] }
 0x28f   : > { %5111 = vrot.lane.b32.xlu0 %v5125_v33, %s5688_s20  ;;  %v2091_v35 = vpop.f32.mrf.mxu0  ;;  %v2358_v16 = vld [vmem:[#allocation3 + $0x122] sm:$0xff]  ;;  %v2359_v2 = vld [vmem:[#allocation3 + $0x12a] sm:$0xff] }
 0x290   : > { %2233 = vst.msk [vmem:[#allocation3 + $0x159] sm:$0xff] %vm172_vm0, %v2146_v42  ;;  %v2144_v3 = vmax.f32 %v2091_v35, 0.0  ;;  %v2320_v42 = vld [vmem:[#allocation3 + $0xd9] sm:$0xff] }
 0x291   : > { %v4331_v63 = vpop.f32.mrf.mxu0  ;;  %v2325_v9 = vld [vmem:[#allocation3 + $0x111] sm:$0xff] }
 0x292   : > { %2231 = vst.msk [vmem:[#allocation3 + $0x141] sm:$0xff] %vm172_vm0, %v2144_v3  ;;  %v2149_v54 = vmax.f32 %v4331_v63, 0.0  ;;  %5161 = vrot.lane.b32.xlu1 %v5160_v20, %s5692_s24  ;;  %v7779_v3 = vpack.i.bf16 %v2321_v32, %v2320_v42  ;;  %v2352_v63 = vld [vmem:[#allocation3 + $0xda] sm:$0xff]  ;;  %v2387_v8 = vld [vmem:[#allocation3 + $0x110] sm:$0xff] }
 0x293   : > { %5131 = vrot.lane.b32.xlu0 %v7641_v47, %s5692_s24  ;;  %v2104_v0 = vpop.f32.mrf.mxu0  ;;  %v2344_v47 = vld [vmem:[#allocation3 + $0x7a] sm:$0xff]  ;;  %v2357_v59 = vld [vmem:[#allocation3 + $0x112] sm:$0xff] }
 0x294   : > { %2236 = vst.msk [vmem:[#allocation3 + $0x181] sm:$0xff] %vm172_vm0, %v2149_v54  ;;  %v2147_v56 = vmax.f32 %v2104_v0, 0.0  ;;  %v5220_v5 = vpack.i.bf16 %v2345_v23, %v2344_v47  ;;  %v2353_v54 = vld [vmem:[#allocation3 + $0xe2] sm:$0xff]  ;;  %v2382_v0 = vld [vmem:[#allocation3 + $0xd8] sm:$0xff]  ;;  %v2392_v7 = vld [vmem:[#allocation3 + $0x150] sm:$0xff] }
 0x295   : > { %v4332_v25 = vpop.f32.mrf.mxu0  ;;  %v2330_v29 = vld [vmem:[#allocation3 + $0x151] sm:$0xff] }
 0x296   : > { %2234 = vst.msk [vmem:[#allocation3 + $0x169] sm:$0xff] %vm172_vm0, %v2147_v56  ;;  %v2150_v17 = vmax.f32 %v4332_v25, 0.0  ;;  %5166 = vrot.lane.b32.xlu1 %v5145_v26, %s5693_s25  ;;  %v7787_v56 = vpack.i.bf16 %v2383_v49, %v2382_v0  ;;  %v7789_v25 = vpack.i.bf16 %v2353_v54, %v2352_v63  ;;  %v2328_v54 = vld [vmem:[#allocation3 + $0x139] sm:$0xff] }
 0x297   : > { %5136 = vrot.lane.b32.xlu0 %v7648_v61, %s5693_s25  ;;  %v2107_v4 = vpop.f32.mrf.mxu0  ;;  %v7736_v61 = vld [vmem:[#allocation3 + $0xc0] sm:$0xff]  ;;  %v2362_v42 = vld [vmem:[#allocation3 + $0x152] sm:$0xff] }
 0x298   : > { %2237 = vst.msk [vmem:[#allocation3 + $0x189] sm:$0xff] %vm172_vm0, %v2150_v17  ;;  %v2148_v6 = vmax.f32 %v2107_v4, 0.0  ;;  %8895 = vst [vmem:[#allocation23_spill] sm:$0xff] %v7736_v61  ;;  %v7740_v22 = vpack.i.bf16 %v7732_v48, %v7736_v61  ;;  %v2389_v17 = vld [vmem:[#allocation3 + $0x128] sm:$0xff]  ;;  %v2331_v30 = vld [vmem:[#allocation3 + $0x159] sm:$0xff] }
 0x299   : > { %v2327_v4 = vld [vmem:[#allocation3 + $0x129] sm:$0xff]  ;;  %v7835_v32 = vpack.i.bf16 %v2331_v30, %v2330_v29  ;;  %v2363_v49 = vld [vmem:[#allocation3 + $0x15a] sm:$0xff] }
 0x29a   : > { %2235 = vst.msk [vmem:[#allocation3 + $0x171] sm:$0xff] %vm172_vm0, %v2148_v6  ;;  %5171 = vrot.lane.b32.xlu1 %v5150_v60, %s5694_s5  ;;  %v7799_v52 = vpack.i.bf16 %v2327_v4, %v2326_v12  ;;  %v2329_v63 = vld [vmem:[#allocation3 + $0x141] sm:$0xff]  ;;  %v7845_v4 = vpack.i.bf16 %v2363_v49, %v2362_v42 }
 0x29b   : > { %5141 = vrot.lane.b32.xlu0 %v5125_v33, %s5694_s5  ;;  %v7747_v33 = vpack.i.bf16 %v2317_v41, %v2316_v24  ;;  %v2356_v41 = vld [vmem:[#allocation3 + $0x10a] sm:$0xff]  ;;  %8899 = vst [vmem:[#allocation27_spill] sm:$0xff] %v7835_v32  ;;  %v2391_v12 = vld [vmem:[#allocation3 + $0x140] sm:$0xff] }
 0x29c   : > { %v2386_v24 = vld [vmem:[#allocation3 + $0x108] sm:$0xff]  ;;  %v7823_v50 = vpack.i.bf16 %v2357_v59, %v2356_v41  ;;  %8900 = vst [vmem:[#allocation28_spill] sm:$0xff] %v7845_v4  ;;  %v2270_v49 = vld [vmem:[#allocation3] sm:$0xff] }
 0x29d   : > { %v7821_v57 = vpack.i.bf16 %v2387_v8, %v2386_v24 }
 0x29e   : > { %5196 = vrot.lane.b32.xlu1 %v5195_v31, %s5689_s21 }
 0x29f   : > { %5156 = vrot.lane.b32.xlu0 %v5160_v20, %s5689_s21  ;;  %v7781_v20 = vpop.permute.xlu0 %5031  ;;  %v2397_v29 = vld [vmem:[#allocation3 + $0x188] sm:$0xff] }
 0x2a0   : > { %v5034_v30 = vunpack.i.h.bf16 %v7781_v20 }
 0x2a1   : > { %v2395_v42 = vld [vmem:[#allocation3 + $0x170] sm:$0xff] }
 0x2a2   : > { %5201 = vrot.lane.b32.xlu1 %v7706_v53, %s5690_s22 }
 0x2a3   : > { %5176 = vrot.lane.b32.xlu0 %v5145_v26, %s5690_s22  ;;  %v7757_v26 = vld [vmem:[#allocation3 + $0xb0] sm:$0xff]  ;;  %v7795_v6 = vpop.permute.xlu0 %5036 }
 0x2a4   : > { %8896 = vst [vmem:[#allocation24_spill] sm:$0xff] %v7757_v26  ;;  %v5280_v14 = vpack.i.bf16 %v7757_v26, %v7763_v45  ;;  %v2333_v26 = vld [vmem:[#allocation3 + $0x171] sm:$0xff] }
 0x2a6   : > { %5206 = vrot.lane.b32.xlu1 %v7711_v40, %s5691_s23 }
 0x2a7   : > { %5181 = vrot.lane.b32.xlu0 %v5150_v60, %s5691_s23  ;;  %v2355_v60 = vld [vmem:[#allocation3 + $0xfa] sm:$0xff] }
 0x2a8   : > { %v7777_v35 = vpack.i.bf16 %v2355_v60, %v2354_v55 }
 0x2aa   : > { %5216 = vrot.lane.b32.xlu1 %v5215_v28, %s5687_s19 }
 0x2ab   : > { %5186 = vrot.lane.b32.xlu0 %v7706_v53, %s5687_s19 }
 0x2ae   : > { %5221 = vrot.lane.b32.xlu1 %v5220_v5, %s5688_s20 }
 0x2af   : > { %5191 = vrot.lane.b32.xlu0 %v7711_v40, %s5688_s20 }
 0x2b2   : > { %5231 = vrot.lane.b32.xlu1 %v5230_v37, %s5692_s24 }
 0x2b3   : > { %5211 = vrot.lane.b32.xlu0 %v5195_v31, %s5692_s24  ;;  %v2388_v31 = vld [vmem:[#allocation3 + $0x120] sm:$0xff] }
 0x2b4   : > { %v7797_v27 = vpack.i.bf16 %v2389_v17, %v2388_v31  ;;  %v7847_v31 = vpack.i.bf16 %v2329_v63, %v2328_v54  ;;  %v2271_v63 = vld [vmem:[#allocation3 + $0x8] sm:$0xff]  ;;  %v2396_v54 = vld [vmem:[#allocation3 + $0x180] sm:$0xff] }
 0x2b6   : > { %5236 = vrot.lane.b32.xlu1 %v5215_v28, %s5693_s25  ;;  %8901 = vst [vmem:[#allocation29_spill] sm:$0xff] %v7847_v31 }
 0x2b7   : > { %5226 = vrot.lane.b32.xlu0 %v5230_v37, %s5689_s21 }
 0x2ba   : > { %5241 = vrot.lane.b32.xlu1 %v5220_v5, %s5694_s5 }
 0x2bb   : > { %5246 = vrot.lane.b32.xlu0 %v5215_v28, %s5690_s22  ;;  %v2324_v28 = vld [vmem:[#allocation3 + $0x109] sm:$0xff] }
 0x2bc   : > { %v7811_v37 = vpack.i.bf16 %v2325_v9, %v2324_v28  ;;  %v2390_v9 = vld [vmem:[#allocation3 + $0x138] sm:$0xff] }
 0x2bd   : > { %v7857_v41 = vpack.i.bf16 %v2391_v12, %v2390_v9  ;;  %v2394_v12 = vld [vmem:[#allocation3 + $0x168] sm:$0xff] }
 0x2be   : > { %5266 = vrot.lane.b32.xlu1 %v7740_v22, %s5689_s21 }
 0x2bf   : > { %5251 = vrot.lane.b32.xlu0 %v5220_v5, %s5691_s23  ;;  %v7809_v5 = vpack.i.bf16 %v2359_v2, %v2358_v16  ;;  %v2360_v16 = vld [vmem:[#allocation3 + $0x13a] sm:$0xff]  ;;  %v2361_v2 = vld [vmem:[#allocation3 + $0x142] sm:$0xff] }
 0x2c0   : > { %v7859_v59 = vpack.i.bf16 %v2361_v2, %v2360_v16  ;;  %v5039_v16 = vunpack.i.h.bf16 %v7795_v6  ;;  %v5038_v2 = vunpack.i.l.bf16 %v7795_v6  ;;  %v2332_v6 = vld [vmem:[#allocation3 + $0x169] sm:$0xff] }
 0x2c2   : > { %5271 = vrot.lane.b32.xlu1 %v7747_v33, %s5687_s19  ;;  %8902 = vst [vmem:[#allocation30_spill] sm:$0xff] %v7859_v59 }
 0x2c3   : > { %5256 = vrot.lane.b32.xlu0 %v7745_v36, %s5687_s19 }
 0x2c6   : > { %5276 = vrot.lane.b32.xlu1 %v7755_v34, %s5688_s20 }
 0x2c7   : > { %5261 = vrot.lane.b32.xlu0 %v7753_v1, %s5688_s20 }
 0x2ca   : > { %5286 = vrot.lane.b32.xlu1 %v5280_v14, %s5692_s24 }
 0x2cb   : > { %5281 = vrot.lane.b32.xlu0 %v5280_v14, %s5689_s21  ;;  %v2393_v14 = vld [vmem:[#allocation3 + $0x158] sm:$0xff] }
 0x2cc   : > { %v7833_v60 = vpack.i.bf16 %v2393_v14, %v2392_v7  ;;  %v5033_v7 = vunpack.i.l.bf16 %v7781_v20  ;;  %v7877_v20 = vpack.i.bf16 %v2397_v29, %v2396_v54 }
 0x2ce   : > { %5301 = vrot.lane.b32.xlu1 %v7769_v18, %s5689_s21  ;;  %8898 = vst [vmem:[#allocation26_spill] sm:$0xff] %v7833_v60  ;;  %8903 = vst [vmem:[#allocation31_spill] sm:$0xff] %v7877_v20 }
 0x2cf   : > { %5291 = vrot.lane.b32.xlu0 %v7771_v13, %s5687_s19 }
 0x2d2   : > { %5306 = vrot.lane.b32.xlu1 %v7779_v3, %s5687_s19 }
 0x2d3   : > { %5296 = vrot.lane.b32.xlu0 %v7777_v35, %s5688_s20 }
 0x2d6   : > { %5311 = vrot.lane.b32.xlu1 %v7789_v25, %s5688_s20 }
 0x2d7   : > { %5316 = vrot.lane.b32.xlu0 %v7787_v56, %s5689_s21 }
 0x2da   : > { %5331 = vrot.lane.b32.xlu1 %v7797_v27, %s5689_s21 }
 0x2db   : > { %5321 = vrot.lane.b32.xlu0 %v7799_v52, %s5687_s19 }
 0x2dc   : > { %v7805_v47 = vpop.permute.xlu1 %5051 }
 0x2dd   : > { %v7807_v23 = vpop.permute.xlu0 %5041 }
 0x2de   : > { %5336 = vrot.lane.b32.xlu1 %v7811_v37, %s5687_s19 }
 0x2df   : > { %5326 = vrot.lane.b32.xlu0 %v7809_v5, %s5688_s20 }
 0x2e0   : > { %v7817_v44 = vpop.permute.xlu1 %5056 }
 0x2e1   : > { %v7819_v43 = vpop.permute.xlu0 %5046 }
 0x2e2   : > { %5341 = vrot.lane.b32.xlu1 %v7823_v50, %s5688_s20 }
 0x2e3   : > { %5346 = vrot.lane.b32.xlu0 %v7821_v57, %s5689_s21 }
 0x2e4   : > { %v7829_v11 = vpop.permute.xlu1 %5061 }
 0x2e5   : > { %v7831_v55 = vpop.permute.xlu0 %5066 }
 0x2e6   : > { %5361 = vrot.lane.b32.xlu1 %v7833_v60, %s5689_s21  ;;  %v3584_v60 = vsel %vm172_vm0, %v2271_v63, %v5034_v30  ;;  %v5068_v61 = vunpack.i.l.bf16 %v7831_v55 }
 0x2e7   : > { %5351 = vrot.lane.b32.xlu0 %v7835_v32, %s5687_s19  ;;  %v7879_v32 = vpack.i.bf16 %v2395_v42, %v2394_v12  ;;  %v3616_v42 = vsel %vm1638_vm3, %v3584_v60, %v5039_v16 }
 0x2e8   : > { %v7843_v17 = vpop.permute.xlu1 %5081 }
 0x2e9   : > { %v7841_v0 = vpop.permute.xlu0 %5071  ;;  %8904 = vst [vmem:[#allocation32_spill] sm:$0xff] %v7879_v32 }
 0x2ea   : > { %5366 = vrot.lane.b32.xlu1 %v7847_v31, %s5687_s19  ;;  %v5074_v16 = vunpack.i.h.bf16 %v7841_v0 }
 0x2eb   : > { %5356 = vrot.lane.b32.xlu0 %v7845_v4, %s5688_s20 }
 0x2ec   : > { %v7855_v8 = vpop.permute.xlu1 %5086 }
 0x2ed   : > { %v7853_v28 = vpop.permute.xlu0 %5076 }
 0x2ee   : > { %5371 = vrot.lane.b32.xlu1 %v7859_v59, %s5688_s20 }
 0x2ef   : > { %5376 = vrot.lane.b32.xlu0 %v7857_v41, %s5689_s21 }
 0x2f0   : > { %v7865_v14 = vpop.permute.xlu1 %5116 }
 0x2f1   : > { %v5092_v24 = vpop.permute.xlu0 %5091 }
 0x2f2   : > { %5386 = vrot.lane.b32.xlu1 %v7747_v33, %s5693_s25  ;;  %v5094_v59 = vunpack.i.h.bf16 %v5092_v24  ;;  %v5093_v31 = vunpack.i.l.bf16 %v5092_v24  ;;  %v2364_v24 = vld [vmem:[#allocation3 + $0x16a] sm:$0xff] }
 0x2f3   : > { %5381 = vrot.lane.b32.xlu0 %v7706_v53, %s5693_s25  ;;  %v3583_v53 = vsel %vm172_vm0, %v2270_v49, %v5033_v7  ;;  %v7891_v7 = vpack.i.bf16 %v2333_v26, %v2332_v6  ;;  %v2365_v49 = vld [vmem:[#allocation3 + $0x172] sm:$0xff]  ;;  %v5084_v6 = vunpack.i.h.bf16 %v7843_v17 }
 0x2f4   : > { %v7875_v4 = vpop.permute.xlu1 %5121  ;;  %v3615_v29 = vsel %vm1638_vm3, %v3583_v53, %v5038_v2  ;;  %v3648_v63 = vsel %vm1671_vm4, %v3616_v42, %v5094_v59  ;;  %v7905_v59 = vpack.i.bf16 %v2365_v49, %v2364_v24  ;;  %v5078_v42 = vunpack.i.l.bf16 %v7853_v28 }
 0x2f5   : > { %v5097_v9 = vpop.permute.xlu0 %5096  ;;  %v3647_v12 = vsel %vm1671_vm4, %v3615_v29, %v5093_v31  ;;  %v5079_v29 = vunpack.i.h.bf16 %v7853_v28 }
 0x2f6   : > { %v5099_v45 = vunpack.i.h.bf16 %v5097_v9  ;;  %v5098_v48 = vunpack.i.l.bf16 %v5097_v9  ;;  %5391 = vrot.lane.b32.xlu1 %v7877_v20, %s5689_s21 }
 0x2f7   : > { %5406 = vrot.lane.b32.xlu0 %v7879_v32, %s5689_s21  ;;  %v5069_v32 = vunpack.i.h.bf16 %v7831_v55  ;;  %v5073_v55 = vunpack.i.l.bf16 %v7841_v0 }
 0x2f8   : > { %v7889_v30 = vpop.permute.xlu1 %5126  ;;  %v3679_v2 = vsel %vm1704_vm5, %v3647_v12, %v5098_v48  ;;  %v3680_v60 = vsel %vm1704_vm5, %v3648_v63, %v5099_v45  ;;  %v3586_v63 = vsel %vm172_vm0, %v7631_v51, %v5084_v6 }
 0x2f9   : > { %v5102_v54 = vpop.permute.xlu0 %5101 }
 0x2fa   : > { %v5104_v9 = vunpack.i.h.bf16 %v5102_v54  ;;  %v5103_v20 = vunpack.i.l.bf16 %v5102_v54  ;;  %5396 = vrot.lane.b32.xlu1 %v7891_v7, %s5687_s19  ;;  %v5088_v54 = vunpack.i.l.bf16 %v7855_v8 }
 0x2fb   : > { %5411 = vrot.lane.b32.xlu0 %v7711_v40, %s5694_s5 }
 0x2fc   : > { %v3711_v26 = vsel %vm1737_vm6, %v3679_v2, %v5103_v20  ;;  %v3712_v31 = vsel %vm1737_vm6, %v3680_v60, %v5104_v9  ;;  %v7911_v48 = vpop.permute.xlu1 %5146  ;;  %v5083_v20 = vunpack.i.l.bf16 %v7843_v17  ;;  %v5054_v2 = vunpack.i.h.bf16 %v7805_v47 }
 0x2fd   : > { %v7909_v53 = vpop.permute.xlu0 %5106  ;;  %v3743_v45 = vsel %vm1770_vm7, %v3711_v26, %v5068_v61  ;;  %v3744_v40 = vsel %vm1770_vm7, %v3712_v31, %v5069_v32  ;;  %v5089_v32 = vunpack.i.h.bf16 %v7855_v8  ;;  %v5053_v60 = vunpack.i.l.bf16 %v7805_v47 }
 0x2fe   : > { %5401 = vrot.lane.b32.xlu1 %v7905_v59, %s5688_s20  ;;  %v3775_v0 = vsel %vm1803_vm8, %v3743_v45, %v5073_v55  ;;  %v3776_v61 = vsel %vm1803_vm8, %v3744_v40, %v5074_v16  ;;  %v5058_v16 = vunpack.i.l.bf16 %v7817_v44 }
 0x2ff   : > { %5421 = vrot.lane.b32.xlu0 %v7747_v33, %s5690_s22  ;;  %v3807_v28 = vsel %vm1836_vm9, %v3775_v0, %v5078_v42  ;;  %v3808_v49 = vsel %vm1836_vm9, %v3776_v61, %v5079_v29  ;;  %v3585_v33 = vsel %vm172_vm0, %v7636_v15, %v5083_v20  ;;  %v3618_v9 = vsel %vm1638_vm3, %v3586_v63, %v5089_v32 }
 0x300   : > { %v7929_v17 = vpop.permute.xlu1 %5151  ;;  %v3839_v12 = vpack.c.bf16 %v3808_v49, %v3807_v28  ;;  %v3617_v8 = vsel %vm1638_vm3, %v3585_v33, %v5088_v54  ;;  %v3650_v31 = vsel %vm1671_vm4, %v3618_v9, %v5054_v2  ;;  %v5064_v29 = vunpack.i.h.bf16 %v7829_v11 }
 0x301   : > { %v7927_v24 = vpop.permute.xlu0 %5111  ;;  %v3649_v26 = vsel %vm1671_vm4, %v3617_v8, %v5053_v60 }
 0x302   : > { %5416 = vrot.lane.b32.xlu1 %v7755_v34, %s5694_s5  ;;  %4339 = vmatprep.mubr.msk.bf16.mxu1 %vm1905_vm10, %v3839_v12  ;;  %v3681_v45 = vsel %vm1704_vm5, %v3649_v26, %v5058_v16  ;;  %v5048_v26 = vunpack.i.l.bf16 %v7819_v43 }
 0x303   : > { %5431 = vrot.lane.b32.xlu0 %v7755_v34, %s5691_s23  ;;  %v5059_v34 = vunpack.i.h.bf16 %v7817_v44 }
 0x304   : > { %v5162_v51 = vpop.permute.xlu1 %5161 }
 0x305   : > { %v7946_v15 = vpop.permute.xlu0 %5131  ;;  %v3682_v40 = vsel %vm1704_vm5, %v3650_v31, %v5059_v34  ;;  %v5164_v6 = vunpack.i.h.bf16 %v5162_v51  ;;  %v5163_v20 = vunpack.i.l.bf16 %v5162_v51  ;;  %v5043_v51 = vunpack.i.l.bf16 %v7807_v23 }
 0x306   : > { %5426 = vrot.lane.b32.xlu1 %v7745_v36, %s5690_s22  ;;  %v3714_v61 = vsel %vm1737_vm6, %v3682_v40, %v5064_v29  ;;  %v5149_v31 = vunpack.i.h.bf16 %v7911_v48  ;;  %v5148_v34 = vunpack.i.l.bf16 %v7911_v48  ;;  %v5119_v29 = vunpack.i.h.bf16 %v7865_v14 }
 0x307   : > { %5441 = vrot.lane.b32.xlu0 %v7740_v22, %s5692_s24  ;;  %v5063_v22 = vunpack.i.l.bf16 %v7829_v11  ;;  %v3746_v28 = vsel %vm1770_vm7, %v3714_v61, %v5164_v6  ;;  %v3587_v6 = vsel %vm172_vm0, %v7608_v10, %v5043_v51 }
 0x308   : > { %v5167_v55 = vpop.permute.xlu1 %5166  ;;  %v3589_v10 = vsel %vm172_vm0, %v7677_v38, %v5148_v34  ;;  %v5118_v34 = vunpack.i.l.bf16 %v7865_v14 }
 0x309   : > { %v7956_v47 = vpop.permute.xlu0 %5136  ;;  %v5169_v42 = vunpack.i.h.bf16 %v5167_v55  ;;  %v5168_v0 = vunpack.i.l.bf16 %v5167_v55  ;;  %v3713_v44 = vsel %vm1737_vm6, %v3681_v45, %v5063_v22  ;;  %v3590_v22 = vsel %vm172_vm0, %v7672_v39, %v5149_v31 }
 0x30a   : > { %5436 = vrot.lane.b32.xlu1 %v7753_v1, %s5691_s23  ;;  %v3745_v49 = vsel %vm1770_vm7, %v3713_v44, %v5163_v20  ;;  %v5154_v39 = vunpack.i.h.bf16 %v7929_v17 }
 0x30b   : > { %5451 = vrot.lane.b32.xlu0 %v7745_v36, %s5693_s25  ;;  %v3777_v63 = vsel %vm1803_vm8, %v3745_v49, %v5168_v0  ;;  %v3778_v36 = vsel %vm1803_vm8, %v3746_v28, %v5169_v42  ;;  %v5133_v28 = vunpack.i.l.bf16 %v7946_v15 }
 0x30c   : > { %v5172_v54 = vpop.permute.xlu1 %5171 }
 0x30d   : > { %v7968_v32 = vpop.permute.xlu0 %5141  ;;  %v5174_v11 = vunpack.i.h.bf16 %v5172_v54  ;;  %v5173_v33 = vunpack.i.l.bf16 %v5172_v54 }
 0x30e   : > { %5446 = vrot.lane.b32.xlu1 %v7787_v56, %s5692_s24  ;;  %v5049_v56 = vunpack.i.h.bf16 %v7819_v43  ;;  %v3619_v43 = vsel %vm1638_vm3, %v3587_v6, %v5048_v26 }
 0x30f   : > { %5461 = vrot.lane.b32.xlu0 %v7753_v1, %s5694_s5  ;;  %v3809_v12 = vsel %vm1836_vm9, %v3777_v63, %v5173_v33  ;;  %v3810_v8 = vsel %vm1836_vm9, %v3778_v36, %v5174_v11  ;;  %v5044_v1 = vunpack.i.h.bf16 %v7807_v23  ;;  %v5153_v11 = vunpack.i.l.bf16 %v7929_v17 }
 0x310   : > { %v7980_v2 = vpop.permute.xlu1 %5196  ;;  %v3840_v60 = vpack.c.bf16 %v3810_v8, %v3809_v12  ;;  %v5138_v36 = vunpack.i.l.bf16 %v7956_v47  ;;  %v5143_v17 = vunpack.i.l.bf16 %v7968_v32 }
 0x311   : > { %v5157_v9 = vpop.permute.xlu0 %5156 }
 0x312   : > { %4340 = vmatmul.mubr.msk.bf16.vlgmr.msra.gmra.mxu1 %vm1905_vm10, %v3840_v60  ;;  %5456 = vrot.lane.b32.xlu1 %v7779_v3, %s5693_s25  ;;  %v5159_v45 = vunpack.i.h.bf16 %v5157_v9  ;;  %v5158_v40 = vunpack.i.l.bf16 %v5157_v9  ;;  %v5144_v60 = vunpack.i.h.bf16 %v7968_v32  ;;  %v5198_v32 = vunpack.i.l.bf16 %v7980_v2 }
 0x313   : > { %5471 = vrot.lane.b32.xlu0 %v7779_v3, %s5690_s22  ;;  %v3588_v3 = vsel %vm172_vm0, %v7610_v62, %v5044_v1 }
 0x314   : > { %v7993_v55 = vpop.permute.xlu1 %5201  ;;  %v3620_v48 = vsel %vm1638_vm3, %v3588_v3, %v5049_v56  ;;  %v3651_v44 = vsel %vm1671_vm4, %v3619_v43, %v5158_v40  ;;  %v5199_v40 = vunpack.i.h.bf16 %v7980_v2 }
 0x315   : > { %v5177_v16 = vpop.permute.xlu0 %5176  ;;  %v3652_v62 = vsel %vm1671_vm4, %v3620_v48, %v5159_v45  ;;  %v3622_v45 = vsel %vm1638_vm3, %v3590_v22, %v5154_v39 }
 0x316   : > { %v5179_v23 = vunpack.i.h.bf16 %v5177_v16  ;;  %v5178_v20 = vunpack.i.l.bf16 %v5177_v16  ;;  %5466 = vrot.lane.b32.xlu1 %v7789_v25, %s5694_s5  ;;  %v3621_v16 = vsel %vm1638_vm3, %v3589_v10, %v5153_v11 }
 0x317   : > { %5481 = vrot.lane.b32.xlu0 %v7789_v25, %s5691_s23  ;;  %v5134_v25 = vunpack.i.h.bf16 %v7946_v15  ;;  %v5139_v15 = vunpack.i.h.bf16 %v7956_v47  ;;  %v3653_v11 = vsel %vm1671_vm4, %v3621_v16, %v5118_v34 }
 0x318   : > { %v8010_v0 = vpop.permute.xlu1 %5206  ;;  %v3683_v49 = vsel %vm1704_vm5, %v3651_v44, %v5178_v20  ;;  %v3684_v38 = vsel %vm1704_vm5, %v3652_v62, %v5179_v23 }
 0x319   : > { %v5182_v42 = vpop.permute.xlu0 %5181  ;;  %v5208_v39 = vunpack.i.l.bf16 %v8010_v0 }
 0x31a   : > { %v5184_v61 = vunpack.i.h.bf16 %v5182_v42  ;;  %v5183_v54 = vunpack.i.l.bf16 %v5182_v42  ;;  %5476 = vrot.lane.b32.xlu1 %v7771_v13, %s5690_s22 }
 0x31b   : > { %5491 = vrot.lane.b32.xlu0 %v7769_v18, %s5692_s24 }
 0x31c   : > { %v3715_v33 = vsel %vm1737_vm6, %v3683_v49, %v5183_v54  ;;  %v3716_v63 = vsel %vm1737_vm6, %v3684_v38, %v5184_v61  ;;  %v5217_v9 = vpop.permute.xlu1 %5216  ;;  %v5209_v38 = vunpack.i.h.bf16 %v8010_v0 }
 0x31d   : > { %v3747_v12 = vsel %vm1770_vm7, %v3715_v33, %v5133_v28  ;;  %v3748_v8 = vsel %vm1770_vm7, %v3716_v63, %v5134_v25  ;;  %v5187_v18 = vpop.permute.xlu0 %5186  ;;  %v5219_v26 = vunpack.i.h.bf16 %v5217_v9  ;;  %v5218_v56 = vunpack.i.l.bf16 %v5217_v9 }
 0x31e   : > { %v5189_v51 = vunpack.i.h.bf16 %v5187_v18  ;;  %v5188_v1 = vunpack.i.l.bf16 %v5187_v18  ;;  %v3779_v31 = vsel %vm1803_vm8, %v3747_v12, %v5138_v36  ;;  %v3780_v47 = vsel %vm1803_vm8, %v3748_v8, %v5139_v15  ;;  %5486 = vrot.lane.b32.xlu1 %v7777_v35, %s5691_s23 }
 0x31f   : > { %5501 = vrot.lane.b32.xlu0 %v7771_v13, %s5693_s25  ;;  %v3811_v20 = vsel %vm1836_vm9, %v3779_v31, %v5143_v17  ;;  %v3812_v3 = vsel %vm1836_vm9, %v3780_v47, %v5144_v60  ;;  %v3593_v62 = vsel %vm172_vm0, %v7724_v46, %v5218_v56  ;;  %v3594_v2 = vsel %vm172_vm0, %v7719_v58, %v5219_v26 }
 0x320   : > { %v3595_v13 = vsel %vm172_vm0, %v7700_v19, %v5188_v1  ;;  %v5222_v23 = vpop.permute.xlu1 %5221  ;;  %v3596_v42 = vsel %vm172_vm0, %v7695_v21, %v5189_v51  ;;  %v3841_v19 = vpack.c.bf16 %v3812_v3, %v3811_v20  ;;  %v5204_v46 = vunpack.i.h.bf16 %v7993_v55 }
 0x321   : > { %v5192_v6 = vpop.permute.xlu0 %5191  ;;  %v5224_v10 = vunpack.i.h.bf16 %v5222_v23  ;;  %v5223_v22 = vunpack.i.l.bf16 %v5222_v23  ;;  %v5203_v58 = vunpack.i.l.bf16 %v7993_v55  ;;  %v5124_v63 = vunpack.i.h.bf16 %v7875_v4 }
 0x322   : > { %v5194_v43 = vunpack.i.h.bf16 %v5192_v6  ;;  %v5193_v48 = vunpack.i.l.bf16 %v5192_v6  ;;  %5496 = vrot.lane.b32.xlu1 %v7821_v57, %s5692_s24  ;;  %4343 = vmatprep.mubr.msk.bf16.mxu1 %vm1905_vm10, %v3841_v19  ;;  %v3654_v57 = vsel %vm1671_vm4, %v3622_v45, %v5119_v29  ;;  %v5123_v15 = vunpack.i.l.bf16 %v7875_v4 }
 0x323   : > { %5511 = vrot.lane.b32.xlu0 %v7777_v35, %s5694_s5  ;;  %v3625_v54 = vsel %vm1638_vm3, %v3593_v62, %v5223_v22  ;;  %v3626_v21 = vsel %vm1638_vm3, %v3594_v2, %v5224_v10  ;;  %v3686_v8 = vsel %vm1704_vm5, %v3654_v57, %v5124_v63  ;;  %v5129_v4 = vunpack.i.h.bf16 %v7889_v30 }
 0x324   : > { %v8056_v44 = vsel %vm1638_vm3, %v3595_v13, %v5193_v48  ;;  %v8059_v61 = vsel %vm1638_vm3, %v3596_v42, %v5194_v43  ;;  %v3657_v25 = vsel %vm1671_vm4, %v3625_v54, %v5198_v32  ;;  %v3658_v35 = vsel %vm1671_vm4, %v3626_v21, %v5199_v40  ;;  %v5232_v49 = vpop.permute.xlu1 %5231  ;;  %v8905_v21 = vld [vmem:[#allocation23_spill] sm:$0xff] }
 0x325   : > { %v8070_v28 = vpop.permute.xlu0 %5211  ;;  %v3689_v55 = vsel %vm1704_vm5, %v3657_v25, %v5203_v58  ;;  %v3690_v33 = vsel %vm1704_vm5, %v3658_v35, %v5204_v46  ;;  %v3685_v12 = vsel %vm1704_vm5, %v3653_v11, %v5123_v15  ;;  %v5234_v18 = vunpack.i.h.bf16 %v5232_v49  ;;  %v8906_v58 = vld [vmem:[#allocation22_spill] sm:$0xff]  ;;  %v8907_v35 = vld [vmem:[#allocation25_spill] sm:$0xff] }
 0x326   : > { %5506 = vrot.lane.b32.xlu1 %v7811_v37, %s5693_s25  ;;  %v8087_v0 = vsel %vm1737_vm6, %v3689_v55, %v5208_v39  ;;  %v8090_v14 = vsel %vm1737_vm6, %v3690_v33, %v5209_v38  ;;  %v5233_v9 = vunpack.i.l.bf16 %v5232_v49  ;;  %v5128_v60 = vunpack.i.l.bf16 %v7889_v30  ;;  %v8908_v49 = vld [vmem:[#allocation24_spill] sm:$0xff]  ;;  %v8909_v38 = vld [vmem:[#allocation29_spill] sm:$0xff] }
 0x327   : > { %5521 = vrot.lane.b32.xlu0 %v7811_v37, %s5690_s22  ;;  %v3718_v1 = vsel %vm1737_vm6, %v3686_v8, %v5129_v4 }
 0x328   : > { %v5237_v36 = vpop.permute.xlu1 %5236  ;;  %v3717_v51 = vsel %vm1737_vm6, %v3685_v12, %v5128_v60  ;;  %v3750_v31 = vsel %vm1770_vm7, %v3718_v1, %v5234_v18  ;;  %v8910_v12 = vld [vmem:[#allocation30_spill] sm:$0xff]  ;;  %v2290_v1 = vld [vmem:[#allocation3 + $0xf0] sm:$0xff] }
 0x329   : > { %v8092_v29 = vpop.permute.xlu0 %5226  ;;  %v5239_v37 = vunpack.i.h.bf16 %v5237_v36  ;;  %v5238_v17 = vunpack.i.l.bf16 %v5237_v36  ;;  %v3749_v47 = vsel %vm1770_vm7, %v3717_v51, %v5233_v9  ;;  %v8911_v60 = vld [vmem:[#allocation26_spill] sm:$0xff] }
 0x32a   : > { %5516 = vrot.lane.b32.xlu1 %v7823_v50, %s5694_s5 }
 0x32b   : > { %5531 = vrot.lane.b32.xlu0 %v7823_v50, %s5691_s23  ;;  %v3781_v16 = vsel %vm1803_vm8, %v3749_v47, %v5238_v17  ;;  %v3782_v45 = vsel %vm1803_vm8, %v3750_v31, %v5239_v37  ;;  %v8912_v37 = vld [vmem:[#allocation27_spill] sm:$0xff] }
 0x32c   : > { %v5242_v56 = vpop.permute.xlu1 %5241 }
 0x32d   : > { %v8104_v26 = vpop.permute.xlu0 %5246  ;;  %v5244_v30 = vunpack.i.h.bf16 %v5242_v56  ;;  %v5243_v34 = vunpack.i.l.bf16 %v5242_v56  ;;  %v2291_v56 = vld [vmem:[#allocation3 + $0xf8] sm:$0xff] }
 0x32e   : > { %5526 = vrot.lane.b32.xlu1 %v7799_v52, %s5690_s22 }
 0x32f   : > { %5541 = vrot.lane.b32.xlu0 %v7797_v27, %s5692_s24  ;;  %v3813_v50 = vsel %vm1836_vm9, %v3781_v16, %v5243_v34  ;;  %v3814_v40 = vsel %vm1836_vm9, %v3782_v45, %v5244_v30 }
 0x330   : > { %v3842_v32 = vpack.c.bf16 %v3814_v40, %v3813_v50  ;;  %v5267_v6 = vpop.permute.xlu1 %5266 }
 0x331   : > { %v8116_v13 = vpop.permute.xlu0 %5251  ;;  %v5269_v10 = vunpack.i.h.bf16 %v5267_v6  ;;  %v5268_v22 = vunpack.i.l.bf16 %v5267_v6 }
 0x332   : > { %4344 = vmatmul.mubr.msk.bf16.gmra.mxu1 %vm1905_vm10, %v3842_v32  ;;  %5536 = vrot.lane.b32.xlu1 %v7809_v5, %s5691_s23  ;;  %v8913_v32 = vld [vmem:[#allocation28_spill] sm:$0xff] }
 0x333   : > { %5551 = vrot.lane.b32.xlu0 %v7799_v52, %s5693_s25 }
 0x334   : > { %v5272_v23 = vpop.permute.xlu1 %5271 }
 0x335   : > { %v5257_v27 = vpop.permute.xlu0 %5256  ;;  %v5274_v43 = vunpack.i.h.bf16 %v5272_v23  ;;  %v5273_v48 = vunpack.i.l.bf16 %v5272_v23  ;;  %v2288_v23 = vld [vmem:[#allocation3 + $0xd8] sm:$0xff] }
 0x336   : > { %v5259_v20 = vunpack.i.h.bf16 %v5257_v27  ;;  %v5258_v3 = vunpack.i.l.bf16 %v5257_v27  ;;  %5546 = vrot.lane.b32.xlu1 %v7857_v41, %s5692_s24 }
 0x337   : > { %5561 = vrot.lane.b32.xlu0 %v7809_v5, %s5694_s5  ;;  %v3597_v5 = vsel %vm172_vm0, %v8907_v35, %v5273_v48  ;;  %v3598_v41 = vsel %vm172_vm0, %v8908_v49, %v5274_v43 }
 0x338   : > { %v5277_v62 = vpop.permute.xlu1 %5276  ;;  %v3599_v46 = vsel %vm172_vm0, %v8905_v21, %v5258_v3  ;;  %v3600_v25 = vsel %vm172_vm0, %v8906_v58, %v5259_v20  ;;  %v2289_v20 = vld [vmem:[#allocation3 + $0xe0] sm:$0xff] }
 0x339   : > { %v5262_v42 = vpop.permute.xlu0 %5261  ;;  %v5279_v19 = vunpack.i.h.bf16 %v5277_v62  ;;  %v5278_v54 = vunpack.i.l.bf16 %v5277_v62 }
 0x33a   : > { %v5264_v52 = vunpack.i.h.bf16 %v5262_v42  ;;  %v5263_v2 = vunpack.i.l.bf16 %v5262_v42  ;;  %5556 = vrot.lane.b32.xlu1 %v8909_v38, %s5693_s25 }
 0x33b   : > { %5571 = vrot.lane.b32.xlu0 %v8909_v38, %s5690_s22  ;;  %v3629_v57 = vsel %vm1638_vm3, %v3597_v5, %v5278_v54  ;;  %v3630_v55 = vsel %vm1638_vm3, %v3598_v41, %v5279_v19 }
 0x33c   : > { %v3631_v39 = vsel %vm1638_vm3, %v3599_v46, %v5263_v2  ;;  %v3632_v11 = vsel %vm1638_vm3, %v3600_v25, %v5264_v52  ;;  %v8145_v63 = vpop.permute.xlu1 %5286  ;;  %v8148_v15 = vsel %vm1671_vm4, %v3629_v57, %v5268_v22  ;;  %v8151_v36 = vsel %vm1671_vm4, %v3630_v55, %v5269_v10  ;;  %v8914_v46 = vld [vmem:[#allocation32_spill] sm:$0xff]  ;;  %v2295_v57 = vld [vmem:[#allocation3 + $0x128] sm:$0xff] }
 0x33d   : > { %v8143_v33 = vpop.permute.xlu0 %5281 }
 0x33e   : > { %5566 = vrot.lane.b32.xlu1 %v8910_v12, %s5694_s5 }
 0x33f   : > { %5581 = vrot.lane.b32.xlu0 %v8910_v12, %s5691_s23 }
 0x340   : > { %v5302_v8 = vpop.permute.xlu1 %5301 }
 0x341   : > { %v5292_v18 = vpop.permute.xlu0 %5291  ;;  %v5304_v22 = vunpack.i.h.bf16 %v5302_v8  ;;  %v5303_v42 = vunpack.i.l.bf16 %v5302_v8  ;;  %v2429_v8 = vld [vmem:[#allocation3 + $0x189] sm:$0xff] }
 0x342   : > { %v5294_v9 = vunpack.i.h.bf16 %v5292_v18  ;;  %v5293_v4 = vunpack.i.l.bf16 %v5292_v18  ;;  %5576 = vrot.lane.b32.xlu1 %v8912_v37, %s5690_s22 }
 0x343   : > { %5591 = vrot.lane.b32.xlu0 %v8911_v60, %s5692_s24 }
 0x344   : > { %v5307_v51 = vpop.permute.xlu1 %5306  ;;  %v3603_v30 = vsel %vm172_vm0, %v2290_v1, %v5293_v4  ;;  %v3604_v34 = vsel %vm172_vm0, %v2291_v56, %v5294_v9 }
 0x345   : > { %v5297_v17 = vpop.permute.xlu0 %5296  ;;  %v5309_v16 = vunpack.i.h.bf16 %v5307_v51  ;;  %v5308_v45 = vunpack.i.l.bf16 %v5307_v51 }
 0x346   : > { %v5299_v31 = vunpack.i.h.bf16 %v5297_v17  ;;  %v5298_v47 = vunpack.i.l.bf16 %v5297_v17  ;;  %5586 = vrot.lane.b32.xlu1 %v8913_v32, %s5691_s23  ;;  %v2428_v17 = vld [vmem:[#allocation3 + $0x181] sm:$0xff] }
 0x347   : > { %5601 = vrot.lane.b32.xlu0 %v8912_v37, %s5693_s25  ;;  %v3601_v62 = vsel %vm172_vm0, %v2288_v23, %v5308_v45  ;;  %v3602_v52 = vsel %vm172_vm0, %v2289_v20, %v5309_v16  ;;  %v5625_v56 = vpack.i.bf16 %v2429_v8, %v2428_v17  ;;  %v8915_v20 = vld [vmem:[#allocation31_spill] sm:$0xff] }
 0x348   : > { %v8166_v50 = vsel %vm1638_vm3, %v3603_v30, %v5298_v47  ;;  %v3636_v40 = vsel %vm1638_vm3, %v3604_v34, %v5299_v31  ;;  %v5312_v27 = vpop.permute.xlu1 %5311  ;;  %v2292_v31 = vld [vmem:[#allocation3 + $0x108] sm:$0xff]  ;;  %v2293_v47 = vld [vmem:[#allocation3 + $0x110] sm:$0xff] }
 0x349   : > { %v5317_v6 = vpop.permute.xlu0 %5316  ;;  %v5314_v48 = vunpack.i.h.bf16 %v5312_v27  ;;  %v5313_v10 = vunpack.i.l.bf16 %v5312_v27 }
 0x34a   : > { %v5319_v3 = vunpack.i.h.bf16 %v5317_v6  ;;  %v5318_v43 = vunpack.i.l.bf16 %v5317_v6  ;;  %5596 = vrot.lane.b32.xlu1 %v8914_v46, %s5692_s24 }
 0x34b   : > { %5611 = vrot.lane.b32.xlu0 %v8913_v32, %s5694_s5  ;;  %v3633_v54 = vsel %vm1638_vm3, %v3601_v62, %v5313_v10  ;;  %v3634_v21 = vsel %vm1638_vm3, %v3602_v52, %v5314_v48  ;;  %v2493_v52 = vld [vmem:[#allocation3 + $0x198] sm:$0xff] }
 0x34c   : > { %v8176_v2 = vsel %vm1671_vm4, %v3632_v11, %v5319_v3  ;;  %v8179_v19 = vsel %vm1671_vm4, %v3631_v39, %v5318_v43  ;;  %v5332_v58 = vpop.permute.xlu1 %5331  ;;  %v8186_v35 = vsel %vm1671_vm4, %v3633_v54, %v5303_v42  ;;  %v8189_v5 = vsel %vm1671_vm4, %v3634_v21, %v5304_v22  ;;  %v2294_v11 = vld [vmem:[#allocation3 + $0x120] sm:$0xff]  ;;  %v2461_v3 = vld [vmem:[#allocation3 + $0x18a] sm:$0xff] }
 0x34d   : > { %v5322_v25 = vpop.permute.xlu0 %5321  ;;  %v5334_v32 = vunpack.i.h.bf16 %v5332_v58  ;;  %v5333_v6 = vunpack.i.l.bf16 %v5332_v58  ;;  %v2494_v54 = vld [vmem:[#allocation3 + $0x1a0] sm:$0xff] }
 0x34e   : > { %v5324_v49 = vunpack.i.h.bf16 %v5322_v25  ;;  %v5323_v41 = vunpack.i.l.bf16 %v5322_v25  ;;  %5606 = vrot.lane.b32.xlu1 %v7891_v7, %s5693_s25  ;;  %v5645_v25 = vpack.i.bf16 %v2494_v54, %v2493_v52 }
 0x34f   : > { %5621 = vrot.lane.b32.xlu0 %v7891_v7, %s5690_s22 }
 0x350   : > { %v5337_v39 = vpop.permute.xlu1 %5336  ;;  %v3607_v18 = vsel %vm172_vm0, %v2294_v11, %v5323_v41  ;;  %v3608_v9 = vsel %vm172_vm0, %v2295_v57, %v5324_v49  ;;  %v2525_v49 = vld [vmem:[#allocation3 + $0x199] sm:$0xff]  ;;  %v2558_v57 = vld [vmem:[#allocation3 + $0x1a2] sm:$0xff] }
 0x351   : > { %v5327_v38 = vpop.permute.xlu0 %5326  ;;  %v5339_v4 = vunpack.i.h.bf16 %v5337_v39  ;;  %v5338_v60 = vunpack.i.l.bf16 %v5337_v39  ;;  %v2526_v39 = vld [vmem:[#allocation3 + $0x1a1] sm:$0xff] }
 0x352   : > { %v5329_v55 = vunpack.i.h.bf16 %v5327_v38  ;;  %v5328_v12 = vunpack.i.l.bf16 %v5327_v38  ;;  %5616 = vrot.lane.b32.xlu1 %v7905_v59, %s5694_s5  ;;  %v2557_v11 = vld [vmem:[#allocation3 + $0x19a] sm:$0xff] }
 0x353   : > { %5631 = vrot.lane.b32.xlu0 %v7905_v59, %s5691_s23  ;;  %v3605_v27 = vsel %vm172_vm0, %v2292_v31, %v5338_v60  ;;  %v3606_v23 = vsel %vm172_vm0, %v2293_v47, %v5339_v4  ;;  %v2460_v59 = vld [vmem:[#allocation3 + $0x182] sm:$0xff]  ;;  %v5665_v31 = vpack.i.bf16 %v2558_v57, %v2557_v11  ;;  %v5109_v47 = vunpack.i.h.bf16 %v7909_v53 }
 0x354   : > { %v8200_v37 = vsel %vm1638_vm3, %v3607_v18, %v5328_v12  ;;  %v8203_v7 = vsel %vm1638_vm3, %v3608_v9, %v5329_v55  ;;  %v5342_v1 = vpop.permute.xlu1 %5341  ;;  %v5635_v46 = vpack.i.bf16 %v2461_v3, %v2460_v59  ;;  %v2298_v55 = vld [vmem:[#allocation3 + $0x150] sm:$0xff]  ;;  %v2299_v12 = vld [vmem:[#allocation3 + $0x158] sm:$0xff]  ;;  %v5677_v11 = vld [vmem:[#allocation3 + $0x68] sm:$0xff] }
 0x355   : > { %v5347_v51 = vpop.permute.xlu0 %5346  ;;  %v5344_v16 = vunpack.i.h.bf16 %v5342_v1  ;;  %v5343_v45 = vunpack.i.l.bf16 %v5342_v1  ;;  %v3592_v57 = vsel %vm172_vm0, %v5677_v11, %v5109_v47 }
 0x356   : > { %v5349_v30 = vunpack.i.h.bf16 %v5347_v51  ;;  %v5348_v34 = vunpack.i.l.bf16 %v5347_v51  ;;  %5626 = vrot.lane.b32.xlu1 %v5625_v56, %s5690_s22 }
 0x357   : > { %5641 = vrot.lane.b32.xlu0 %v8915_v20, %s5692_s24  ;;  %v3637_v10 = vsel %vm1638_vm3, %v3605_v27, %v5343_v45  ;;  %v3638_v22 = vsel %vm1638_vm3, %v3606_v23, %v5344_v16  ;;  %v5113_v16 = vunpack.i.l.bf16 %v7927_v24  ;;  %v2297_v27 = vld [vmem:[#allocation3 + $0x140] sm:$0xff] }
 0x358   : > { %v8212_v43 = vsel %vm1671_vm4, %v3636_v40, %v5349_v30  ;;  %v8216_v48 = vsel %vm1671_vm4, %v8166_v50, %v5348_v34  ;;  %v5362_v42 = vpop.permute.xlu1 %5361  ;;  %v8222_v21 = vsel %vm1671_vm4, %v3637_v10, %v5333_v6  ;;  %v8225_v40 = vsel %vm1671_vm4, %v3638_v22, %v5334_v32  ;;  %v2296_v6 = vld [vmem:[#allocation3 + $0x138] sm:$0xff] }
 0x359   : > { %v5352_v62 = vpop.permute.xlu0 %5351  ;;  %v5108_v30 = vunpack.i.l.bf16 %v7909_v53  ;;  %v5114_v34 = vunpack.i.h.bf16 %v7927_v24  ;;  %v5364_v10 = vunpack.i.h.bf16 %v5362_v42  ;;  %v5363_v22 = vunpack.i.l.bf16 %v5362_v42 }
 0x35a   : > { %v5354_v58 = vunpack.i.h.bf16 %v5352_v62  ;;  %v5353_v50 = vunpack.i.l.bf16 %v5352_v62  ;;  %5636 = vrot.lane.b32.xlu1 %v5635_v46, %s5691_s23  ;;  %v5229_v42 = vunpack.i.h.bf16 %v8092_v29 }
 0x35b   : > { %5651 = vrot.lane.b32.xlu0 %v5625_v56, %s5693_s25  ;;  %v5655_v56 = vpack.i.bf16 %v2526_v39, %v2525_v49 }
 0x35c   : > { %v5367_v38 = vpop.permute.xlu1 %5366  ;;  %v3611_v9 = vsel %vm172_vm0, %v2298_v55, %v5353_v50  ;;  %v3612_v4 = vsel %vm172_vm0, %v2299_v12, %v5354_v58  ;;  %v5228_v58 = vunpack.i.l.bf16 %v8092_v29  ;;  %v5254_v29 = vunpack.i.h.bf16 %v8116_v13 }
 0x35d   : > { %v5357_v41 = vpop.permute.xlu0 %5356  ;;  %v5369_v60 = vunpack.i.h.bf16 %v5367_v38  ;;  %v5368_v17 = vunpack.i.l.bf16 %v5367_v38  ;;  %v5676_v38 = vld [vmem:[#allocation3 + $0x60] sm:$0xff]  ;;  %v5253_v55 = vunpack.i.l.bf16 %v8116_v13 }
 0x35e   : > { %v5359_v8 = vunpack.i.h.bf16 %v5357_v41  ;;  %v5358_v18 = vunpack.i.l.bf16 %v5357_v41  ;;  %5646 = vrot.lane.b32.xlu1 %v5645_v25, %s5692_s24  ;;  %v5248_v41 = vunpack.i.l.bf16 %v8104_v26  ;;  %v3591_v39 = vsel %vm172_vm0, %v5676_v38, %v5108_v30  ;;  %v2300_v38 = vld [vmem:[#allocation3 + $0x168] sm:$0xff] }
 0x35f   : > { %5661 = vrot.lane.b32.xlu0 %v5635_v46, %s5694_s5  ;;  %v3609_v62 = vsel %vm172_vm0, %v2296_v6, %v5368_v17  ;;  %v3610_v52 = vsel %vm172_vm0, %v2297_v27, %v5369_v60  ;;  %v3623_v12 = vsel %vm1638_vm3, %v3591_v39, %v5113_v16  ;;  %v2301_v39 = vld [vmem:[#allocation3 + $0x170] sm:$0xff] }
 0x360   : > { %v3643_v51 = vsel %vm1638_vm3, %v3611_v9, %v5358_v18  ;;  %v3644_v1 = vsel %vm1638_vm3, %v3612_v4, %v5359_v8  ;;  %v5372_v32 = vpop.permute.xlu1 %5371  ;;  %v3624_v8 = vsel %vm1638_vm3, %v3592_v57, %v5114_v34 }
 0x361   : > { %v5377_v45 = vpop.permute.xlu0 %5376  ;;  %v5374_v59 = vunpack.i.h.bf16 %v5372_v32  ;;  %v5373_v3 = vunpack.i.l.bf16 %v5372_v32  ;;  %v3656_v18 = vsel %vm1671_vm4, %v3624_v8, %v5229_v42 }
 0x362   : > { %v5379_v23 = vunpack.i.h.bf16 %v5377_v45  ;;  %v5378_v20 = vunpack.i.l.bf16 %v5377_v45  ;;  %5656 = vrot.lane.b32.xlu1 %v5655_v56, %s5693_s25  ;;  %v5213_v45 = vunpack.i.l.bf16 %v8070_v28 }
 0x363   : > { %v3641_v54 = vsel %vm1638_vm3, %v3609_v62, %v5373_v3  ;;  %v3642_v46 = vsel %vm1638_vm3, %v3610_v52, %v5374_v59 }
 0x364   : > { %v8243_v53 = vsel %vm1671_vm4, %v8203_v7, %v5379_v23  ;;  %v8247_v24 = vsel %vm1671_vm4, %v8200_v37, %v5378_v20  ;;  %v8254_v25 = vpop.permute.xlu1 %5386  ;;  %v8257_v7 = vsel %vm1671_vm4, %v3641_v54, %v5363_v22  ;;  %v8260_v49 = vsel %vm1671_vm4, %v3642_v46, %v5364_v10 }
 0x365   : > { %v5382_v50 = vpop.permute.xlu0 %5381  ;;  %v5249_v37 = vunpack.i.h.bf16 %v8104_v26  ;;  %v3655_v26 = vsel %vm1671_vm4, %v3623_v12, %v5228_v58  ;;  %v5288_v46 = vunpack.i.l.bf16 %v8145_v63 }
 0x366   : > { %5666 = vrot.lane.b32.xlu1 %v5665_v31, %s5694_s5  ;;  %v3687_v60 = vsel %vm1704_vm5, %v3655_v26, %v5248_v41  ;;  %v5384_v16 = vunpack.i.h.bf16 %v5382_v50  ;;  %v5383_v34 = vunpack.i.l.bf16 %v5382_v50  ;;  %v5214_v31 = vunpack.i.h.bf16 %v8070_v28 }
 0x367   : > { %v3688_v17 = vsel %vm1704_vm5, %v3656_v18, %v5249_v37  ;;  %v3719_v13 = vsel %vm1737_vm6, %v3687_v60, %v5253_v55  ;;  %v5389_v37 = vunpack.i.h.bf16 %v8254_v25  ;;  %v5388_v41 = vunpack.i.l.bf16 %v8254_v25 }
 0x368   : > { %v5392_v9 = vpop.permute.xlu1 %5391  ;;  %v3720_v30 = vsel %vm1737_vm6, %v3688_v17, %v5254_v29  ;;  %v3751_v20 = vsel %vm1770_vm7, %v3719_v13, %v5213_v45  ;;  %v3753_v17 = vsel %vm1770_vm7, %v8087_v0, %v5288_v46 }
 0x369   : > { %v5407_v4 = vpop.permute.xlu0 %5406  ;;  %v3752_v59 = vsel %vm1770_vm7, %v3720_v30, %v5214_v31  ;;  %v3783_v62 = vsel %vm1803_vm8, %v3751_v20, %v5383_v34  ;;  %v5394_v29 = vunpack.i.h.bf16 %v5392_v9  ;;  %v5393_v55 = vunpack.i.l.bf16 %v5392_v9 }
 0x36a   : > { %v5409_v56 = vunpack.i.h.bf16 %v5407_v4  ;;  %v5408_v47 = vunpack.i.l.bf16 %v5407_v4  ;;  %v3784_v22 = vsel %vm1803_vm8, %v3752_v59, %v5384_v16  ;;  %v3785_v30 = vsel %vm1803_vm8, %v3753_v17, %v5388_v41 }
 0x36c   : > { %v8280_v32 = vsel %vm1671_vm4, %v3644_v1, %v5409_v56  ;;  %v8283_v6 = vsel %vm1671_vm4, %v3643_v51, %v5408_v47  ;;  %v5397_v23 = vpop.permute.xlu1 %5396  ;;  %v5289_v51 = vunpack.i.h.bf16 %v8145_v63 }
 0x36d   : > { %v5412_v27 = vpop.permute.xlu0 %5411  ;;  %v5399_v52 = vunpack.i.h.bf16 %v5397_v23  ;;  %v5398_v28 = vunpack.i.l.bf16 %v5397_v23  ;;  %v5284_v23 = vunpack.i.h.bf16 %v8143_v33 }
 0x36e   : > { %v5414_v3 = vunpack.i.h.bf16 %v5412_v27  ;;  %v5413_v10 = vunpack.i.l.bf16 %v5412_v27  ;;  %v3754_v9 = vsel %vm1770_vm7, %v8090_v14, %v5289_v51  ;;  %v5283_v14 = vunpack.i.l.bf16 %v8143_v33 }
 0x36f   : > { %v3613_v12 = vsel %vm172_vm0, %v2300_v38, %v5398_v28  ;;  %v3614_v8 = vsel %vm172_vm0, %v2301_v39, %v5399_v52  ;;  %v3786_v13 = vsel %vm1803_vm8, %v3754_v9, %v5389_v37  ;;  %v3660_v28 = vsel %vm1671_vm4, %v8059_v61, %v5284_v23 }
 0x370   : > { %v3816_v1 = vsel %vm1836_vm9, %v3784_v22, %v5414_v3  ;;  %v3815_v54 = vsel %vm1836_vm9, %v3783_v62, %v5413_v10  ;;  %v5402_v50 = vpop.permute.xlu1 %5401 }
 0x371   : > { %v3843_v42 = vpack.c.bf16 %v3816_v1, %v3815_v54  ;;  %v5422_v58 = vpop.permute.xlu0 %5421  ;;  %v5404_v11 = vunpack.i.h.bf16 %v5402_v50  ;;  %v5403_v57 = vunpack.i.l.bf16 %v5402_v50  ;;  %v3659_v1 = vsel %vm1671_vm4, %v8056_v44, %v5283_v14 }
 0x372   : > { %v5424_v0 = vunpack.i.h.bf16 %v5422_v58  ;;  %v5423_v20 = vunpack.i.l.bf16 %v5422_v58 }
 0x373   : > { %4347 = vmatprep.mubr.msk.bf16.mxu1 %vm1905_vm10, %v3843_v42  ;;  %v3645_v63 = vsel %vm1638_vm3, %v3613_v12, %v5403_v57  ;;  %v3646_v18 = vsel %vm1638_vm3, %v3614_v8, %v5404_v11 }
 0x374   : > { %v5417_v4 = vpop.permute.xlu1 %5416  ;;  %v8301_v25 = vsel %vm1671_vm4, %v3645_v63, %v5393_v55  ;;  %v8304_v60 = vsel %vm1671_vm4, %v3646_v18, %v5394_v29  ;;  %v3692_v33 = vsel %vm1704_vm5, %v3660_v28, %v5424_v0  ;;  %v3691_v46 = vsel %vm1704_vm5, %v3659_v1, %v5423_v20 }
 0x375   : > { %v5432_v26 = vpop.permute.xlu0 %5431  ;;  %v5419_v56 = vunpack.i.h.bf16 %v5417_v4  ;;  %v5418_v47 = vunpack.i.l.bf16 %v5417_v4 }
 0x376   : > { %v5434_v59 = vunpack.i.h.bf16 %v5432_v26  ;;  %v5433_v3 = vunpack.i.l.bf16 %v5432_v26 }
 0x377   : > { %v3818_v16 = vsel %vm1836_vm9, %v3786_v13, %v5419_v56  ;;  %v3817_v34 = vsel %vm1836_vm9, %v3785_v30, %v5418_v47 }
 0x378   : > { %v3844_v31 = vpack.c.bf16 %v3818_v16, %v3817_v34  ;;  %v5427_v27 = vpop.permute.xlu1 %5426  ;;  %v3723_v42 = vsel %vm1737_vm6, %v3691_v46, %v5433_v3  ;;  %v3724_v58 = vsel %vm1737_vm6, %v3692_v33, %v5434_v59 }
 0x379   : > { %v5442_v45 = vpop.permute.xlu0 %5441  ;;  %v5429_v55 = vunpack.i.h.bf16 %v5427_v27  ;;  %v5428_v12 = vunpack.i.l.bf16 %v5427_v27 }
 0x37a   : > { %4348 = vmatmul.mubr.msk.bf16.gmra.mxu1 %vm1905_vm10, %v3844_v31  ;;  %v5444_v62 = vunpack.i.h.bf16 %v5442_v45  ;;  %v5443_v52 = vunpack.i.l.bf16 %v5442_v45 }
 0x37b   : > { %v3694_v13 = vsel %vm1704_vm5, %v8151_v36, %v5429_v55  ;;  %v3693_v30 = vsel %vm1704_vm5, %v8148_v15, %v5428_v12 }
 0x37c   : > { %v5437_v22 = vpop.permute.xlu1 %5436  ;;  %v3755_v41 = vsel %vm1770_vm7, %v3723_v42, %v5443_v52  ;;  %v3756_v38 = vsel %vm1770_vm7, %v3724_v58, %v5444_v62 }
 0x37d   : > { %v5452_v10 = vpop.permute.xlu0 %5451  ;;  %v5439_v18 = vunpack.i.h.bf16 %v5437_v22  ;;  %v5438_v26 = vunpack.i.l.bf16 %v5437_v22 }
 0x37e   : > { %v5454_v54 = vunpack.i.h.bf16 %v5452_v10  ;;  %v5453_v51 = vunpack.i.l.bf16 %v5452_v10 }
 0x37f   : > { %v3725_v34 = vsel %vm1737_vm6, %v3693_v30, %v5438_v26  ;;  %v3726_v31 = vsel %vm1737_vm6, %v3694_v13, %v5439_v18 }
 0x380   : > { %v5447_v37 = vpop.permute.xlu1 %5446  ;;  %v3787_v44 = vsel %vm1803_vm8, %v3755_v41, %v5453_v51  ;;  %v3788_v11 = vsel %vm1803_vm8, %v3756_v38, %v5454_v54 }
 0x381   : > { %v5462_v50 = vpop.permute.xlu0 %5461  ;;  %v5449_v9 = vunpack.i.h.bf16 %v5447_v37  ;;  %v5448_v17 = vunpack.i.l.bf16 %v5447_v37 }
 0x382   : > { %v5464_v61 = vunpack.i.h.bf16 %v5462_v50  ;;  %v5463_v39 = vunpack.i.l.bf16 %v5462_v50 }
 0x383   : > { %v3757_v27 = vsel %vm1770_vm7, %v3725_v34, %v5448_v17  ;;  %v3758_v23 = vsel %vm1770_vm7, %v3726_v31, %v5449_v9 }
 0x384   : > { %v3819_v57 = vsel %vm1836_vm9, %v3787_v44, %v5463_v39  ;;  %v3820_v29 = vsel %vm1836_vm9, %v3788_v11, %v5464_v61  ;;  %v5457_v4 = vpop.permute.xlu1 %5456 }
 0x385   : > { %v3845_v8 = vpack.c.bf16 %v3820_v29, %v3819_v57  ;;  %v5472_v63 = vpop.permute.xlu0 %5471  ;;  %v5459_v56 = vunpack.i.h.bf16 %v5457_v4  ;;  %v5458_v47 = vunpack.i.l.bf16 %v5457_v4 }
 0x386   : > { %v5474_v62 = vunpack.i.h.bf16 %v5472_v63  ;;  %v5473_v52 = vunpack.i.l.bf16 %v5472_v63 }
 0x387   : > { %4351 = vmatprep.mubr.msk.bf16.mxu1 %vm1905_vm10, %v3845_v8  ;;  %v3789_v20 = vsel %vm1803_vm8, %v3757_v27, %v5458_v47  ;;  %v3790_v59 = vsel %vm1803_vm8, %v3758_v23, %v5459_v56 }
 0x388   : > { %v5467_v45 = vpop.permute.xlu1 %5466  ;;  %v3696_v50 = vsel %vm1704_vm5, %v8176_v2, %v5474_v62  ;;  %v3695_v37 = vsel %vm1704_vm5, %v8179_v19, %v5473_v52 }
 0x389   : > { %v5482_v16 = vpop.permute.xlu0 %5481  ;;  %v5469_v14 = vunpack.i.h.bf16 %v5467_v45  ;;  %v5468_v0 = vunpack.i.l.bf16 %v5467_v45 }
 0x38a   : > { %v5484_v28 = vunpack.i.h.bf16 %v5482_v16  ;;  %v5483_v1 = vunpack.i.l.bf16 %v5482_v16 }
 0x38b   : > { %v3821_v36 = vsel %vm1836_vm9, %v3789_v20, %v5468_v0  ;;  %v3822_v15 = vsel %vm1836_vm9, %v3790_v59, %v5469_v14 }
 0x38c   : > { %v3846_v10 = vpack.c.bf16 %v3822_v15, %v3821_v36  ;;  %v5477_v22 = vpop.permute.xlu1 %5476  ;;  %v3727_v41 = vsel %vm1737_vm6, %v3695_v37, %v5483_v1  ;;  %v3728_v38 = vsel %vm1737_vm6, %v3696_v50, %v5484_v28 }
 0x38d   : > { %v5492_v3 = vpop.permute.xlu0 %5491  ;;  %v5479_v8 = vunpack.i.h.bf16 %v5477_v22  ;;  %v5478_v63 = vunpack.i.l.bf16 %v5477_v22 }
 0x38e   : > { %4352 = vmatmul.mubr.msk.bf16.gmra.mxu1 %vm1905_vm10, %v3846_v10  ;;  %v5494_v51 = vunpack.i.h.bf16 %v5492_v3  ;;  %v5493_v33 = vunpack.i.l.bf16 %v5492_v3 }
 0x38f   : > { %v3698_v16 = vsel %vm1704_vm5, %v8189_v5, %v5479_v8  ;;  %v3697_v34 = vsel %vm1704_vm5, %v8186_v35, %v5478_v63 }
 0x390   : > { %v5487_v46 = vpop.permute.xlu1 %5486  ;;  %v3759_v39 = vsel %vm1770_vm7, %v3727_v41, %v5493_v33  ;;  %v3760_v44 = vsel %vm1770_vm7, %v3728_v38, %v5494_v51 }
 0x391   : > { %v5502_v54 = vpop.permute.xlu0 %5501  ;;  %v5489_v4 = vunpack.i.h.bf16 %v5487_v46  ;;  %v5488_v9 = vunpack.i.l.bf16 %v5487_v46 }
 0x392   : > { %v5504_v42 = vunpack.i.h.bf16 %v5502_v54  ;;  %v5503_v58 = vunpack.i.l.bf16 %v5502_v54 }
 0x393   : > { %v3729_v45 = vsel %vm1737_vm6, %v3697_v34, %v5488_v9  ;;  %v3730_v27 = vsel %vm1737_vm6, %v3698_v16, %v5489_v4 }
 0x394   : > { %v5497_v29 = vpop.permute.xlu1 %5496  ;;  %v3791_v55 = vsel %vm1803_vm8, %v3759_v39, %v5503_v58  ;;  %v3792_v12 = vsel %vm1803_vm8, %v3760_v44, %v5504_v42 }
 0x395   : > { %v5512_v61 = vpop.permute.xlu0 %5511  ;;  %v5499_v56 = vunpack.i.h.bf16 %v5497_v29  ;;  %v5498_v47 = vunpack.i.l.bf16 %v5497_v29 }
 0x396   : > { %v5514_v11 = vunpack.i.h.bf16 %v5512_v61  ;;  %v5513_v57 = vunpack.i.l.bf16 %v5512_v61 }
 0x397   : > { %v3761_v14 = vsel %vm1770_vm7, %v3729_v45, %v5498_v47  ;;  %v3762_v0 = vsel %vm1770_vm7, %v3730_v27, %v5499_v56 }
 0x398   : > { %v3823_v2 = vsel %vm1836_vm9, %v3791_v55, %v5513_v57  ;;  %v3824_v19 = vsel %vm1836_vm9, %v3792_v12, %v5514_v11  ;;  %v5507_v17 = vpop.permute.xlu1 %5506 }
 0x399   : > { %v3847_v18 = vpack.c.bf16 %v3824_v19, %v3823_v2  ;;  %v5522_v26 = vpop.permute.xlu0 %5521  ;;  %v5509_v13 = vunpack.i.h.bf16 %v5507_v17  ;;  %v5508_v30 = vunpack.i.l.bf16 %v5507_v17 }
 0x39a   : > { %v5524_v62 = vunpack.i.h.bf16 %v5522_v26  ;;  %v5523_v52 = vunpack.i.l.bf16 %v5522_v26 }
 0x39b   : > { %4355 = vmatprep.mubr.msk.bf16.mxu1 %vm1905_vm10, %v3847_v18  ;;  %v3793_v36 = vsel %vm1803_vm8, %v3761_v14, %v5508_v30  ;;  %v3794_v15 = vsel %vm1803_vm8, %v3762_v0, %v5509_v13 }
 0x39c   : > { %v5517_v23 = vpop.permute.xlu1 %5516  ;;  %v3700_v50 = vsel %vm1704_vm5, %v8212_v43, %v5524_v62  ;;  %v3699_v37 = vsel %vm1704_vm5, %v8216_v48, %v5523_v52 }
 0x39d   : > { %v5532_v31 = vpop.permute.xlu0 %5531  ;;  %v5519_v20 = vunpack.i.h.bf16 %v5517_v23  ;;  %v5518_v59 = vunpack.i.l.bf16 %v5517_v23 }
 0x39e   : > { %v5534_v28 = vunpack.i.h.bf16 %v5532_v31  ;;  %v5533_v1 = vunpack.i.l.bf16 %v5532_v31 }
 0x39f   : > { %v3825_v5 = vsel %vm1836_vm9, %v3793_v36, %v5518_v59  ;;  %v3826_v35 = vsel %vm1836_vm9, %v3794_v15, %v5519_v20 }
 0x3a0   : > { %v3848_v10 = vpack.c.bf16 %v3826_v35, %v3825_v5  ;;  %v5527_v22 = vpop.permute.xlu1 %5526  ;;  %v3731_v41 = vsel %vm1737_vm6, %v3699_v37, %v5533_v1  ;;  %v3732_v38 = vsel %vm1737_vm6, %v3700_v50, %v5534_v28 }
 0x3a1   : > { %v5542_v3 = vpop.permute.xlu0 %5541  ;;  %v5529_v2 = vunpack.i.h.bf16 %v5527_v22  ;;  %v5528_v19 = vunpack.i.l.bf16 %v5527_v22 }
 0x3a2   : > { %4356 = vmatmul.mubr.msk.bf16.gmra.mxu1 %vm1905_vm10, %v3848_v10  ;;  %v5544_v51 = vunpack.i.h.bf16 %v5542_v3  ;;  %v5543_v33 = vunpack.i.l.bf16 %v5542_v3 }
 0x3a3   : > { %v3702_v13 = vsel %vm1704_vm5, %v8225_v40, %v5529_v2  ;;  %v3701_v30 = vsel %vm1704_vm5, %v8222_v21, %v5528_v19 }
 0x3a4   : > { %v5537_v46 = vpop.permute.xlu1 %5536  ;;  %v3763_v39 = vsel %vm1770_vm7, %v3731_v41, %v5543_v33  ;;  %v3764_v44 = vsel %vm1770_vm7, %v3732_v38, %v5544_v51 }
 0x3a5   : > { %v5552_v54 = vpop.permute.xlu0 %5551  ;;  %v5539_v18 = vunpack.i.h.bf16 %v5537_v46  ;;  %v5538_v26 = vunpack.i.l.bf16 %v5537_v46 }
 0x3a6   : > { %v5554_v42 = vunpack.i.h.bf16 %v5552_v54  ;;  %v5553_v58 = vunpack.i.l.bf16 %v5552_v54 }
 0x3a7   : > { %v3733_v34 = vsel %vm1737_vm6, %v3701_v30, %v5538_v26  ;;  %v3734_v31 = vsel %vm1737_vm6, %v3702_v13, %v5539_v18 }
 0x3a8   : > { %v5547_v29 = vpop.permute.xlu1 %5546  ;;  %v3795_v55 = vsel %vm1803_vm8, %v3763_v39, %v5553_v58  ;;  %v3796_v12 = vsel %vm1803_vm8, %v3764_v44, %v5554_v42 }
 0x3a9   : > { %v5562_v61 = vpop.permute.xlu0 %5561  ;;  %v5549_v9 = vunpack.i.h.bf16 %v5547_v29  ;;  %v5548_v17 = vunpack.i.l.bf16 %v5547_v29 }
 0x3aa   : > { %v5564_v11 = vunpack.i.h.bf16 %v5562_v61  ;;  %v5563_v57 = vunpack.i.l.bf16 %v5562_v61 }
 0x3ab   : > { %v3765_v27 = vsel %vm1770_vm7, %v3733_v34, %v5548_v17  ;;  %v3766_v23 = vsel %vm1770_vm7, %v3734_v31, %v5549_v9 }
 0x3ac   : > { %v3827_v43 = vsel %vm1836_vm9, %v3795_v55, %v5563_v57  ;;  %v3828_v48 = vsel %vm1836_vm9, %v3796_v12, %v5564_v11  ;;  %v5557_v4 = vpop.permute.xlu1 %5556 }
 0x3ad   : > { %v3849_v8 = vpack.c.bf16 %v3828_v48, %v3827_v43  ;;  %v5572_v63 = vpop.permute.xlu0 %5571  ;;  %v5559_v56 = vunpack.i.h.bf16 %v5557_v4  ;;  %v5558_v47 = vunpack.i.l.bf16 %v5557_v4 }
 0x3ae   : > { %v5574_v35 = vunpack.i.h.bf16 %v5572_v63  ;;  %v5573_v3 = vunpack.i.l.bf16 %v5572_v63 }
 0x3af   : > { %4359 = vmatprep.mubr.msk.bf16.mxu1 %vm1905_vm10, %v3849_v8  ;;  %v3797_v20 = vsel %vm1803_vm8, %v3765_v27, %v5558_v47  ;;  %v3798_v59 = vsel %vm1803_vm8, %v3766_v23, %v5559_v56 }
 0x3b0   : > { %v5567_v45 = vpop.permute.xlu1 %5566  ;;  %v3704_v33 = vsel %vm1704_vm5, %v8243_v53, %v5574_v35  ;;  %v3703_v46 = vsel %vm1704_vm5, %v8247_v24, %v5573_v3 }
 0x3b1   : > { %v5582_v16 = vpop.permute.xlu0 %5581  ;;  %v5569_v14 = vunpack.i.h.bf16 %v5567_v45  ;;  %v5568_v0 = vunpack.i.l.bf16 %v5567_v45 }
 0x3b2   : > { %v5584_v10 = vunpack.i.h.bf16 %v5582_v16  ;;  %v5583_v22 = vunpack.i.l.bf16 %v5582_v16 }
 0x3b3   : > { %v3829_v40 = vsel %vm1836_vm9, %v3797_v20, %v5568_v0  ;;  %v3830_v21 = vsel %vm1836_vm9, %v3798_v59, %v5569_v14 }
 0x3b4   : > { %v3850_v15 = vpack.c.bf16 %v3830_v21, %v3829_v40  ;;  %v5577_v5 = vpop.permute.xlu1 %5576  ;;  %v3735_v42 = vsel %vm1737_vm6, %v3703_v46, %v5583_v22  ;;  %v3736_v58 = vsel %vm1737_vm6, %v3704_v33, %v5584_v10  ;;  %v8440_v33 = vld [vmem:[%s5957_s18 + $0x30] sm:$0xff]  ;;  %v8446_v46 = vld [vmem:[%s5957_s18 + $0x38] sm:$0xff] }
 0x3b5   : > { %v5592_v36 = vpop.permute.xlu0 %5591  ;;  %v5579_v57 = vunpack.i.h.bf16 %v5577_v5  ;;  %v5578_v29 = vunpack.i.l.bf16 %v5577_v5 }
 0x3b6   : > { %4360 = vmatmul.mubr.msk.bf16.gmra.mxu1 %vm1905_vm10, %v3850_v15  ;;  %v5594_v52 = vunpack.i.h.bf16 %v5592_v36  ;;  %v5593_v28 = vunpack.i.l.bf16 %v5592_v36 }
 0x3b7   : > { %v3706_v26 = vsel %vm1704_vm5, %v8260_v49, %v5579_v57  ;;  %v3705_v4 = vsel %vm1704_vm5, %v8257_v7, %v5578_v29  ;;  %v8485_v57 = vld [vmem:[%s5957_s18 + $0x88] sm:$0xff]  ;;  %v8488_v29 = vld [vmem:[%s5957_s18 + $0xb0] sm:$0xff] }
 0x3b8   : > { %v5587_v1 = vpop.permute.xlu1 %5586  ;;  %v3767_v37 = vsel %vm1770_vm7, %v3735_v42, %v5593_v28  ;;  %v3768_v41 = vsel %vm1770_vm7, %v3736_v58, %v5594_v52  ;;  %v8449_v42 = vld [vmem:[%s5957_s18 + $0x28] sm:$0xff]  ;;  %v8452_v58 = vld [vmem:[%s5957_s18 + $0x50] sm:$0xff] }
 0x3b9   : > { %v5602_v62 = vpop.permute.xlu0 %5601  ;;  %v5589_v43 = vunpack.i.h.bf16 %v5587_v1  ;;  %v5588_v48 = vunpack.i.l.bf16 %v5587_v1 }
 0x3ba   : > { %v5604_v54 = vunpack.i.h.bf16 %v5602_v62  ;;  %v5603_v51 = vunpack.i.l.bf16 %v5602_v62  ;;  %v2240_v62 = vld [vmem:[%s5957_s18 + $0x10] sm:$0xff] }
 0x3bb   : > { %v3737_v17 = vsel %vm1737_vm6, %v3705_v4, %v5588_v48  ;;  %v3738_v56 = vsel %vm1737_vm6, %v3706_v26, %v5589_v43  ;;  %v8497_v43 = vld [vmem:[%s5957_s18 + $0xa8] sm:$0xff]  ;;  %v8500_v48 = vld [vmem:[%s5957_s18 + $0xd0] sm:$0xff]  ;;  %v8508_v4 = vld [vmem:[%s5957_s18 + $0xd8] sm:$0xff] }
 0x3bc   : > { %v5597_v39 = vpop.permute.xlu1 %5596  ;;  %v3799_v44 = vsel %vm1803_vm8, %v3767_v37, %v5603_v51  ;;  %v3800_v11 = vsel %vm1803_vm8, %v3768_v41, %v5604_v54  ;;  %v2238_v54 = vld [vmem:[%s5957_s18] sm:$0xff]  ;;  %v2241_v51 = vld [vmem:[%s5957_s18 + $0x18] sm:$0xff]  ;;  %v8461_v41 = vld [vmem:[%s5957_s18 + $0x48] sm:$0xff] }
 0x3bd   : > { %v5612_v50 = vpop.permute.xlu0 %5611  ;;  %v5599_v19 = vunpack.i.h.bf16 %v5597_v39  ;;  %v5598_v8 = vunpack.i.l.bf16 %v5597_v39  ;;  %v8458_v37 = vld [vmem:[%s5957_s18 + $0x58] sm:$0xff] }
 0x3be   : > { %v5614_v38 = vunpack.i.h.bf16 %v5612_v50  ;;  %v5613_v61 = vunpack.i.l.bf16 %v5612_v50  ;;  %v8455_v50 = vld [vmem:[%s5957_s18 + $0x40] sm:$0xff]  ;;  %v8470_v39 = vld [vmem:[%s5957_s18 + $0x78] sm:$0xff] }
 0x3bf   : > { %v3769_v13 = vsel %vm1770_vm7, %v3737_v17, %v5598_v8  ;;  %v3770_v30 = vsel %vm1770_vm7, %v3738_v56, %v5599_v19  ;;  %v8514_v17 = vld [vmem:[%s5957_s18 + $0xf0] sm:$0xff] }
 0x3c0   : > { %v3831_v53 = vsel %vm1836_vm9, %v3799_v44, %v5613_v61  ;;  %v3832_v24 = vsel %vm1836_vm9, %v3800_v11, %v5614_v38  ;;  %v5607_v2 = vpop.permute.xlu1 %5606  ;;  %v8464_v38 = vld [vmem:[%s5957_s18 + $0x70] sm:$0xff]  ;;  %v8467_v61 = vld [vmem:[%s5957_s18 + $0x60] sm:$0xff]  ;;  %v8473_v44 = vld [vmem:[%s5957_s18 + $0x68] sm:$0xff] }
 0x3c1   : > { %v3851_v55 = vpack.c.bf16 %v3832_v24, %v3831_v53  ;;  %v5622_v12 = vpop.permute.xlu0 %5621  ;;  %v5609_v63 = vunpack.i.h.bf16 %v5607_v2  ;;  %v5608_v18 = vunpack.i.l.bf16 %v5607_v2  ;;  %v8476_v11 = vld [vmem:[%s5957_s18 + $0x90] sm:$0xff]  ;;  %v8479_v53 = vld [vmem:[%s5957_s18 + $0x80] sm:$0xff]  ;;  %v8482_v24 = vld [vmem:[%s5957_s18 + $0x98] sm:$0xff] }
 0x3c2   : > { %v5624_v0 = vunpack.i.h.bf16 %v5622_v12  ;;  %v5623_v20 = vunpack.i.l.bf16 %v5622_v12  ;;  %v8494_v12 = vld [vmem:[%s5957_s18 + $0xb8] sm:$0xff]  ;;  %v8503_v2 = vld [vmem:[%s5957_s18 + $0xc0] sm:$0xff] }
 0x3c3   : > { %4363 = vmatprep.mubr.msk.bf16.mxu1 %vm1905_vm10, %v3851_v55  ;;  %v3801_v31 = vsel %vm1803_vm8, %v3769_v13, %v5608_v18  ;;  %v3802_v45 = vsel %vm1803_vm8, %v3770_v30, %v5609_v63  ;;  %v8491_v55 = vld [vmem:[%s5957_s18 + $0xa0] sm:$0xff] }
 0x3c4   : > { %v5617_v47 = vpop.permute.xlu1 %5616  ;;  %v3707_v10 = vsel %vm1704_vm5, %v8283_v6, %v5623_v20  ;;  %v3708_v22 = vsel %vm1704_vm5, %v8280_v32, %v5624_v0  ;;  %v8437_v6 = vld [vmem:[%s5957_s18 + $0x8] sm:$0xff]  ;;  %v8443_v32 = vld [vmem:[%s5957_s18 + $0x20] sm:$0xff] }
 0x3c5   : > { %v5632_v9 = vpop.permute.xlu0 %5631  ;;  %v5619_v16 = vunpack.i.h.bf16 %v5617_v47  ;;  %v5618_v34 = vunpack.i.l.bf16 %v5617_v47  ;;  %v8526_v30 = vld [vmem:[%s5957_s18 + $0xe0] sm:$0xff] }
 0x3c6   : > { %v5634_v59 = vunpack.i.h.bf16 %v5632_v9  ;;  %v5633_v40 = vunpack.i.l.bf16 %v5632_v9  ;;  %v8511_v9 = vld [vmem:[%s5957_s18 + $0xc8] sm:$0xff] }
 0x3c7   : > { %v3833_v49 = vsel %vm1836_vm9, %v3801_v31, %v5618_v34  ;;  %v3834_v7 = vsel %vm1836_vm9, %v3802_v45, %v5619_v16  ;;  %v8529_v16 = vld [vmem:[%s5957_s18 + $0xf8] sm:$0xff]  ;;  %v8532_v34 = vld [vmem:[%s5957_s18 + $0xe8] sm:$0xff] }
 0x3c8   : > { %v3852_v23 = vpack.c.bf16 %v3834_v7, %v3833_v49  ;;  %v8422_v14 = vpop.permute.xlu1 %5626  ;;  %v3739_v52 = vsel %vm1737_vm6, %v3707_v10, %v5633_v40  ;;  %v3740_v28 = vsel %vm1737_vm6, %v3708_v22, %v5634_v59 }
 0x3c9   : > { %v5642_v27 = vpop.permute.xlu0 %5641  ;;  %v5629_v7 = vunpack.i.h.bf16 %v8422_v14 }
 0x3ca   : > { %4364 = vmatmul.mubr.msk.bf16.gmra.mxu1 %vm1905_vm10, %v3852_v23  ;;  %v5644_v36 = vunpack.i.h.bf16 %v5642_v27  ;;  %v5643_v15 = vunpack.i.l.bf16 %v5642_v27  ;;  %v5628_v27 = vunpack.i.l.bf16 %v8422_v14 }
 0x3cc   : > { %v8425_v5 = vpop.permute.xlu1 %5636  ;;  %v3771_v19 = vsel %vm1770_vm7, %v3739_v52, %v5643_v15  ;;  %v3772_v8 = vsel %vm1770_vm7, %v3740_v28, %v5644_v36  ;;  %v3709_v14 = vsel %vm1704_vm5, %v8301_v25, %v5628_v27 }
 0x3cd   : > { %v5652_v21 = vpop.permute.xlu0 %5651  ;;  %v5639_v20 = vunpack.i.h.bf16 %v8425_v5  ;;  %v5638_v59 = vunpack.i.l.bf16 %v8425_v5  ;;  %v3710_v5 = vsel %vm1704_vm5, %v8304_v60, %v5629_v7 }
 0x3ce   : > { %v5654_v35 = vunpack.i.h.bf16 %v5652_v21  ;;  %v5653_v3 = vunpack.i.l.bf16 %v5652_v21 }
 0x3cf   : > { %v3741_v52 = vsel %vm1737_vm6, %v3709_v14, %v5638_v59  ;;  %v3742_v28 = vsel %vm1737_vm6, %v3710_v5, %v5639_v20 }
 0x3d0   : > { %v5647_v26 = vpop.permute.xlu1 %5646  ;;  %v3803_v56 = vsel %vm1803_vm8, %v3771_v19, %v5653_v3  ;;  %v3804_v47 = vsel %vm1803_vm8, %v3772_v8, %v5654_v35 }
 0x3d1   : > { %v5662_v1 = vpop.permute.xlu0 %5661  ;;  %v5649_v36 = vunpack.i.h.bf16 %v5647_v26  ;;  %v5648_v15 = vunpack.i.l.bf16 %v5647_v26 }
 0x3d2   : > { %v5664_v63 = vunpack.i.h.bf16 %v5662_v1  ;;  %v5663_v18 = vunpack.i.l.bf16 %v5662_v1  ;;  %v4341_v13 = vpop.f32.mrf.mxu1 }
 0x3d3   : > { %v4089_v49 = vadd.f32 %v4341_v13, %v2240_v62  ;;  %v3774_v19 = vsel %vm1770_vm7, %v3742_v28, %v5649_v36 }
 0x3d4   : > { %v3835_v31 = vsel %vm1836_vm9, %v3803_v56, %v5663_v18  ;;  %v3836_v45 = vsel %vm1836_vm9, %v3804_v47, %v5664_v63  ;;  %v3960_v0 = vpop.f32.mrf.mxu1  ;;  %v5657_v21 = vpop.permute.xlu1 %5656 }
 0x3d5   : > { %v3853_v23 = vpack.c.bf16 %v3836_v45, %v3835_v31  ;;  %v4087_v40 = vadd.f32 %v3960_v0, %v2238_v54  ;;  %4121 = vst.msk [vmem:[%s8521_s17 + $0x10] sm:$0xff] %vm172_vm0, %v4089_v49  ;;  %v5659_v3 = vunpack.i.h.bf16 %v5657_v21  ;;  %v5658_v10 = vunpack.i.l.bf16 %v5657_v21 }
 0x3d6   : > { %v4342_v35 = vpop.f32.mrf.mxu1 }
 0x3d7   : > { %4367 = vmatprep.mubr.msk.bf16.mxu1 %vm1905_vm10, %v3853_v23  ;;  %v4090_v22 = vadd.f32 %v4342_v35, %v2241_v51  ;;  %4119 = vst.msk [vmem:[%s8521_s17] sm:$0xff] %vm172_vm0, %v4087_v40  ;;  %v3773_v51 = vsel %vm1770_vm7, %v3741_v52, %v5648_v15  ;;  %v3806_v63 = vsel %vm1803_vm8, %v3774_v19, %v5659_v3 }
 0x3d8   : > { %v3963_v62 = vpop.f32.mrf.mxu1  ;;  %v5667_v54 = vpop.permute.xlu1 %5666  ;;  %v3805_v60 = vsel %vm1803_vm8, %v3773_v51, %v5658_v10 }
 0x3d9   : > { %v4088_v1 = vadd.f32 %v3963_v62, %v8437_v6  ;;  %4122 = vst.msk [vmem:[%s8521_s17 + $0x18] sm:$0xff] %vm172_vm0, %v4090_v22  ;;  %v5669_v8 = vunpack.i.h.bf16 %v5667_v54  ;;  %v5668_v25 = vunpack.i.l.bf16 %v5667_v54 }
 0x3db   : > { %4120 = vst.msk [vmem:[%s8521_s17 + $0x8] sm:$0xff] %vm172_vm0, %v4088_v1  ;;  %v3837_v6 = vsel %vm1836_vm9, %v3805_v60, %v5668_v25  ;;  %v3838_v18 = vsel %vm1836_vm9, %v3806_v63, %v5669_v8 }
 0x3dc   : > { %v3854_v26 = vpack.c.bf16 %v3838_v18, %v3837_v6 }
 0x3de   : > { %4368 = vmatmul.mubr.msk.bf16.gmra.mxu1 %vm1905_vm10, %v3854_v26 }
 0x3f2   : > { %v4345_v56 = vpop.f32.mrf.mxu1 }
 0x3f3   : > { %v4093_v47 = vadd.f32 %v4345_v56, %v8440_v33 }
 0x3f4   : > { %v3976_v13 = vpop.f32.mrf.mxu1 }
 0x3f5   : > { %v4091_v31 = vadd.f32 %v3976_v13, %v8443_v32  ;;  %4125 = vst.msk [vmem:[%s8521_s17 + $0x30] sm:$0xff] %vm172_vm0, %v4093_v47 }
 0x3f6   : > { %v4346_v45 = vpop.f32.mrf.mxu1 }
 0x3f7   : > { %v4094_v49 = vadd.f32 %v4346_v45, %v8446_v46  ;;  %4123 = vst.msk [vmem:[%s8521_s17 + $0x20] sm:$0xff] %vm172_vm0, %v4091_v31 }
 0x3f8   : > { %v3979_v7 = vpop.f32.mrf.mxu1 }
 0x3f9   : > { %v4092_v27 = vadd.f32 %v3979_v7, %v8449_v42  ;;  %4126 = vst.msk [vmem:[%s8521_s17 + $0x38] sm:$0xff] %vm172_vm0, %v4094_v49 }
 0x3fb   : > { %4124 = vst.msk [vmem:[%s8521_s17 + $0x28] sm:$0xff] %vm172_vm0, %v4092_v27 }
 0x43a   : > { %v4349_v33 = vpop.f32.mrf.mxu1 }
 0x43b   : > { %v4097_v32 = vadd.f32 %v4349_v33, %v8452_v58 }
 0x43c   : > { %v3992_v23 = vpop.f32.mrf.mxu1 }
 0x43d   : > { %v4095_v0 = vadd.f32 %v3992_v23, %v8455_v50  ;;  %4129 = vst.msk [vmem:[%s8521_s17 + $0x50] sm:$0xff] %vm172_vm0, %v4097_v32 }
 0x43e   : > { %v4350_v46 = vpop.f32.mrf.mxu1 }
 0x43f   : > { %v4098_v20 = vadd.f32 %v4350_v46, %v8458_v37  ;;  %4127 = vst.msk [vmem:[%s8521_s17 + $0x40] sm:$0xff] %vm172_vm0, %v4095_v0 }
 0x440   : > { %v3995_v42 = vpop.f32.mrf.mxu1 }
 0x441   : > { %v4096_v59 = vadd.f32 %v3995_v42, %v8461_v41  ;;  %4130 = vst.msk [vmem:[%s8521_s17 + $0x58] sm:$0xff] %vm172_vm0, %v4098_v20 }
 0x443   : > { %4128 = vst.msk [vmem:[%s8521_s17 + $0x48] sm:$0xff] %vm172_vm0, %v4096_v59 }
 0x44e   : > { %v4353_v58 = vpop.f32.mrf.mxu1 }
 0x44f   : > { %v4101_v50 = vadd.f32 %v4353_v58, %v8464_v38 }
 0x450   : > { %v4008_v40 = vpop.f32.mrf.mxu1 }
 0x451   : > { %v4099_v21 = vadd.f32 %v4008_v40, %v8467_v61  ;;  %4133 = vst.msk [vmem:[%s8521_s17 + $0x70] sm:$0xff] %vm172_vm0, %v4101_v50 }
 0x452   : > { %v4354_v37 = vpop.f32.mrf.mxu1 }
 0x453   : > { %v4102_v36 = vadd.f32 %v4354_v37, %v8470_v39  ;;  %4131 = vst.msk [vmem:[%s8521_s17 + $0x60] sm:$0xff] %vm172_vm0, %v4099_v21 }
 0x454   : > { %v4011_v41 = vpop.f32.mrf.mxu1 }
 0x455   : > { %v4100_v15 = vadd.f32 %v4011_v41, %v8473_v44  ;;  %4134 = vst.msk [vmem:[%s8521_s17 + $0x78] sm:$0xff] %vm172_vm0, %v4102_v36 }
 0x457   : > { %4132 = vst.msk [vmem:[%s8521_s17 + $0x68] sm:$0xff] %vm172_vm0, %v4100_v15 }
 0x462   : > { %v4357_v38 = vpop.f32.mrf.mxu1 }
 0x463   : > { %v4105_v61 = vadd.f32 %v4357_v38, %v8476_v11 }
 0x464   : > { %v4024_v35 = vpop.f32.mrf.mxu1 }
 0x465   : > { %v4103_v3 = vadd.f32 %v4024_v35, %v8479_v53  ;;  %4137 = vst.msk [vmem:[%s8521_s17 + $0x90] sm:$0xff] %vm172_vm0, %v4105_v61 }
 0x466   : > { %v4358_v39 = vpop.f32.mrf.mxu1 }
 0x467   : > { %v4106_v10 = vadd.f32 %v4358_v39, %v8482_v24  ;;  %4135 = vst.msk [vmem:[%s8521_s17 + $0x80] sm:$0xff] %vm172_vm0, %v4103_v3 }
 0x468   : > { %v4027_v44 = vpop.f32.mrf.mxu1 }
 0x469   : > { %v4104_v22 = vadd.f32 %v4027_v44, %v8485_v57  ;;  %4138 = vst.msk [vmem:[%s8521_s17 + $0x98] sm:$0xff] %vm172_vm0, %v4106_v10 }
 0x46b   : > { %4136 = vst.msk [vmem:[%s8521_s17 + $0x88] sm:$0xff] %vm172_vm0, %v4104_v22 }
 0x476   : > { %v4361_v11 = vpop.f32.mrf.mxu1 }
 0x477   : > { %v4109_v53 = vadd.f32 %v4361_v11, %v8488_v29 }
 0x478   : > { %v4040_v14 = vpop.f32.mrf.mxu1 }
 0x479   : > { %v4107_v5 = vadd.f32 %v4040_v14, %v8491_v55  ;;  %4141 = vst.msk [vmem:[%s8521_s17 + $0xb0] sm:$0xff] %vm172_vm0, %v4109_v53 }
 0x47a   : > { %v4362_v24 = vpop.f32.mrf.mxu1 }
 0x47b   : > { %v4110_v62 = vadd.f32 %v4362_v24, %v8494_v12  ;;  %4139 = vst.msk [vmem:[%s8521_s17 + $0xa0] sm:$0xff] %vm172_vm0, %v4107_v5 }
 0x47c   : > { %v4043_v57 = vpop.f32.mrf.mxu1 }
 0x47d   : > { %v4108_v52 = vadd.f32 %v4043_v57, %v8497_v43  ;;  %4142 = vst.msk [vmem:[%s8521_s17 + $0xb8] sm:$0xff] %vm172_vm0, %v4110_v62 }
 0x47f   : > { %4140 = vst.msk [vmem:[%s8521_s17 + $0xa8] sm:$0xff] %vm172_vm0, %v4108_v52 }
 0x48a   : > { %v4365_v29 = vpop.f32.mrf.mxu1 }
 0x48b   : > { %v4113_v55 = vadd.f32 %v4365_v29, %v8500_v48 }
 0x48c   : > { %v4056_v28 = vpop.f32.mrf.mxu1 }
 0x48d   : > { %v4111_v1 = vadd.f32 %v4056_v28, %v8503_v2  ;;  %4145 = vst.msk [vmem:[%s8521_s17 + $0xd0] sm:$0xff] %vm172_vm0, %v4113_v55 }
 0x48e   : > { %v4366_v12 = vpop.f32.mrf.mxu1 }
 0x48f   : > { %v4114_v54 = vadd.f32 %v4366_v12, %v8508_v4  ;;  %4143 = vst.msk [vmem:[%s8521_s17 + $0xc0] sm:$0xff] %vm172_vm0, %v4111_v1 }
 0x490   : > { %v4059_v43 = vpop.f32.mrf.mxu1 }
 0x491   : > { %v4112_v51 = vadd.f32 %v4059_v43, %v8511_v9  ;;  %4146 = vst.msk [vmem:[%s8521_s17 + $0xd8] sm:$0xff] %vm172_vm0, %v4114_v54 }
 0x493   : > { %4144 = vst.msk [vmem:[%s8521_s17 + $0xc8] sm:$0xff] %vm172_vm0, %v4112_v51 }
 0x49e   : > { %v4369_v48 = vpop.f32.mrf.mxu1 }
 0x49f   : > { %v4117_v2 = vadd.f32 %v4369_v48, %v8514_v17 }
 0x4a0   : > { %v4072_v19 = vpop.f32.mrf.mxu1 }
 0x4a1   : > { %v4115_v8 = vadd.f32 %v4072_v19, %v8526_v30  ;;  %4149 = vst.msk [vmem:[%s8521_s17 + $0xf0] sm:$0xff] %vm172_vm0, %v4117_v2 }
 0x4a2   : > { %v4370_v4 = vpop.f32.mrf.mxu1 }
 0x4a3   : > { %v4118_v25 = vadd.f32 %v4370_v4, %v8529_v16  ;;  %4147 = vst.msk [vmem:[%s8521_s17 + $0xe0] sm:$0xff] %vm172_vm0, %v4115_v8 }
 0x4a4   : > { %v4075_v60 = vpop.f32.mrf.mxu1 }
 0x4a5   : > { %v4116_v9 = vadd.f32 %v4075_v60, %v8532_v34  ;;  %4150 = vst.msk [vmem:[%s8521_s17 + $0xf8] sm:$0xff] %vm172_vm0, %v4118_v25 }
 0x4a7   : > { %4148 = vst.msk [vmem:[%s8521_s17 + $0xe8] sm:$0xff] %vm172_vm0, %v4116_v9 }
 0x4a8 PF: > { %s13_s12 = sadd.s32 1, %s5684_s12  }
 0x4a9   : > { %p10_p4 = scmp.ge.s32.totalorder %s13_s12, 4  }
 0x4ab   :  { %12 = sbr.rel (!%p10_p4) target bundleno = 1 (0x1), region = 66 }

</bundles_post_ra>
